<compile_context>
chip_gen: v6e
topology: v6e:2x2x1
jax: 0.10.0
libtpu: 0.0.40
codegen_flags: <defaults>
</compile_context>

<pallas_src>
import jax
import jax.numpy as jnp
from jax.experimental import pallas as pl
from jax.experimental.pallas import tpu as pltpu

BN_EPS = 1e-5


def _round_up(x, m):
    return ((x + m - 1) // m) * m


def _pick_row_tile(h, w, target_rows=512):
    """Largest divisor `th` of h with th*w <= target_rows (so the matmul has
    ~512 M-rows per tile)."""
    best = 1
    for th in range(1, h + 1):
        if h % th == 0 and th * w <= max(target_rows, w):
            best = th
    return best


# ---------------------------------------------------------------------------
# Pass 1 kernel: 3x3 conv (single K=9*Cin matmul) + bias, plus per-tile
# BatchNorm partial statistics (sum, sum of squares per channel).
# ---------------------------------------------------------------------------
def _conv_stats_kernel(x_ref, w_ref, b_ref, out_ref, stats_ref):
    # x_ref:     (1, th+2, W+2, Cin_pad)  bf16  (haloed input tile)
    # w_ref:     (9*Cin_pad, Cout_pad)    bf16
    # b_ref:     (1, Cout_pad)            f32
    # out_ref:   (1, th*W, Cout_pad)      f32   conv + bias
    # stats_ref: (1, 2, Cout_pad)         f32   [sum, sumsq] over this tile
    xt = x_ref[0]                                   # (th+2, W+2, Cin_pad)
    thp2, wp2, _ = xt.shape
    th, w = thp2 - 2, wp2 - 2

    # Build the patch matrix from 9 shifted VMEM views (no HBM im2col).
    taps = [xt[dy:dy + th, dx:dx + w, :]            # (th, w, Cin_pad)
            for dy in range(3) for dx in range(3)]
    patch = jnp.concatenate(taps, axis=-1)          # (th, w, 9*Cin_pad)
    patch = patch.reshape(th * w, patch.shape[-1])  # (M_tile, K)

    # One MXU matmul, f32 accumulation.
    acc = jnp.dot(patch, w_ref[...], preferred_element_type=jnp.float32)
    acc = acc + b_ref[...]                          # (M_tile, Cout_pad)

    out_ref[0] = acc
    s = jnp.sum(acc, axis=0, keepdims=True)
    ss = jnp.sum(acc * acc, axis=0, keepdims=True)
    stats_ref[0] = jnp.concatenate([s, ss], axis=0)  # (2, Cout_pad)


# ---------------------------------------------------------------------------
# Pass 2 kernel: y = relu(x * scale + shift)   (per-channel affine)
# ---------------------------------------------------------------------------
def _bn_relu_kernel(x_ref, scale_ref, shift_ref, o_ref):
    o_ref[...] = jnp.maximum(x_ref[...] * scale_ref[...] + shift_ref[...], 0.0)


# ---------------------------------------------------------------------------
# Fused Conv3x3 + BatchNorm2d (training-mode batch stats) + ReLU layer
# ---------------------------------------------------------------------------
def conv3x3_bn_relu(x_nhwc, w, b, gamma, beta):
    """x_nhwc: (N,H,W,Cin) f32; w: (3,3,Cin,Cout); b/gamma/beta: (Cout,)."""
    n, h, wd, cin = x_nhwc.shape
    cout = w.shape[-1]

    cin_p = _round_up(cin, 8)       # sublane-friendly K chunks
    cout_p = _round_up(cout, 128)   # lane-dense output stores
    th = _pick_row_tile(h, wd)
    nt = h // th
    m_tile = th * wd
    m_total = n * h * wd
    k = 9 * cin_p

    # --- host-side (plain JAX) prep: channel pad, spatial pad, haloed tiles ---
    x_c = jnp.pad(x_nhwc, ((0, 0), (0, 0), (0, 0), (0, cin_p - cin)))
    xp = jnp.pad(x_c, ((0, 0), (1, 1), (1, 1), (0, 0)))          # (n, h+2, w+2, cin_p)
    tiles = jnp.concatenate(
        [xp[:, t * th: t * th + th + 2][:, None] for t in range(nt)], axis=1)
    tiles = tiles.reshape(n * nt, th + 2, wd + 2, cin_p).astype(jnp.bfloat16)

    w_p = jnp.pad(w, ((0, 0), (0, 0), (0, cin_p - cin), (0, cout_p - cout)))
    wmat = w_p.reshape(k, cout_p).astype(jnp.bfloat16)           # tap-major, Cin fastest
    b_p = jnp.pad(b, (0, cout_p - cout)).reshape(1, cout_p).astype(jnp.float32)

    # --- pass 1: conv + bias + per-tile BN stats -----------------------------
    conv_flat, stats = pl.pallas_call(
        _conv_stats_kernel,
        grid=(n * nt,),
        in_specs=[
            pl.BlockSpec((1, th + 2, wd + 2, cin_p), lambda i: (i, 0, 0, 0)),
            pl.BlockSpec((k, cout_p), lambda i: (0, 0)),
            pl.BlockSpec((1, cout_p), lambda i: (0, 0)),
        ],
        out_specs=[
            pl.BlockSpec((1, m_tile, cout_p), lambda i: (i, 0, 0)),
            pl.BlockSpec((1, 2, cout_p), lambda i: (i, 0, 0)),
        ],
        out_shape=[
            jax.ShapeDtypeStruct((n * nt, m_tile, cout_p), jnp.float32),
            jax.ShapeDtypeStruct((n * nt, 2, cout_p), jnp.float32),
        ],
        compiler_params=pltpu.CompilerParams(dimension_semantics=("parallel",)),
        cost_estimate=pl.CostEstimate(
            flops=2 * m_total * k * cout_p,
            transcendentals=0,
            bytes_accessed=(tiles.size * 2 + wmat.size * 2
                            + m_total * cout_p * 4 + n * nt * 2 * cout_p * 4),
        ),
    )(tiles, wmat, b_p)

    # --- tiny JAX reduction: fold per-tile stats into BN scale/shift ---------
    s = jnp.sum(stats, axis=0)                        # (2, cout_p)
    mean = s[0] / m_total
    var = jnp.maximum(s[1] / m_total - mean * mean, 0.0)   # biased variance
    inv = jax.lax.rsqrt(var + BN_EPS)
    gamma_p = jnp.pad(gamma, (0, cout_p - cout))
    beta_p = jnp.pad(beta, (0, cout_p - cout))
    scale = (gamma_p * inv).reshape(1, cout_p).astype(jnp.float32)
    shift = (beta_p - mean * gamma_p * inv).reshape(1, cout_p).astype(jnp.float32)

    # --- pass 2: normalize + ReLU (lane-dense elementwise) --------------------
    conv2d = conv_flat.reshape(m_total, cout_p)
    blk = m_tile if (m_tile % 8 == 0) else m_total
    y = pl.pallas_call(
        _bn_relu_kernel,
        grid=(m_total // blk,),
        in_specs=[
            pl.BlockSpec((blk, cout_p), lambda i: (i, 0)),
            pl.BlockSpec((1, cout_p), lambda i: (0, 0)),
            pl.BlockSpec((1, cout_p), lambda i: (0, 0)),
        ],
        out_specs=pl.BlockSpec((blk, cout_p), lambda i: (i, 0)),
        out_shape=jax.ShapeDtypeStruct((m_total, cout_p), jnp.float32),
        compiler_params=pltpu.CompilerParams(dimension_semantics=("parallel",)),
    )(conv2d, scale, shift)

    return y[:, :cout].reshape(n, h, wd, cout)


# ---------------------------------------------------------------------------
# Bilinear 2x upsample == nn.Upsample(scale_factor=2, mode='bilinear',
# align_corners=False): separable 0.75/0.25 blend with edge clamping.
# ---------------------------------------------------------------------------
def upsample2x_bilinear_nhwc(x):
    n, h, w, c = x.shape
    # along H
    x_prev = jnp.concatenate([x[:, :1], x[:, :-1]], axis=1)
    x_next = jnp.concatenate([x[:, 1:], x[:, -1:]], axis=1)
    even = 0.75 * x + 0.25 * x_prev
    odd = 0.75 * x + 0.25 * x_next
    x = jnp.stack([even, odd], axis=2).reshape(n, 2 * h, w, c)
    # along W
    x_prev = jnp.concatenate([x[:, :, :1], x[:, :, :-1]], axis=2)
    x_next = jnp.concatenate([x[:, :, 1:], x[:, :, -1:]], axis=2)
    even = 0.75 * x + 0.25 * x_prev
    odd = 0.75 * x + 0.25 * x_next
    x = jnp.stack([even, odd], axis=3).reshape(n, 2 * h, 2 * w, c)
    return x


# ---------------------------------------------------------------------------
# SegnetDec forward
# ---------------------------------------------------------------------------
def init_segnet_dec_params(key, in_channels, out_channels):
    mid = in_channels // 2
    shapes = [(in_channels, mid), (mid, mid), (mid, out_channels)]
    params = []
    for i, (cin, cout) in enumerate(shapes):
        k_w, k_b, k_g, k_be = jax.random.split(jax.random.fold_in(key, i), 4)
        w = jax.random.normal(k_w, (3, 3, cin, cout), jnp.float32) * 0.1
        b = jax.random.normal(k_b, (cout,), jnp.float32) * 0.05
        gamma = 1.0 + 0.1 * jax.random.normal(k_g, (cout,), jnp.float32)
        beta = 0.05 * jax.random.normal(k_be, (cout,), jnp.float32)
        params.append((w, b, gamma, beta))
    return params


def segnet_dec_forward(x_nchw, params):
    # NCHW (PyTorch convention) -> NHWC for the TPU kernels.
    x = jnp.transpose(x_nchw, (0, 2, 3, 1)).astype(jnp.float32)
    x = upsample2x_bilinear_nhwc(x)
    for (w, b, gamma, beta) in params:
        x = conv3x3_bn_relu(x, w, b, gamma, beta)
    return jnp.transpose(x, (0, 3, 1, 2))


if __name__ == "__main__":
    key = jax.random.PRNGKey(0)
    k_x, k_p = jax.random.split(key)

    N, C_IN, H, W = 2, 4, 16, 16
    C_OUT = 4

    x = jax.random.normal(k_x, (N, C_IN, H, W), jnp.float32)
    params = init_segnet_dec_params(k_p, C_IN, C_OUT)

    fwd = jax.jit(segnet_dec_forward)
    out = jax.block_until_ready(fwd(x, params))

    assert out.shape == (N, C_OUT, 2 * H, 2 * W), out.shape
    assert bool(jnp.all(jnp.isfinite(out)))
    assert bool(jnp.all(out >= 0.0))  # ReLU output
    print("KERNEL_OK")
</pallas_src>

<mosaic_0001>
module attributes {stable_mosaic.version = 11 : i64} {
  func.func @_conv_stats_kernel(%arg0: i32, %arg1: memref<1x18x34x8xbf16, #tpu.memory_space<vmem>>, %arg2: memref<72x128xbf16, #tpu.memory_space<vmem>>, %arg3: memref<1x128xf32, #tpu.memory_space<vmem>>, %arg4: memref<1x512x128xf32, #tpu.memory_space<vmem>>, %arg5: memref<1x2x128xf32, #tpu.memory_space<vmem>>) attributes {dimension_semantics = [#tpu.dimension_semantics<parallel>], iteration_bounds = array<i64: 4>, scalar_prefetch = 0 : i64, scratch_operands = 0 : i64, tpu.core_type = #tpu.core_type<tc>, window_params = [{transform_indices = @transform_0, window_bounds = array<i64: 1, 18, 34, 8>}, {pipeline_mode = #tpu.pipeline_mode<synchronous>, transform_indices = @transform_1, window_bounds = array<i64: 72, 128>}, {pipeline_mode = #tpu.pipeline_mode<synchronous>, transform_indices = @transform_2, window_bounds = array<i64: 1, 128>}, {transform_indices = @transform_3, window_bounds = array<i64: 1, 512, 128>}, {transform_indices = @transform_4, window_bounds = array<i64: 1, 2, 128>}]} {
    %c0 = arith.constant 0 : index
    %c0_0 = arith.constant 0 : index
    %c0_1 = arith.constant 0 : index
    %c0_2 = arith.constant 0 : index
    %0 = vector.load %arg1[%c0, %c0_0, %c0_1, %c0_2] : memref<1x18x34x8xbf16, #tpu.memory_space<vmem>>, vector<1x18x34x8xbf16>
    %1 = vector.shape_cast %0 : vector<1x18x34x8xbf16> to vector<18x34x8xbf16>
    %2 = vector.extract_strided_slice %1 {offsets = [0, 0, 0], sizes = [16, 32, 8], strides = [1, 1, 1]} : vector<18x34x8xbf16> to vector<16x32x8xbf16>
    %3 = vector.extract_strided_slice %1 {offsets = [0, 1, 0], sizes = [16, 32, 8], strides = [1, 1, 1]} : vector<18x34x8xbf16> to vector<16x32x8xbf16>
    %4 = vector.extract_strided_slice %1 {offsets = [0, 2, 0], sizes = [16, 32, 8], strides = [1, 1, 1]} : vector<18x34x8xbf16> to vector<16x32x8xbf16>
    %5 = vector.extract_strided_slice %1 {offsets = [1, 0, 0], sizes = [16, 32, 8], strides = [1, 1, 1]} : vector<18x34x8xbf16> to vector<16x32x8xbf16>
    %6 = vector.extract_strided_slice %1 {offsets = [1, 1, 0], sizes = [16, 32, 8], strides = [1, 1, 1]} : vector<18x34x8xbf16> to vector<16x32x8xbf16>
    %7 = vector.extract_strided_slice %1 {offsets = [1, 2, 0], sizes = [16, 32, 8], strides = [1, 1, 1]} : vector<18x34x8xbf16> to vector<16x32x8xbf16>
    %8 = vector.extract_strided_slice %1 {offsets = [2, 0, 0], sizes = [16, 32, 8], strides = [1, 1, 1]} : vector<18x34x8xbf16> to vector<16x32x8xbf16>
    %9 = vector.extract_strided_slice %1 {offsets = [2, 1, 0], sizes = [16, 32, 8], strides = [1, 1, 1]} : vector<18x34x8xbf16> to vector<16x32x8xbf16>
    %10 = vector.extract_strided_slice %1 {offsets = [2, 2, 0], sizes = [16, 32, 8], strides = [1, 1, 1]} : vector<18x34x8xbf16> to vector<16x32x8xbf16>
    %11 = tpu.concatenate %2, %3, %4, %5, %6, %7, %8, %9, %10 in 2 : vector<16x32x8xbf16>, vector<16x32x8xbf16>, vector<16x32x8xbf16>, vector<16x32x8xbf16>, vector<16x32x8xbf16>, vector<16x32x8xbf16>, vector<16x32x8xbf16>, vector<16x32x8xbf16>, vector<16x32x8xbf16> -> vector<16x32x72xbf16>
    %12 = vector.shape_cast %11 : vector<16x32x72xbf16> to vector<512x72xbf16>
    %c0_3 = arith.constant 0 : index
    %c0_4 = arith.constant 0 : index
    %13 = vector.load %arg2[%c0_3, %c0_4] : memref<72x128xbf16, #tpu.memory_space<vmem>>, vector<72x128xbf16>
    %cst = arith.constant dense<0.000000e+00> : vector<512x128xf32>
    %14 = tpu.matmul %12, %13, %cst {dimension_numbers = #tpu.dot_dimension_numbers<[1], [0], [0], [1], [0, 0, 1, 1], [], []>} : vector<512x72xbf16>, vector<72x128xbf16>, vector<512x128xf32> -> vector<512x128xf32>
    %c0_5 = arith.constant 0 : index
    %c0_6 = arith.constant 0 : index
    %15 = vector.load %arg3[%c0_5, %c0_6] : memref<1x128xf32, #tpu.memory_space<vmem>>, vector<1x128xf32>
    %16 = vector.broadcast %15 : vector<1x128xf32> to vector<512x128xf32>
    %17 = arith.addf %14, %16 : vector<512x128xf32>
    %c0_7 = arith.constant 0 : index
    %c0_8 = arith.constant 0 : index
    %c0_9 = arith.constant 0 : index
    %18 = vector.load %arg4[%c0_7, %c0_8, %c0_9] : memref<1x512x128xf32, #tpu.memory_space<vmem>>, vector<1x512x128xf32>
    %19 = vector.shape_cast %18 : vector<1x512x128xf32> to vector<512x128xf32>
    %20 = vector.shape_cast %17 : vector<512x128xf32> to vector<1x512x128xf32>
    tpu.vector_store %arg4[%c0_7, %c0_8, %c0_9], %20 {strides = array<i32>} : memref<1x512x128xf32, #tpu.memory_space<vmem>>, vector<1x512x128xf32>,
    %cst_10 = arith.constant dense<0.000000e+00> : vector<128xf32>
    %21 = vector.multi_reduction <add>, %17, %cst_10 [0] : vector<512x128xf32> to vector<128xf32>
    %22 = vector.shape_cast %21 : vector<128xf32> to vector<1x128xf32>
    %23 = arith.mulf %17, %17 : vector<512x128xf32>
    %cst_11 = arith.constant dense<0.000000e+00> : vector<128xf32>
    %24 = vector.multi_reduction <add>, %23, %cst_11 [0] : vector<512x128xf32> to vector<128xf32>
    %25 = vector.shape_cast %24 : vector<128xf32> to vector<1x128xf32>
    %26 = tpu.concatenate %22, %25 in 0 : vector<1x128xf32>, vector<1x128xf32> -> vector<2x128xf32>
    %c0_12 = arith.constant 0 : index
    %c0_13 = arith.constant 0 : index
    %c0_14 = arith.constant 0 : index
    %27 = vector.load %arg5[%c0_12, %c0_13, %c0_14] : memref<1x2x128xf32, #tpu.memory_space<vmem>>, vector<1x2x128xf32>
    %28 = vector.shape_cast %27 : vector<1x2x128xf32> to vector<2x128xf32>
    %29 = vector.shape_cast %26 : vector<2x128xf32> to vector<1x2x128xf32>
    tpu.vector_store %arg5[%c0_12, %c0_13, %c0_14], %29 {strides = array<i32>} : memref<1x2x128xf32, #tpu.memory_space<vmem>>, vector<1x2x128xf32>,
    return
  }
  func.func @transform_0(%arg0: i32) -> (i32, i32, i32, i32) {
    %c0_i32 = arith.constant 0 : i32
    %c0_i32_0 = arith.constant 0 : i32
    %c0_i32_1 = arith.constant 0 : i32
    %c0_i32_2 = arith.constant 0 : i32
    return %arg0, %c0_i32, %c0_i32_0, %c0_i32_1 : i32, i32, i32, i32
  }
  func.func @transform_1(%arg0: i32) -> (i32, i32) {
    %c0_i32 = arith.constant 0 : i32
    %c0_i32_0 = arith.constant 0 : i32
    %c0_i32_1 = arith.constant 0 : i32
    return %c0_i32, %c0_i32_0 : i32, i32
  }
  func.func @transform_2(%arg0: i32) -> (i32, i32) {
    %c0_i32 = arith.constant 0 : i32
    %c0_i32_0 = arith.constant 0 : i32
    %c0_i32_1 = arith.constant 0 : i32
    return %c0_i32, %c0_i32_0 : i32, i32
  }
  func.func @transform_3(%arg0: i32) -> (i32, i32, i32) {
    %c0_i32 = arith.constant 0 : i32
    %c0_i32_0 = arith.constant 0 : i32
    %c0_i32_1 = arith.constant 0 : i32
    return %arg0, %c0_i32, %c0_i32_0 : i32, i32, i32
  }
  func.func @transform_4(%arg0: i32) -> (i32, i32, i32) {
    %c0_i32 = arith.constant 0 : i32
    %c0_i32_0 = arith.constant 0 : i32
    %c0_i32_1 = arith.constant 0 : i32
    return %arg0, %c0_i32, %c0_i32_0 : i32, i32, i32
  }
}

module attributes {stable_mosaic.version = 11 : i64} {
  func.func @_bn_relu_kernel(%arg0: i32, %arg1: memref<512x128xf32, #tpu.memory_space<vmem>>, %arg2: memref<1x128xf32, #tpu.memory_space<vmem>>, %arg3: memref<1x128xf32, #tpu.memory_space<vmem>>, %arg4: memref<512x128xf32, #tpu.memory_space<vmem>>) attributes {dimension_semantics = [#tpu.dimension_semantics<parallel>], iteration_bounds = array<i64: 4>, scalar_prefetch = 0 : i64, scratch_operands = 0 : i64, tpu.core_type = #tpu.core_type<tc>, window_params = [{transform_indices = @transform_0, window_bounds = array<i64: 512, 128>}, {pipeline_mode = #tpu.pipeline_mode<synchronous>, transform_indices = @transform_1, window_bounds = array<i64: 1, 128>}, {pipeline_mode = #tpu.pipeline_mode<synchronous>, transform_indices = @transform_2, window_bounds = array<i64: 1, 128>}, {transform_indices = @transform_3, window_bounds = array<i64: 512, 128>}]} {
    %c0 = arith.constant 0 : index
    %c0_0 = arith.constant 0 : index
    %0 = vector.load %arg1[%c0, %c0_0] : memref<512x128xf32, #tpu.memory_space<vmem>>, vector<512x128xf32>
    %c0_1 = arith.constant 0 : index
    %c0_2 = arith.constant 0 : index
    %1 = vector.load %arg2[%c0_1, %c0_2] : memref<1x128xf32, #tpu.memory_space<vmem>>, vector<1x128xf32>
    %2 = vector.broadcast %1 : vector<1x128xf32> to vector<512x128xf32>
    %3 = arith.mulf %0, %2 : vector<512x128xf32>
    %c0_3 = arith.constant 0 : index
    %c0_4 = arith.constant 0 : index
    %4 = vector.load %arg3[%c0_3, %c0_4] : memref<1x128xf32, #tpu.memory_space<vmem>>, vector<1x128xf32>
    %5 = vector.broadcast %4 : vector<1x128xf32> to vector<512x128xf32>
    %6 = arith.addf %3, %5 : vector<512x128xf32>
    %cst = arith.constant 0.000000e+00 : f32
    %7 = vector.broadcast %cst : f32 to vector<512x128xf32>
    %8 = arith.maximumf %6, %7 : vector<512x128xf32>
    %c0_5 = arith.constant 0 : index
    %c0_6 = arith.constant 0 : index
    %9 = vector.load %arg4[%c0_5, %c0_6] : memref<512x128xf32, #tpu.memory_space<vmem>>, vector<512x128xf32>
    tpu.vector_store %arg4[%c0_5, %c0_6], %8 {strides = array<i32>} : memref<512x128xf32, #tpu.memory_space<vmem>>, vector<512x128xf32>,
    return
  }
  func.func @transform_0(%arg0: i32) -> (i32, i32) {
    %c0_i32 = arith.constant 0 : i32
    %c0_i32_0 = arith.constant 0 : i32
    return %arg0, %c0_i32 : i32, i32
  }
  func.func @transform_1(%arg0: i32) -> (i32, i32) {
    %c0_i32 = arith.constant 0 : i32
    %c0_i32_0 = arith.constant 0 : i32
    %c0_i32_1 = arith.constant 0 : i32
    return %c0_i32, %c0_i32_0 : i32, i32
  }
  func.func @transform_2(%arg0: i32) -> (i32, i32) {
    %c0_i32 = arith.constant 0 : i32
    %c0_i32_0 = arith.constant 0 : i32
    %c0_i32_1 = arith.constant 0 : i32
    return %c0_i32, %c0_i32_0 : i32, i32
  }
  func.func @transform_3(%arg0: i32) -> (i32, i32) {
    %c0_i32 = arith.constant 0 : i32
    %c0_i32_0 = arith.constant 0 : i32
    return %arg0, %c0_i32 : i32, i32
  }
}

</mosaic_0001>

<bundles_post_ra>
// kernel: segnet_dec_forward.7
= control target key start
LH: loop header
LB: loop body
LE: loop exit
PB: predicated region body
PF: predicated region fallthrough
CT: control target
= control target key end

     0   :  { %s613_s12 = smov 0   ;;  %s900_s0 = inlined_call_operand.vmem [shape: f32[2048,128], index: 0, kind: input, shape index: {}]   ;;  %s901_s1 = inlined_call_operand.vmem [shape: f32[1,128], index: 1, kind: input, shape index: {}]   ;;  %s902_s2 = inlined_call_operand.vmem [shape: f32[1,128], index: 2, kind: input, shape index: {}]   ;;  %s903_s3 = inlined_call_operand.vmem [shape: f32[2048,128], index: 3, kind: output, shape index: {}]  }
   0x1 LB: > { %s564_s13 = sadd.s32 4294967295, %s591_s12   ;;  %p568_p0 = scmp.ge.s32.totalorder %s591_s12, 1  ;;  %s591_s12 = sphi %s613_s12, %s13_s12  }
   0x2   : > { %p138_p1 = scmp.lt.s32.totalorder %s591_s12, 5 }
   0x4   : > { %p139_p2 = pnand %p568_p0, %p138_p1 }
   0x5   : > { %s569_s14 = sshll.u32 (!%p139_p2), %s564_s13, 6 }
   0x6   : > { %142 = sbr.rel (%p139_p2) target bundleno = 68 (0x44), region = 32  ;;  %p163_p3 = scmp.lt.s32.totalorder (!%p139_p2), %s569_s14, 255 }
   0xb   : > { %s905_s14 = smov (!%p163_p3, %s569_s14), 255  ;;  %v624_v0 = vld [vmem:[%s901_s1] ss:$0 sm:$0xff] }
   0xc   : > { %s570_s15 = sshll.u32 %s905_s14, 3  ;;  %v634_v1 = vld [vmem:[%s902_s2] ss:$0 sm:$0xff] }
   0xd   : > { %s629_s20 = scalar_lea.vmem %s900_s0, %s570_s15  ;;  %s657_s25 = scalar_lea.vmem %s903_s3, %s570_s15 }
   0xe   : > { %v174_v2 = vld [vmem:[%s629_s20] sm:$0xff]  ;;  %v175_v3 = vld [vmem:[%s629_s20 + $0x8] sm:$0xff]  ;;  %v176_v4 = vld [vmem:[%s629_s20 + $0x10] sm:$0xff] }
   0xf   : > { %v245_v5 = vmul.f32 %v624_v0, %v174_v2  ;;  %v246_v6 = vmul.f32 %v624_v0, %v175_v3  ;;  %v247_v7 = vmul.f32 %v624_v0, %v176_v4  ;;  %v177_v8 = vld [vmem:[%s629_s20 + $0x18] sm:$0xff]  ;;  %v178_v9 = vld [vmem:[%s629_s20 + $0x20] sm:$0xff]  ;;  %v179_v10 = vld [vmem:[%s629_s20 + $0x28] sm:$0xff] }
  0x10   : > { %v248_v11 = vmul.f32 %v624_v0, %v177_v8  ;;  %v249_v12 = vmul.f32 %v624_v0, %v178_v9  ;;  %v250_v13 = vmul.f32 %v624_v0, %v179_v10  ;;  %v180_v14 = vld [vmem:[%s629_s20 + $0x30] sm:$0xff]  ;;  %v181_v15 = vld [vmem:[%s629_s20 + $0x38] sm:$0xff]  ;;  %v182_v24 = vld [vmem:[%s629_s20 + $0x40] sm:$0xff] }
  0x11   : > { %v316_v16 = vadd.f32 %v634_v1, %v245_v5  ;;  %v317_v17 = vadd.f32 %v634_v1, %v246_v6  ;;  %v318_v18 = vadd.f32 %v634_v1, %v247_v7  ;;  %v251_v19 = vmul.f32 %v624_v0, %v180_v14  ;;  %v183_v25 = vld [vmem:[%s629_s20 + $0x48] sm:$0xff]  ;;  %v184_v26 = vld [vmem:[%s629_s20 + $0x50] sm:$0xff]  ;;  %v185_v31 = vld [vmem:[%s629_s20 + $0x58] sm:$0xff] }
  0x12   : > { %v319_v20 = vadd.f32 %v634_v1, %v248_v11  ;;  %v320_v21 = vadd.f32 %v634_v1, %v249_v12  ;;  %v321_v22 = vadd.f32 %v634_v1, %v250_v13  ;;  %v252_v23 = vmul.f32 %v624_v0, %v181_v15  ;;  %v186_v32 = vld [vmem:[%s629_s20 + $0x60] sm:$0xff]  ;;  %v187_v33 = vld [vmem:[%s629_s20 + $0x68] sm:$0xff]  ;;  %v188_v38 = vld [vmem:[%s629_s20 + $0x70] sm:$0xff] }
  0x13   : > { %v380_v27 = vmax.f32 %v316_v16, 0.0  ;;  %v381_v28 = vmax.f32 %v317_v17, 0.0  ;;  %v382_v29 = vmax.f32 %v318_v18, 0.0  ;;  %v322_v30 = vadd.f32 %v634_v1, %v251_v19  ;;  %v189_v43 = vld [vmem:[%s629_s20 + $0x78] sm:$0xff]  ;;  %v190_v56 = vld [vmem:[%s629_s20 + $0x80] sm:$0xff]  ;;  %v191_v57 = vld [vmem:[%s629_s20 + $0x88] sm:$0xff] }
  0x14   : > { %v383_v34 = vmax.f32 %v319_v20, 0.0  ;;  %v384_v35 = vmax.f32 %v320_v21, 0.0  ;;  %v385_v36 = vmax.f32 %v321_v22, 0.0  ;;  %v323_v37 = vadd.f32 %v634_v1, %v252_v23  ;;  %v192_v58 = vld [vmem:[%s629_s20 + $0x90] sm:$0xff]  ;;  %v193_v63 = vld [vmem:[%s629_s20 + $0x98] sm:$0xff]  ;;  %v194_v2 = vld [vmem:[%s629_s20 + $0xa0] sm:$0xff] }
  0x15   : > { %444 = vst [vmem:[%s657_s25] sm:$0xff] %v380_v27  ;;  %445 = vst [vmem:[%s657_s25 + $0x8] sm:$0xff] %v381_v28  ;;  %v386_v39 = vmax.f32 %v322_v30, 0.0  ;;  %v253_v40 = vmul.f32 %v624_v0, %v182_v24  ;;  %v254_v41 = vmul.f32 %v624_v0, %v183_v25  ;;  %v255_v42 = vmul.f32 %v624_v0, %v184_v26  ;;  %v195_v3 = vld [vmem:[%s629_s20 + $0xa8] sm:$0xff]  ;;  %v196_v8 = vld [vmem:[%s629_s20 + $0xb0] sm:$0xff] }
  0x16   : > { %446 = vst [vmem:[%s657_s25 + $0x10] sm:$0xff] %v382_v29  ;;  %447 = vst [vmem:[%s657_s25 + $0x18] sm:$0xff] %v383_v34  ;;  %v387_v44 = vmax.f32 %v323_v37, 0.0  ;;  %v256_v45 = vmul.f32 %v624_v0, %v185_v31  ;;  %v257_v46 = vmul.f32 %v624_v0, %v186_v32  ;;  %v258_v47 = vmul.f32 %v624_v0, %v187_v33  ;;  %v197_v13 = vld [vmem:[%s629_s20 + $0xb8] sm:$0xff]  ;;  %v198_v26 = vld [vmem:[%s629_s20 + $0xc0] sm:$0xff] }
  0x17   : > { %448 = vst [vmem:[%s657_s25 + $0x20] sm:$0xff] %v384_v35  ;;  %449 = vst [vmem:[%s657_s25 + $0x28] sm:$0xff] %v385_v36  ;;  %v324_v48 = vadd.f32 %v634_v1, %v253_v40  ;;  %v325_v49 = vadd.f32 %v634_v1, %v254_v41  ;;  %v326_v50 = vadd.f32 %v634_v1, %v255_v42  ;;  %v199_v27 = vld [vmem:[%s629_s20 + $0xc8] sm:$0xff]  ;;  %v200_v28 = vld [vmem:[%s629_s20 + $0xd0] sm:$0xff] }
  0x18   : > { %450 = vst [vmem:[%s657_s25 + $0x30] sm:$0xff] %v386_v39  ;;  %v259_v51 = vmul.f32 %v624_v0, %v188_v38  ;;  %451 = vst [vmem:[%s657_s25 + $0x38] sm:$0xff] %v387_v44  ;;  %v327_v52 = vadd.f32 %v634_v1, %v256_v45  ;;  %v328_v53 = vadd.f32 %v634_v1, %v257_v46  ;;  %v201_v33 = vld [vmem:[%s629_s20 + $0xd8] sm:$0xff]  ;;  %v202_v34 = vld [vmem:[%s629_s20 + $0xe0] sm:$0xff] }
  0x19   : > { %v329_v54 = vadd.f32 %v634_v1, %v258_v47  ;;  %v260_v55 = vmul.f32 %v624_v0, %v189_v43  ;;  %v388_v59 = vmax.f32 %v324_v48, 0.0  ;;  %v389_v60 = vmax.f32 %v325_v49, 0.0  ;;  %v203_v35 = vld [vmem:[%s629_s20 + $0xe8] sm:$0xff]  ;;  %v204_v40 = vld [vmem:[%s629_s20 + $0xf0] sm:$0xff]  ;;  %v205_v45 = vld [vmem:[%s629_s20 + $0xf8] sm:$0xff] }
  0x1a   : > { %v390_v61 = vmax.f32 %v326_v50, 0.0  ;;  %v330_v62 = vadd.f32 %v634_v1, %v259_v51  ;;  %v391_v4 = vmax.f32 %v327_v52, 0.0  ;;  %v392_v5 = vmax.f32 %v328_v53, 0.0 }
  0x1b   : > { %v393_v6 = vmax.f32 %v329_v54, 0.0  ;;  %v331_v7 = vadd.f32 %v634_v1, %v260_v55  ;;  %452 = vst [vmem:[%s657_s25 + $0x40] sm:$0xff] %v388_v59  ;;  %453 = vst [vmem:[%s657_s25 + $0x48] sm:$0xff] %v389_v60  ;;  %v261_v10 = vmul.f32 %v624_v0, %v190_v56  ;;  %v262_v11 = vmul.f32 %v624_v0, %v191_v57  ;;  %v207_v59 = vld [vmem:[%s629_s20 + $0x108] sm:$0xff]  ;;  %v208_v60 = vld [vmem:[%s629_s20 + $0x110] sm:$0xff] }
  0x1c   : > { %454 = vst [vmem:[%s657_s25 + $0x50] sm:$0xff] %v390_v61  ;;  %v394_v9 = vmax.f32 %v330_v62, 0.0  ;;  %v263_v12 = vmul.f32 %v624_v0, %v192_v58  ;;  %455 = vst [vmem:[%s657_s25 + $0x58] sm:$0xff] %v391_v4  ;;  %v264_v15 = vmul.f32 %v624_v0, %v193_v63  ;;  %v265_v16 = vmul.f32 %v624_v0, %v194_v2  ;;  %v206_v58 = vld [vmem:[%s629_s20 + $0x100] sm:$0xff] }
  0x1d   : > { %456 = vst [vmem:[%s657_s25 + $0x60] sm:$0xff] %v392_v5  ;;  %457 = vst [vmem:[%s657_s25 + $0x68] sm:$0xff] %v393_v6  ;;  %v395_v14 = vmax.f32 %v331_v7, 0.0  ;;  %v266_v17 = vmul.f32 %v624_v0, %v195_v3  ;;  %v332_v18 = vadd.f32 %v634_v1, %v261_v10  ;;  %v333_v19 = vadd.f32 %v634_v1, %v262_v11  ;;  %v209_v3 = vld [vmem:[%s629_s20 + $0x118] sm:$0xff]  ;;  %v210_v4 = vld [vmem:[%s629_s20 + $0x120] sm:$0xff] }
  0x1e   : > { %458 = vst [vmem:[%s657_s25 + $0x70] sm:$0xff] %v394_v9  ;;  %v334_v20 = vadd.f32 %v634_v1, %v263_v12  ;;  %v267_v21 = vmul.f32 %v624_v0, %v196_v8  ;;  %v335_v22 = vadd.f32 %v634_v1, %v264_v15  ;;  %v336_v23 = vadd.f32 %v634_v1, %v265_v16  ;;  %v211_v5 = vld [vmem:[%s629_s20 + $0x128] sm:$0xff]  ;;  %v212_v10 = vld [vmem:[%s629_s20 + $0x130] sm:$0xff]  ;;  %v213_v15 = vld [vmem:[%s629_s20 + $0x138] sm:$0xff] }
  0x1f   : > { %459 = vst [vmem:[%s657_s25 + $0x78] sm:$0xff] %v395_v14  ;;  %v337_v24 = vadd.f32 %v634_v1, %v266_v17  ;;  %v268_v25 = vmul.f32 %v624_v0, %v197_v13  ;;  %v396_v29 = vmax.f32 %v332_v18, 0.0  ;;  %v397_v30 = vmax.f32 %v333_v19, 0.0 }
  0x20   : > { %v398_v31 = vmax.f32 %v334_v20, 0.0  ;;  %v338_v32 = vadd.f32 %v634_v1, %v267_v21  ;;  %v399_v36 = vmax.f32 %v335_v22, 0.0  ;;  %v400_v37 = vmax.f32 %v336_v23, 0.0 }
  0x21   : > { %v401_v38 = vmax.f32 %v337_v24, 0.0  ;;  %v339_v39 = vadd.f32 %v634_v1, %v268_v25  ;;  %460 = vst [vmem:[%s657_s25 + $0x80] sm:$0xff] %v396_v29  ;;  %461 = vst [vmem:[%s657_s25 + $0x88] sm:$0xff] %v397_v30  ;;  %v269_v42 = vmul.f32 %v624_v0, %v198_v26  ;;  %v270_v43 = vmul.f32 %v624_v0, %v199_v27  ;;  %v215_v29 = vld [vmem:[%s629_s20 + $0x148] sm:$0xff]  ;;  %v216_v30 = vld [vmem:[%s629_s20 + $0x150] sm:$0xff] }
  0x22   : > { %462 = vst [vmem:[%s657_s25 + $0x90] sm:$0xff] %v398_v31  ;;  %v402_v41 = vmax.f32 %v338_v32, 0.0  ;;  %v271_v44 = vmul.f32 %v624_v0, %v200_v28  ;;  %463 = vst [vmem:[%s657_s25 + $0x98] sm:$0xff] %v399_v36  ;;  %v272_v47 = vmul.f32 %v624_v0, %v201_v33  ;;  %v273_v48 = vmul.f32 %v624_v0, %v202_v34  ;;  %v214_v28 = vld [vmem:[%s629_s20 + $0x140] sm:$0xff] }
  0x23   : > { %464 = vst [vmem:[%s657_s25 + $0xa0] sm:$0xff] %v400_v37  ;;  %465 = vst [vmem:[%s657_s25 + $0xa8] sm:$0xff] %v401_v38  ;;  %v403_v46 = vmax.f32 %v339_v39, 0.0  ;;  %v274_v49 = vmul.f32 %v624_v0, %v203_v35  ;;  %v340_v50 = vadd.f32 %v634_v1, %v269_v42  ;;  %v341_v51 = vadd.f32 %v634_v1, %v270_v43  ;;  %v217_v35 = vld [vmem:[%s629_s20 + $0x158] sm:$0xff]  ;;  %v218_v36 = vld [vmem:[%s629_s20 + $0x160] sm:$0xff] }
  0x24   : > { %466 = vst [vmem:[%s657_s25 + $0xb0] sm:$0xff] %v402_v41  ;;  %v342_v52 = vadd.f32 %v634_v1, %v271_v44  ;;  %v275_v53 = vmul.f32 %v624_v0, %v204_v40  ;;  %v343_v54 = vadd.f32 %v634_v1, %v272_v47  ;;  %v344_v55 = vadd.f32 %v634_v1, %v273_v48  ;;  %v219_v37 = vld [vmem:[%s629_s20 + $0x168] sm:$0xff]  ;;  %v220_v42 = vld [vmem:[%s629_s20 + $0x170] sm:$0xff]  ;;  %v221_v47 = vld [vmem:[%s629_s20 + $0x178] sm:$0xff] }
  0x25   : > { %467 = vst [vmem:[%s657_s25 + $0xb8] sm:$0xff] %v403_v46  ;;  %v345_v56 = vadd.f32 %v634_v1, %v274_v49  ;;  %v276_v57 = vmul.f32 %v624_v0, %v205_v45  ;;  %v404_v61 = vmax.f32 %v340_v50, 0.0  ;;  %v405_v62 = vmax.f32 %v341_v51, 0.0 }
  0x26   : > { %v406_v63 = vmax.f32 %v342_v52, 0.0  ;;  %v346_v2 = vadd.f32 %v634_v1, %v275_v53  ;;  %v407_v6 = vmax.f32 %v343_v54, 0.0  ;;  %v408_v7 = vmax.f32 %v344_v55, 0.0 }
  0x27   : > { %v409_v8 = vmax.f32 %v345_v56, 0.0  ;;  %v347_v9 = vadd.f32 %v634_v1, %v276_v57  ;;  %468 = vst [vmem:[%s657_s25 + $0xc0] sm:$0xff] %v404_v61  ;;  %469 = vst [vmem:[%s657_s25 + $0xc8] sm:$0xff] %v405_v62  ;;  %v277_v12 = vmul.f32 %v624_v0, %v206_v58  ;;  %v278_v13 = vmul.f32 %v624_v0, %v207_v59  ;;  %v223_v61 = vld [vmem:[%s629_s20 + $0x188] sm:$0xff]  ;;  %v224_v62 = vld [vmem:[%s629_s20 + $0x190] sm:$0xff] }
  0x28   : > { %470 = vst [vmem:[%s657_s25 + $0xd0] sm:$0xff] %v406_v63  ;;  %v410_v11 = vmax.f32 %v346_v2, 0.0  ;;  %v279_v14 = vmul.f32 %v624_v0, %v208_v60  ;;  %471 = vst [vmem:[%s657_s25 + $0xd8] sm:$0xff] %v407_v6  ;;  %v280_v17 = vmul.f32 %v624_v0, %v209_v3  ;;  %v281_v18 = vmul.f32 %v624_v0, %v210_v4  ;;  %v222_v60 = vld [vmem:[%s629_s20 + $0x180] sm:$0xff] }
  0x29   : > { %472 = vst [vmem:[%s657_s25 + $0xe0] sm:$0xff] %v408_v7  ;;  %473 = vst [vmem:[%s657_s25 + $0xe8] sm:$0xff] %v409_v8  ;;  %v411_v16 = vmax.f32 %v347_v9, 0.0  ;;  %v282_v19 = vmul.f32 %v624_v0, %v211_v5  ;;  %v348_v20 = vadd.f32 %v634_v1, %v277_v12  ;;  %v349_v21 = vadd.f32 %v634_v1, %v278_v13  ;;  %v225_v5 = vld [vmem:[%s629_s20 + $0x198] sm:$0xff]  ;;  %v226_v6 = vld [vmem:[%s629_s20 + $0x1a0] sm:$0xff] }
  0x2a   : > { %474 = vst [vmem:[%s657_s25 + $0xf0] sm:$0xff] %v410_v11  ;;  %v350_v22 = vadd.f32 %v634_v1, %v279_v14  ;;  %v283_v23 = vmul.f32 %v624_v0, %v212_v10  ;;  %v351_v24 = vadd.f32 %v634_v1, %v280_v17  ;;  %v352_v25 = vadd.f32 %v634_v1, %v281_v18  ;;  %v227_v7 = vld [vmem:[%s629_s20 + $0x1a8] sm:$0xff]  ;;  %v228_v12 = vld [vmem:[%s629_s20 + $0x1b0] sm:$0xff]  ;;  %v229_v17 = vld [vmem:[%s629_s20 + $0x1b8] sm:$0xff] }
  0x2b   : > { %475 = vst [vmem:[%s657_s25 + $0xf8] sm:$0xff] %v411_v16  ;;  %v353_v26 = vadd.f32 %v634_v1, %v282_v19  ;;  %v284_v27 = vmul.f32 %v624_v0, %v213_v15  ;;  %v412_v31 = vmax.f32 %v348_v20, 0.0  ;;  %v413_v32 = vmax.f32 %v349_v21, 0.0 }
  0x2c   : > { %v414_v33 = vmax.f32 %v350_v22, 0.0  ;;  %v354_v34 = vadd.f32 %v634_v1, %v283_v23  ;;  %v415_v38 = vmax.f32 %v351_v24, 0.0  ;;  %v416_v39 = vmax.f32 %v352_v25, 0.0 }
  0x2d   : > { %v417_v40 = vmax.f32 %v353_v26, 0.0  ;;  %v355_v41 = vadd.f32 %v634_v1, %v284_v27  ;;  %476 = vst [vmem:[%s657_s25 + $0x100] sm:$0xff] %v412_v31  ;;  %477 = vst [vmem:[%s657_s25 + $0x108] sm:$0xff] %v413_v32  ;;  %v285_v44 = vmul.f32 %v624_v0, %v214_v28  ;;  %v286_v45 = vmul.f32 %v624_v0, %v215_v29  ;;  %v231_v31 = vld [vmem:[%s629_s20 + $0x1c8] sm:$0xff]  ;;  %v232_v32 = vld [vmem:[%s629_s20 + $0x1d0] sm:$0xff] }
  0x2e   : > { %478 = vst [vmem:[%s657_s25 + $0x110] sm:$0xff] %v414_v33  ;;  %v418_v43 = vmax.f32 %v354_v34, 0.0  ;;  %v287_v46 = vmul.f32 %v624_v0, %v216_v30  ;;  %479 = vst [vmem:[%s657_s25 + $0x118] sm:$0xff] %v415_v38  ;;  %v288_v49 = vmul.f32 %v624_v0, %v217_v35  ;;  %v289_v50 = vmul.f32 %v624_v0, %v218_v36  ;;  %v230_v30 = vld [vmem:[%s629_s20 + $0x1c0] sm:$0xff] }
  0x2f   : > { %480 = vst [vmem:[%s657_s25 + $0x120] sm:$0xff] %v416_v39  ;;  %481 = vst [vmem:[%s657_s25 + $0x128] sm:$0xff] %v417_v40  ;;  %v419_v48 = vmax.f32 %v355_v41, 0.0  ;;  %v290_v51 = vmul.f32 %v624_v0, %v219_v37  ;;  %v356_v52 = vadd.f32 %v634_v1, %v285_v44  ;;  %v357_v53 = vadd.f32 %v634_v1, %v286_v45  ;;  %v233_v37 = vld [vmem:[%s629_s20 + $0x1d8] sm:$0xff]  ;;  %v234_v38 = vld [vmem:[%s629_s20 + $0x1e0] sm:$0xff] }
  0x30   : > { %482 = vst [vmem:[%s657_s25 + $0x130] sm:$0xff] %v418_v43  ;;  %v358_v54 = vadd.f32 %v634_v1, %v287_v46  ;;  %v291_v55 = vmul.f32 %v624_v0, %v220_v42  ;;  %v359_v56 = vadd.f32 %v634_v1, %v288_v49  ;;  %v360_v57 = vadd.f32 %v634_v1, %v289_v50  ;;  %v235_v39 = vld [vmem:[%s629_s20 + $0x1e8] sm:$0xff]  ;;  %v236_v44 = vld [vmem:[%s629_s20 + $0x1f0] sm:$0xff]  ;;  %v237_v49 = vld [vmem:[%s629_s20 + $0x1f8] sm:$0xff] }
  0x31   : > { %483 = vst [vmem:[%s657_s25 + $0x138] sm:$0xff] %v419_v48  ;;  %v361_v58 = vadd.f32 %v634_v1, %v290_v51  ;;  %v292_v59 = vmul.f32 %v624_v0, %v221_v47  ;;  %v420_v63 = vmax.f32 %v356_v52, 0.0  ;;  %v421_v2 = vmax.f32 %v357_v53, 0.0 }
  0x32   : > { %v422_v3 = vmax.f32 %v358_v54, 0.0  ;;  %v362_v4 = vadd.f32 %v634_v1, %v291_v55  ;;  %v423_v8 = vmax.f32 %v359_v56, 0.0  ;;  %v424_v9 = vmax.f32 %v360_v57, 0.0 }
  0x33   : > { %v425_v10 = vmax.f32 %v361_v58, 0.0  ;;  %v363_v11 = vadd.f32 %v634_v1, %v292_v59  ;;  %484 = vst [vmem:[%s657_s25 + $0x140] sm:$0xff] %v420_v63  ;;  %485 = vst [vmem:[%s657_s25 + $0x148] sm:$0xff] %v421_v2  ;;  %v293_v14 = vmul.f32 %v624_v0, %v222_v60  ;;  %v294_v15 = vmul.f32 %v624_v0, %v223_v61 }
  0x34   : > { %486 = vst [vmem:[%s657_s25 + $0x150] sm:$0xff] %v422_v3  ;;  %v426_v13 = vmax.f32 %v362_v4, 0.0  ;;  %v295_v16 = vmul.f32 %v624_v0, %v224_v62  ;;  %487 = vst [vmem:[%s657_s25 + $0x158] sm:$0xff] %v423_v8  ;;  %v296_v19 = vmul.f32 %v624_v0, %v225_v5  ;;  %v297_v20 = vmul.f32 %v624_v0, %v226_v6 }
  0x35   : > { %488 = vst [vmem:[%s657_s25 + $0x160] sm:$0xff] %v424_v9  ;;  %489 = vst [vmem:[%s657_s25 + $0x168] sm:$0xff] %v425_v10  ;;  %v427_v18 = vmax.f32 %v363_v11, 0.0  ;;  %v298_v21 = vmul.f32 %v624_v0, %v227_v7  ;;  %v364_v22 = vadd.f32 %v634_v1, %v293_v14  ;;  %v365_v23 = vadd.f32 %v634_v1, %v294_v15 }
  0x36   : > { %490 = vst [vmem:[%s657_s25 + $0x170] sm:$0xff] %v426_v13  ;;  %v366_v24 = vadd.f32 %v634_v1, %v295_v16  ;;  %v299_v25 = vmul.f32 %v624_v0, %v228_v12  ;;  %v367_v26 = vadd.f32 %v634_v1, %v296_v19  ;;  %v368_v27 = vadd.f32 %v634_v1, %v297_v20 }
  0x37   : > { %491 = vst [vmem:[%s657_s25 + $0x178] sm:$0xff] %v427_v18  ;;  %v369_v28 = vadd.f32 %v634_v1, %v298_v21  ;;  %v300_v29 = vmul.f32 %v624_v0, %v229_v17  ;;  %v428_v33 = vmax.f32 %v364_v22, 0.0  ;;  %v429_v34 = vmax.f32 %v365_v23, 0.0 }
  0x38   : > { %v430_v35 = vmax.f32 %v366_v24, 0.0  ;;  %v370_v36 = vadd.f32 %v634_v1, %v299_v25  ;;  %v431_v40 = vmax.f32 %v367_v26, 0.0  ;;  %v432_v41 = vmax.f32 %v368_v27, 0.0 }
  0x39   : > { %v433_v42 = vmax.f32 %v369_v28, 0.0  ;;  %v371_v43 = vadd.f32 %v634_v1, %v300_v29  ;;  %492 = vst [vmem:[%s657_s25 + $0x180] sm:$0xff] %v428_v33  ;;  %493 = vst [vmem:[%s657_s25 + $0x188] sm:$0xff] %v429_v34  ;;  %v301_v46 = vmul.f32 %v624_v0, %v230_v30  ;;  %v302_v47 = vmul.f32 %v624_v0, %v231_v31 }
  0x3a   : > { %494 = vst [vmem:[%s657_s25 + $0x190] sm:$0xff] %v430_v35  ;;  %v434_v45 = vmax.f32 %v370_v36, 0.0  ;;  %v303_v48 = vmul.f32 %v624_v0, %v232_v32  ;;  %495 = vst [vmem:[%s657_s25 + $0x198] sm:$0xff] %v431_v40  ;;  %v304_v51 = vmul.f32 %v624_v0, %v233_v37  ;;  %v305_v52 = vmul.f32 %v624_v0, %v234_v38 }
  0x3b   : > { %496 = vst [vmem:[%s657_s25 + $0x1a0] sm:$0xff] %v432_v41  ;;  %497 = vst [vmem:[%s657_s25 + $0x1a8] sm:$0xff] %v433_v42  ;;  %v435_v50 = vmax.f32 %v371_v43, 0.0  ;;  %v306_v53 = vmul.f32 %v624_v0, %v235_v39  ;;  %v372_v54 = vadd.f32 %v634_v1, %v301_v46  ;;  %v373_v55 = vadd.f32 %v634_v1, %v302_v47 }
  0x3c   : > { %498 = vst [vmem:[%s657_s25 + $0x1b0] sm:$0xff] %v434_v45  ;;  %v374_v56 = vadd.f32 %v634_v1, %v303_v48  ;;  %v307_v57 = vmul.f32 %v624_v0, %v236_v44  ;;  %v375_v58 = vadd.f32 %v634_v1, %v304_v51  ;;  %v376_v59 = vadd.f32 %v634_v1, %v305_v52 }
  0x3d   : > { %499 = vst [vmem:[%s657_s25 + $0x1b8] sm:$0xff] %v435_v50  ;;  %v377_v60 = vadd.f32 %v634_v1, %v306_v53  ;;  %v308_v61 = vmul.f32 %v624_v0, %v237_v49  ;;  %v436_v62 = vmax.f32 %v372_v54, 0.0  ;;  %v437_v63 = vmax.f32 %v373_v55, 0.0 }
  0x3e   : > { %v438_v2 = vmax.f32 %v374_v56, 0.0  ;;  %v378_v3 = vadd.f32 %v634_v1, %v307_v57  ;;  %v439_v4 = vmax.f32 %v375_v58, 0.0  ;;  %v440_v5 = vmax.f32 %v376_v59, 0.0 }
  0x3f   : > { %v441_v6 = vmax.f32 %v377_v60, 0.0  ;;  %v379_v7 = vadd.f32 %v634_v1, %v308_v61  ;;  %500 = vst [vmem:[%s657_s25 + $0x1c0] sm:$0xff] %v436_v62  ;;  %501 = vst [vmem:[%s657_s25 + $0x1c8] sm:$0xff] %v437_v63 }
  0x40   : > { %502 = vst [vmem:[%s657_s25 + $0x1d0] sm:$0xff] %v438_v2  ;;  %v442_v8 = vmax.f32 %v378_v3, 0.0  ;;  %503 = vst [vmem:[%s657_s25 + $0x1d8] sm:$0xff] %v439_v4 }
  0x41   : > { %504 = vst [vmem:[%s657_s25 + $0x1e0] sm:$0xff] %v440_v5  ;;  %505 = vst [vmem:[%s657_s25 + $0x1e8] sm:$0xff] %v441_v6  ;;  %v443_v0 = vmax.f32 %v379_v7, 0.0 }
  0x42   : > { %506 = vst [vmem:[%s657_s25 + $0x1f0] sm:$0xff] %v442_v8 }
  0x43   : > { %507 = vst [vmem:[%s657_s25 + $0x1f8] sm:$0xff] %v443_v0 }
  0x44 PF: > { %s13_s12 = sadd.s32 1, %s591_s12  }
  0x45   : > { %p10_p4 = scmp.ge.s32.totalorder %s13_s12, 6  }
  0x47   :  { %12 = sbr.rel (!%p10_p4) target bundleno = 1 (0x1), region = 62 }

// kernel: segnet_dec_forward.6
= control target key start
LH: loop header
LB: loop body
LE: loop exit
PB: predicated region body
PF: predicated region fallthrough
CT: control target
= control target key end

     0   :  { %s3157_s15 = smov 0   ;;  %s4804_s0 = inlined_call_operand.vmem [shape: bf16[4,18,34,8], index: 0, kind: input, shape index: {}]   ;;  %s4805_s1 = inlined_call_operand.vmem [shape: bf16[72,128], index: 1, kind: input, shape index: {}]   ;;  %s4806_s2 = inlined_call_operand.vmem [shape: f32[1,128], index: 2, kind: input, shape index: {}]   ;;  %s4807_s3 = inlined_call_operand.vmem [shape: f32[4,512,128], index: 3, kind: output, shape index: {0}]   ;;  %s4808_s4 = inlined_call_operand.vmem [shape: f32[4,2,128], index: 4, kind: output, shape index: {1}]  }
   0x1 LB: > { %s2774_s16 = sadd.s32 4294967295, %s3122_s15   ;;  %p2778_p0 = scmp.ge.s32.totalorder %s3122_s15, 1  ;;  %s3122_s15 = sphi %s3157_s15, %s15_s15  }
   0x2   : > { %p165_p1 = scmp.lt.s32.totalorder %s3122_s15, 5 }
   0x4   : > { %p166_p2 = pnand %p2778_p0, %p165_p1 }
   0x6   : > { %169 = sbr.rel (%p166_p2) target bundleno = 874 (0x36a), region = 32 }
   0xb   : > { %p195_p3 = scmp.lt.s32.totalorder %s2774_s16, 3  ;;  %vm508_vm0 = vsmask.f32 7424  ;;  %s3124_s21 = smov 8   ;;  %vm893_vm1 = vcmask 1046528   ;;  %vm2126_vm2 = vcmask 1043456  }
   0xc   : > { %s3125_s22 = smov 16   ;;  %s3126_s27 = smov 24   ;;  %vm1498_vm3 = vcmask 64512   ;;  %vm1563_vm4 = vcmask 130048   ;;  %vm1628_vm5 = vcmask 195584   ;;  %vm1693_vm6 = vcmask 261120  }
   0xd   : > { %s4932_s16 = smov (!%p195_p3, %s2774_s16), 3  ;;  %s3127_s30 = smov 32   ;;  %vm1758_vm7 = vcmask 326656   ;;  %vm1823_vm8 = vcmask 392192   ;;  %vm1888_vm9 = vcmask 457728   ;;  %vm1953_vm10 = vcmask 523264  }
   0xe   : > { %s3001_s17 = smul.u32 360, %s4932_s16  ;;  %s3128_s7 = smov 40   ;;  %vm2061_vm11 = vcmask 588800   ;;  %vm2685_vm12 = vcmask 1040384  }
   0xf   : > { %s3129_s10 = smov 48   ;;  %s3130_s11 = smov 56  }
  0x10   : > { %s3171_s20 = scalar_lea.vmem %s4804_s0, %s3001_s17  ;;  %s3131_s12 = smov 64  }
  0x11   : > { %v3174_v0 = vld [vmem:[%s3171_s20 + $0x14] sm:$0xff]   ;;  %v3177_v1 = vld [vmem:[%s3171_s20 + $0x1c] sm:$0xff]   ;;  %v3186_v6 = vld [vmem:[%s3171_s20 + $0x8] sm:$0xff]   ;;  %s2877_s13 = sshll.u32 %s4932_s16, 9  ;;  %s2782_s23 = sshll.u32 %s4932_s16, 1 }
  0x12   : > { %v530_v2 = vshrl.u32 %v3174_v0, 16  ;;  %v532_v3 = vshll.u32 %v3174_v0, 16  ;;  %v537_v4 = vshll.u32 %v3177_v1, 16  ;;  %v3183_v5 = vld [vmem:[%s3171_s20] sm:$0xff]   ;;  %v517_v12 = vshll.u32 %v3186_v6, 16  ;;  %v3202_v23 = vld [vmem:[%s3171_s20 + $0x30] sm:$0xff]   ;;  %s208_s26 = scalar_lea.vmem %s4808_s4, %s2782_s23 }
  0x13   : > { %v3189_v7 = vld [vmem:[%s3171_s20 + $0x24] ss:$0 sps:$4 sm:$0x11]   ;;  %v510_v10 = vshrl.u32 %v3183_v5, 16  ;;  %v512_v11 = vshll.u32 %v3183_v5, 16  ;;  %v541_v13 = vshrl.u32 %v3177_v1, 16 }
  0x14   : > { %v534_v8 = vrot.slane %v532_v3, 1  ;;  %v539_v9 = vrot.slane %v537_v4, 1  ;;  %v545_v14 = vshll.u32 %v3189_v7, 16  ;;  %v3197_v15 = vld [vmem:[%s3171_s20 + $0x10] ss:$0 sps:$4 sm:$0x11]  }
  0x15   : > { %v514_v17 = vrot.slane %v512_v11, 1  ;;  %v521_v18 = vshrl.u32 %v3186_v6, 16  ;;  %v519_v19 = vrot.slane %v517_v12, 1  ;;  %v525_v22 = vshll.u32 %v3197_v15, 16  ;;  %v3211_v27 = vld [vmem:[%s3171_s20 + $0x28] sm:$0xff]   ;;  %v3237_v46 = vld [vmem:[%s3171_s20 + $0x3c] sm:$0xff]  }
  0x16   : > { %v535_v16 = vor.u32 %v534_v8, %v530_v2  ;;  %v543_v20 = vor.u32 %v541_v13, %v539_v9  ;;  %v547_v21 = vrot.slane %v545_v14, 1  ;;  %v3208_v26 = vld [vmem:[%s3171_s20 + $0x38] ss:$0 sps:$4 sm:$0x11]   ;;  %v557_v31 = vshll.u32 %v3202_v23, 16  ;;  %v3224_v36 = vld [vmem:[%s3171_s20 + $0x44] sm:$0xff]  }
  0x17   : > { %v515_v25 = vor.u32 %v514_v17, %v510_v10  ;;  %v523_v29 = vor.u32 %v521_v18, %v519_v19  ;;  %v527_v30 = vrot.slane %v525_v22, 1  ;;  %v561_v33 = vshrl.u32 %v3202_v23, 16  ;;  %v3230_v41 = vld [vmem:[%s3171_s20 + $0x4c] ss:$0 sps:$4 sm:$0x11]   ;;  %v3247_v53 = vld [vmem:[%s3171_s20 + $0x58] sm:$0xff]  }
  0x18   : > { %v3205_v24 = vsel %vm508_vm0, %v535_v16, %v539_v9  ;;  %v3216_v28 = vsel %vm508_vm0, %v543_v20, %v547_v21  ;;  %v565_v34 = vshll.u32 %v3208_v26, 16  ;;  %v550_v35 = vshrl.u32 %v3211_v27, 16  ;;  %v3250_v54 = vld [vmem:[%s3171_s20 + $0x60] ss:$0 sps:$4 sm:$0x11]   ;;  %v3253_v57 = vld [vmem:[%s3171_s20 + $0x50] sm:$0xff]  }
  0x19   : > { %833 = vrot.lane.b32.xlu1 %v3205_v24, %s3124_s21  ;;  %v520_v32 = vsel %vm508_vm0, %v515_v25, %v519_v19  ;;  %v559_v37 = vrot.slane %v557_v31, 1  ;;  %v552_v38 = vshll.u32 %v3211_v27, 16  ;;  %v528_v39 = vsel %vm508_vm0, %v523_v29, %v527_v30  ;;  %v3263_v62 = vld [vmem:[%s3171_s20 + $0x6c] sm:$0xff]   ;;  %v3272_v8 = vld [vmem:[%s3171_s20 + $0x64] sm:$0xff]  }
  0x1a   : > { %829 = vrot.lane.b32.xlu0 %v520_v32, %s3124_s21  ;;  %v567_v40 = vrot.slane %v565_v34, 1  ;;  %v577_v42 = vshll.u32 %v3224_v36, 16  ;;  %v581_v43 = vshrl.u32 %v3224_v36, 16  ;;  %v585_v48 = vshll.u32 %v3230_v41, 16  ;;  %v3295_v31 = vld [vmem:[%s3171_s20 + $0x80] sm:$0xff]  }
  0x1b   : > { %v563_v44 = vor.u32 %v561_v33, %v559_v37  ;;  %v554_v45 = vrot.slane %v552_v38, 1  ;;  %v570_v51 = vshrl.u32 %v3237_v46, 16  ;;  %v572_v52 = vshll.u32 %v3237_v46, 16  ;;  %v3277_v11 = vld [vmem:[%s3171_s20 + $0x74] ss:$0 sps:$4 sm:$0x11]  }
  0x1c   : > { %v579_v47 = vrot.slane %v577_v42, 1  ;;  %v587_v56 = vrot.slane %v585_v48, 1  ;;  %v597_v60 = vshll.u32 %v3247_v53, 16  ;;  %v601_v61 = vshrl.u32 %v3247_v53, 16  ;;  %v3301_v33 = vld [vmem:[%s3171_s20 + $0x78] sm:$0xff]  }
  0x1d   : > { %835 = vrot.lane.b32.xlu1 %v3216_v28, %s3124_s21  ;;  %v3242_v49 = vsel %vm508_vm0, %v563_v44, %v567_v40  ;;  %v555_v50 = vor.u32 %v554_v45, %v550_v35  ;;  %v574_v59 = vrot.slane %v572_v52, 1  ;;  %v605_v2 = vshll.u32 %v3250_v54, 16  ;;  %v3298_v32 = vld [vmem:[%s3171_s20 + $0x88] ss:$0 sps:$4 sm:$0x11]   ;;  %v3307_v38 = vld [vmem:[%s3171_s20 + $0x94] sm:$0xff]  }
  0x1e   : > { %831 = vrot.lane.b32.xlu0 %v528_v39, %s3124_s21  ;;  %v583_v55 = vor.u32 %v581_v43, %v579_v47  ;;  %v590_v3 = vshrl.u32 %v3253_v57, 16  ;;  %v592_v4 = vshll.u32 %v3253_v57, 16  ;;  %v599_v10 = vrot.slane %v597_v60, 1  ;;  %v3323_v52 = vld [vmem:[%s3171_s20 + $0x9c] ss:$0 sps:$4 sm:$0x11]  }
  0x1f   : > { %v3258_v58 = vsel %vm508_vm0, %v555_v50, %v559_v37  ;;  %v575_v9 = vor.u32 %v574_v59, %v570_v51  ;;  %v607_v12 = vrot.slane %v605_v2, 1  ;;  %v617_v14 = vshll.u32 %v3263_v62, 16 }
  0x20   : > { %v3266_v63 = vsel %vm508_vm0, %v583_v55, %v587_v56  ;;  %v594_v13 = vrot.slane %v592_v4, 1  ;;  %v621_v16 = vshrl.u32 %v3263_v62, 16  ;;  %v603_v18 = vor.u32 %v601_v61, %v599_v10 }
  0x21   : > { %839 = vrot.lane.b32.xlu1 %v3242_v49, %s3124_s21  ;;  %v3284_v17 = vsel %vm508_vm0, %v575_v9, %v579_v47  ;;  %v625_v19 = vshll.u32 %v3277_v11, 16  ;;  %v610_v20 = vshrl.u32 %v3272_v8, 16  ;;  %v619_v22 = vrot.slane %v617_v14, 1 }
  0x22   : > { %837 = vrot.lane.b32.xlu0 %v3258_v58, %s3124_s21  ;;  %v595_v21 = vor.u32 %v594_v13, %v590_v3  ;;  %v612_v25 = vshll.u32 %v3272_v8, 16  ;;  %v3292_v29 = vsel %vm508_vm0, %v603_v18, %v607_v12  ;;  %v637_v39 = vshll.u32 %v3295_v31, 16  ;;  %v3333_v3 = vld [vmem:[%s3171_s20 + $0x8c] sm:$0xff]  }
  0x23   : > { %4848 = vst [vmem:[#allocation2_spill] sm:$0xff] %v3292_v29  ;;  %v627_v30 = vrot.slane %v625_v19, 1  ;;  %v623_v35 = vor.u32 %v621_v16, %v619_v22  ;;  %v641_v40 = vshrl.u32 %v3295_v31, 16  ;;  %v645_v42 = vshll.u32 %v3298_v32, 16  ;;  %v3349_v19 = vld [vmem:[%s3171_s20 + $0xa0] sm:$0xff]  }
  0x24   : > { %v3304_v34 = vsel %vm508_vm0, %v595_v21, %v599_v10  ;;  %v614_v37 = vrot.slane %v612_v25, 1  ;;  %v630_v43 = vshrl.u32 %v3301_v33, 16  ;;  %v632_v47 = vshll.u32 %v3301_v33, 16  ;;  %v3336_v10 = vld [vmem:[%s3171_s20 + $0xa8] sm:$0xff]  }
  0x25   : > { %843 = vrot.lane.b32.xlu1 %v3266_v63, %s3124_s21  ;;  %v3316_v44 = vsel %vm508_vm0, %v623_v35, %v627_v30  ;;  %v657_v48 = vshll.u32 %v3307_v38, 16  ;;  %v639_v50 = vrot.slane %v637_v39, 1  ;;  %v647_v51 = vrot.slane %v645_v42, 1  ;;  %v3339_v12 = vld [vmem:[%s3171_s20 + $0xb0] ss:$0 sps:$4 sm:$0x11]  }
  0x26   : > { %841 = vrot.lane.b32.xlu0 %v3284_v17, %s3124_s21  ;;  %4849 = vst [vmem:[#allocation3_spill] sm:$0xff] %v3316_v44  ;;  %v615_v45 = vor.u32 %v614_v37, %v610_v20  ;;  %v661_v55 = vshrl.u32 %v3307_v38, 16  ;;  %v634_v59 = vrot.slane %v632_v47, 1  ;;  %v665_v2 = vshll.u32 %v3323_v52, 16  ;;  %v3358_v30 = vld [vmem:[%s3171_s20 + $0xbc] sm:$0xff]  }
  0x27   : > { %v659_v60 = vrot.slane %v657_v48, 1  ;;  %v643_v61 = vor.u32 %v641_v40, %v639_v50  ;;  %v650_v16 = vshrl.u32 %v3333_v3, 16  ;;  %v652_v18 = vshll.u32 %v3333_v3, 16  ;;  %v3365_v40 = vld [vmem:[%s3171_s20 + $0xb4] sm:$0xff]  }
  0x28   : > { %v3327_v56 = vsel %vm508_vm0, %v615_v45, %v619_v22  ;;  %v635_v4 = vor.u32 %v634_v59, %v630_v43  ;;  %v667_v14 = vrot.slane %v665_v2, 1  ;;  %v677_v21 = vshll.u32 %v3336_v10, 16 }
  0x29   : > { %847 = vrot.lane.b32.xlu1 %v3292_v29, %s3124_s21  ;;  %4850 = vst [vmem:[#allocation4_spill] sm:$0xff] %v3327_v56  ;;  %v663_v9 = vor.u32 %v661_v55, %v659_v60  ;;  %v3344_v13 = vsel %vm508_vm0, %v643_v61, %v647_v51  ;;  %v681_v22 = vshrl.u32 %v3336_v10, 16  ;;  %v685_v25 = vshll.u32 %v3339_v12, 16 }
  0x2a   : > { %845 = vrot.lane.b32.xlu0 %v3304_v34, %s3124_s21  ;;  %4851 = vst [vmem:[#allocation5_spill] sm:$0xff] %v3344_v13  ;;  %v3352_v20 = vsel %vm508_vm0, %v635_v4, %v639_v50  ;;  %v654_v35 = vrot.slane %v652_v18, 1  ;;  %v670_v37 = vshrl.u32 %v3349_v19, 16  ;;  %v672_v39 = vshll.u32 %v3349_v19, 16 }
  0x2b   : > { %4852 = vst [vmem:[#allocation6_spill] sm:$0xff] %v3352_v20  ;;  %v3368_v42 = vsel %vm508_vm0, %v663_v9, %v667_v14  ;;  %v679_v43 = vrot.slane %v677_v21, 1  ;;  %v687_v45 = vrot.slane %v685_v25, 1  ;;  %v3373_v50 = vld [vmem:[%s3171_s20 + $0xc4] ss:$0 sps:$4 sm:$0x11]  }
  0x2c   : > { %4853 = vst [vmem:[#allocation7_spill] sm:$0xff] %v3368_v42  ;;  %v655_v47 = vor.u32 %v654_v35, %v650_v16  ;;  %v674_v48 = vrot.slane %v672_v39, 1  ;;  %v697_v51 = vshll.u32 %v3358_v30, 16  ;;  %v701_v55 = vshrl.u32 %v3358_v30, 16 }
  0x2d   : > { %851 = vrot.lane.b32.xlu1 %v3316_v44, %s3124_s21  ;;  %v683_v59 = vor.u32 %v681_v22, %v679_v43  ;;  %v690_v61 = vshrl.u32 %v3365_v40, 16  ;;  %v692_v2 = vshll.u32 %v3365_v40, 16  ;;  %v705_v16 = vshll.u32 %v3373_v50, 16  ;;  %v3389_v22 = vld [vmem:[%s3171_s20 + $0xd0] sm:$0xff]  }
  0x2e   : > { %849 = vrot.lane.b32.xlu0 %v3327_v56, %s3124_s21  ;;  %v3382_v4 = vsel %vm508_vm0, %v655_v47, %v659_v60  ;;  %v675_v9 = vor.u32 %v674_v48, %v670_v37  ;;  %v699_v14 = vrot.slane %v697_v51, 1  ;;  %v3049_v60 = vld [vmem:[%s3171_s20 + $0xd8] ss:$0 sps:$4 sm:$0x11]   ;;  %v717_v47 = vshll.u32 %v3389_v22, 16  ;;  %v3400_v48 = vld [vmem:[%s3171_s20 + $0xc8] sm:$0xff]  }
  0x2f   : > { %4854 = vst [vmem:[#allocation8_spill] sm:$0xff] %v3382_v4  ;;  %v3386_v18 = vsel %vm508_vm0, %v683_v59, %v687_v45  ;;  %v694_v21 = vrot.slane %v692_v2, 1  ;;  %v707_v35 = vrot.slane %v705_v16, 1  ;;  %v721_v45 = vshrl.u32 %v3389_v22, 16  ;;  %v3051_v51 = vld [vmem:[%s3171_s20 + $0xe4] sm:$0xff]   ;;  %v3053_v2 = vld [vmem:[%s3171_s20 + $0xdc] sm:$0xff]  }
  0x30   : > { %4855 = vst [vmem:[#allocation9_spill] sm:$0xff] %v3386_v18  ;;  %v703_v25 = vor.u32 %v701_v55, %v699_v14  ;;  %v3395_v39 = vsel %vm508_vm0, %v675_v9, %v679_v43  ;;  %v725_v55 = vshll.u32 %v3049_v60, 16  ;;  %v710_v9 = vshrl.u32 %v3400_v48, 16 }
  0x31   : > { %855 = vrot.lane.b32.xlu1 %v3344_v13, %s3124_s21  ;;  %4856 = vst [vmem:[#allocation10_spill] sm:$0xff] %v3395_v39  ;;  %v695_v37 = vor.u32 %v694_v21, %v690_v61  ;;  %v719_v61 = vrot.slane %v717_v47, 1  ;;  %v712_v16 = vshll.u32 %v3400_v48, 16  ;;  %v3052_v21 = vld [vmem:[%s3171_s20 + $0xec] ss:$0 sps:$4 sm:$0x11]  }
  0x32   : > { %853 = vrot.lane.b32.xlu0 %v3352_v20, %s3124_s21  ;;  %v3406_v59 = vsel %vm508_vm0, %v703_v25, %v707_v35  ;;  %v741_v25 = vshrl.u32 %v3051_v51, 16  ;;  %v730_v35 = vshrl.u32 %v3053_v2, 16  ;;  %v745_v13 = vshll.u32 %v3052_v21, 16  ;;  %v3056_v20 = vld [vmem:[%s3171_s20 + $0xf0] sm:$0xff]  }
  0x33   : > { %4857 = vst [vmem:[#allocation11_spill] sm:$0xff] %v3406_v59  ;;  %v3410_v43 = vsel %vm508_vm0, %v695_v37, %v699_v14  ;;  %v723_v60 = vor.u32 %v721_v45, %v719_v61  ;;  %v732_v14 = vshll.u32 %v3053_v2, 16  ;;  %v3054_v37 = vld [vmem:[%s3171_s20 + $0xf8] sm:$0xff]   ;;  %v750_v21 = vshrl.u32 %v3056_v20, 16 }
  0x34   : > { %4858 = vst [vmem:[#allocation12_spill] sm:$0xff] %v3410_v43  ;;  %v757_v2 = vshll.u32 %v3054_v37, 16  ;;  %v752_v29 = vshll.u32 %v3056_v20, 16 }
  0x35   : > { %859 = vrot.lane.b32.xlu1 %v3368_v42, %s3124_s21  ;;  %v737_v42 = vshll.u32 %v3051_v51, 16  ;;  %v734_v56 = vrot.slane %v732_v14, 1  ;;  %v3055_v51 = vld [vmem:[%s3171_s20 + $0x100] ss:$0 sps:$4 sm:$0x11]  }
  0x36   : > { %857 = vrot.lane.b32.xlu0 %v3382_v4, %s3124_s21  ;;  %v714_v4 = vrot.slane %v712_v16, 1  ;;  %v761_v16 = vshrl.u32 %v3054_v37, 16 }
  0x37   : > { %v739_v47 = vrot.slane %v737_v42, 1  ;;  %v735_v42 = vor.u32 %v734_v56, %v730_v35 }
  0x39   : > { %863 = vrot.lane.b32.xlu1 %v3386_v18, %s3124_s21  ;;  %v727_v18 = vrot.slane %v725_v55, 1  ;;  %v747_v55 = vrot.slane %v745_v13, 1  ;;  %v743_v45 = vor.u32 %v741_v25, %v739_v47  ;;  %v759_v13 = vrot.slane %v757_v2, 1  ;;  %v3060_v2 = vld [vmem:[%s3171_s20 + $0x120] sm:$0xff]  }
  0x3a   : > { %861 = vrot.lane.b32.xlu0 %v3395_v39, %s3124_s21  ;;  %v715_v39 = vor.u32 %v714_v4, %v710_v9  ;;  %v765_v4 = vshll.u32 %v3055_v51, 16  ;;  %v754_v25 = vrot.slane %v752_v29, 1 }
  0x3b   : > { %v3422_v44 = vsel %vm508_vm0, %v723_v60, %v727_v18  ;;  %v3057_v18 = vld [vmem:[%s3171_s20 + $0x10c] sm:$0xff]   ;;  %v3434_v9 = vsel %vm508_vm0, %v743_v45, %v747_v55  ;;  %v3058_v60 = vld [vmem:[%s3171_s20 + $0x114] ss:$0 sps:$4 sm:$0x11]   ;;  %v763_v56 = vor.u32 %v761_v16, %v759_v13 }
  0x3c   : > { %4859 = vst [vmem:[#allocation13_spill] sm:$0xff] %v3422_v44  ;;  %4861 = vst [vmem:[#allocation15_spill] sm:$0xff] %v3434_v9  ;;  %v777_v14 = vshll.u32 %v3057_v18, 16  ;;  %v781_v37 = vshrl.u32 %v3057_v18, 16  ;;  %v767_v20 = vrot.slane %v765_v4, 1  ;;  %v755_v35 = vor.u32 %v754_v25, %v750_v21  ;;  %v3062_v18 = vld [vmem:[%s3171_s20 + $0x118] sm:$0xff]  }
  0x3d   : > { %867 = vrot.lane.b32.xlu1 %v3406_v59, %s3124_s21  ;;  %v3428_v59 = vsel %vm508_vm0, %v715_v39, %v719_v61  ;;  %v3059_v39 = vld [vmem:[%s3171_s20 + $0x104] sm:$0xff]   ;;  %v3441_v61 = vsel %vm508_vm0, %v735_v42, %v739_v47  ;;  %v785_v55 = vshll.u32 %v3058_v60, 16  ;;  %v797_v21 = vshll.u32 %v3060_v2, 16 }
  0x3e   : > { %865 = vrot.lane.b32.xlu0 %v3410_v43, %s3124_s21  ;;  %4860 = vst [vmem:[#allocation14_spill] sm:$0xff] %v3428_v59  ;;  %4862 = vst [vmem:[#allocation16_spill] sm:$0xff] %v3441_v61  ;;  %v779_v51 = vrot.slane %v777_v14, 1  ;;  %v770_v29 = vshrl.u32 %v3059_v39, 16  ;;  %v772_v45 = vshll.u32 %v3059_v39, 16  ;;  %v801_v42 = vshrl.u32 %v3060_v2, 16 }
  0x3f   : > { %v787_v4 = vrot.slane %v785_v55, 1  ;;  %v790_v25 = vshrl.u32 %v3062_v18, 16  ;;  %v3454_v60 = vsel %vm508_vm0, %v755_v35, %v759_v13  ;;  %v792_v39 = vshll.u32 %v3062_v18, 16  ;;  %v3065_v43 = vld [vmem:[%s3171_s20 + $0x12c] sm:$0xff]  }
  0x40   : > { %v783_v16 = vor.u32 %v781_v37, %v779_v51  ;;  %v774_v47 = vrot.slane %v772_v45, 1  ;;  %v3064_v45 = vld [vmem:[%s3171_s20 + $0x13c] ss:$0 sps:$4 sm:$0x11]  }
  0x41   : > { %871 = vrot.lane.b32.xlu1 %v3422_v44, %s3124_s21  ;;  %v3448_v44 = vsel %vm508_vm0, %v763_v56, %v767_v20  ;;  %v799_v56 = vrot.slane %v797_v21, 1  ;;  %v3063_v20 = vld [vmem:[%s3171_s20 + $0x134] sm:$0xff]   ;;  %v812_v21 = vshll.u32 %v3065_v43, 16 }
  0x42   : > { %869 = vrot.lane.b32.xlu0 %v3428_v59, %s3124_s21  ;;  %v3061_v59 = vld [vmem:[%s3171_s20 + $0x128] ss:$0 sps:$4 sm:$0x11]   ;;  %v775_v37 = vor.u32 %v774_v47, %v770_v29  ;;  %v3460_v55 = vsel %vm508_vm0, %v783_v16, %v787_v4  ;;  %v817_v35 = vshll.u32 %v3063_v20, 16  ;;  %v821_v2 = vshrl.u32 %v3063_v20, 16 }
  0x43   : > { %v805_v14 = vshll.u32 %v3061_v59, 16  ;;  %v803_v59 = vor.u32 %v801_v42, %v799_v56  ;;  %v825_v29 = vshll.u32 %v3064_v45, 16  ;;  %v810_v47 = vshrl.u32 %v3065_v43, 16 }
  0x44   : > { %v3467_v13 = vsel %vm508_vm0, %v775_v37, %v779_v51  ;;  %v819_v16 = vrot.slane %v817_v35, 1  ;;  %v900_v45 = vrot.slane %v3177_v1, 1  ;;  %v905_v35 = vrot.slane %v3202_v23, 1 }
  0x45   : > { %875 = vrot.lane.b32.xlu1 %v3434_v9, %s3124_s21  ;;  %v807_v9 = vrot.slane %v805_v14, 1  ;;  %v827_v14 = vrot.slane %v825_v29, 1 }
  0x46   : > { %873 = vrot.lane.b32.xlu0 %v3441_v61, %s3124_s21  ;;  %v794_v61 = vrot.slane %v792_v39, 1  ;;  %v814_v39 = vrot.slane %v812_v21, 1  ;;  %v823_v51 = vor.u32 %v821_v2, %v819_v16  ;;  %v907_v2 = vrot.slane %v3208_v26, 1 }
  0x47   : > { %v3472_v4 = vsel %vm508_vm0, %v803_v59, %v807_v9  ;;  %v897_v9 = vrot.slane %v3197_v15, 1  ;;  %v899_v59 = vrot.slane %v3174_v0, 1  ;;  %v912_v21 = vrot.slane %v3230_v41, 1 }
  0x48   : > { %v795_v18 = vor.u32 %v794_v61, %v790_v25  ;;  %4863 = vst [vmem:[#allocation17_spill] sm:$0xff] %v3472_v4  ;;  %v815_v61 = vor.u32 %v814_v39, %v810_v47  ;;  %v3482_v43 = vsel %vm508_vm0, %v823_v51, %v827_v14  ;;  %v895_v25 = vrot.slane %v3186_v6, 1 }
  0x49   : > { %879 = vrot.lane.b32.xlu1 %v3448_v44, %s3124_s21  ;;  %4865 = vst [vmem:[#allocation19_spill] sm:$0xff] %v3482_v43  ;;  %v902_v6 = vrot.slane %v3189_v7, 1  ;;  %v3509_v7 = vsel %vm893_vm1, %v899_v59, %v900_v45  ;;  %v3515_v29 = vsel %vm893_vm1, %v905_v35, %v907_v2  ;;  %v910_v47 = vrot.slane %v3224_v36, 1 }
  0x4a   : > { %877 = vrot.lane.b32.xlu0 %v3454_v60, %s3124_s21  ;;  %v3477_v42 = vsel %vm508_vm0, %v795_v18, %v799_v56  ;;  %v3489_v37 = vsel %vm508_vm0, %v815_v61, %v819_v16  ;;  %v894_v56 = vrot.slane %v3183_v5, 1  ;;  %v898_v20 = vsel %vm893_vm1, %v895_v25, %v897_v9 }
  0x4b   : > { %4864 = vst [vmem:[#allocation18_spill] sm:$0xff] %v3477_v42  ;;  %4866 = vst [vmem:[#allocation20_spill] sm:$0xff] %v3489_v37  ;;  %v3503_v5 = vsel %vm893_vm1, %v900_v45, %v902_v6  ;;  %v904_v18 = vrot.slane %v3211_v27, 1  ;;  %v909_v16 = vrot.slane %v3237_v46, 1  ;;  %v3528_v14 = vsel %vm893_vm1, %v910_v47, %v912_v21 }
  0x4c   : > { %v896_v15 = vsel %vm893_vm1, %v894_v56, %v895_v25  ;;  %v915_v39 = vrot.slane %v3247_v53, 1  ;;  %v917_v51 = vrot.slane %v3250_v54, 1  ;;  %v914_v61 = vrot.slane %v3253_v57, 1 }
  0x4d   : > { %883 = vrot.lane.b32.xlu1 %v3460_v55, %s3124_s21  ;;  %v3522_v26 = vsel %vm893_vm1, %v904_v18, %v905_v35  ;;  %v3535_v41 = vsel %vm893_vm1, %v909_v16, %v910_v47  ;;  %v920_v9 = vrot.slane %v3263_v62, 1  ;;  %v922_v56 = vrot.slane %v3277_v11, 1 }
  0x4e   : > { %881 = vrot.lane.b32.xlu0 %v3467_v13, %s3124_s21  ;;  %v3541_v25 = vsel %vm893_vm1, %v915_v39, %v917_v51  ;;  %v3548_v54 = vsel %vm893_vm1, %v914_v61, %v915_v39  ;;  %v925_v6 = vrot.slane %v3295_v31, 1  ;;  %v924_v59 = vrot.slane %v3301_v33, 1 }
  0x4f   : > { %v3554_v45 = vsel %vm893_vm1, %v920_v9, %v922_v56  ;;  %v930_v2 = vrot.slane %v3307_v38, 1  ;;  %v932_v18 = vrot.slane %v3323_v52, 1  ;;  %v929_v47 = vrot.slane %v3333_v3, 1 }
  0x50   : > { %v935_v16 = vrot.slane %v3336_v10, 1  ;;  %v937_v39 = vrot.slane %v3339_v12, 1  ;;  %v934_v51 = vrot.slane %v3349_v19, 1  ;;  %v942_v56 = vrot.slane %v3373_v50, 1 }
  0x51   : > { %887 = vrot.lane.b32.xlu1 %v3472_v4, %s3124_s21  ;;  %v3580_v21 = vsel %vm893_vm1, %v930_v2, %v932_v18  ;;  %v3587_v52 = vsel %vm893_vm1, %v929_v47, %v930_v2  ;;  %v4839_v2 = vrot.slane %v3389_v22, 1  ;;  %v3067_v18 = vld [vmem:[%s4805_s1 + $0x18] sm:$0xff]   ;;  %v3068_v47 = vld [vmem:[%s4805_s1 + $0x10] sm:$0xff]  }
  0x52   : > { %885 = vrot.lane.b32.xlu0 %v3477_v42, %s3124_s21  ;;  %v3593_v61 = vsel %vm893_vm1, %v935_v16, %v937_v39  ;;  %v3600_v12 = vsel %vm893_vm1, %v934_v51, %v935_v16  ;;  %v3069_v16 = vld [vmem:[%s4805_s1 + $0x8] sm:$0xff]  }
  0x55   : > { %891 = vrot.lane.b32.xlu1 %v3482_v43, %s3124_s21 }
  0x56   : > { %889 = vrot.lane.b32.xlu0 %v3489_v37, %s3124_s21  ;;  %s4371_s21 = scalar_lea.vmem %s4807_s3, %s2877_s13 }
  0x59   : > { %976 = vrot.lane.b32.xlu1 %v898_v20, %s3125_s22  ;;  %v919_v20 = vrot.slane %v3272_v8, 1 }
  0x5a   : > { %974 = vrot.lane.b32.xlu0 %v896_v15, %s3125_s22  ;;  %v927_v15 = vrot.slane %v3298_v32, 1  ;;  %v3574_v32 = vsel %vm893_vm1, %v924_v59, %v925_v6  ;;  %v944_v59 = vrot.slane %v3400_v48, 1 }
  0x5b   : > { %v3561_v11 = vsel %vm893_vm1, %v919_v20, %v920_v9  ;;  %v940_v9 = vrot.slane %v3358_v30, 1  ;;  %v939_v20 = vrot.slane %v3365_v40, 1 }
  0x5c   : > { %v3567_v35 = vsel %vm893_vm1, %v925_v6, %v927_v15  ;;  %v3066_v6 = vld [vmem:[%s4805_s1 + $0x20] ss:$0 sps:$4 sm:$0xff]   ;;  %v3628_v48 = vsel %vm893_vm1, %v944_v59, %v4839_v2 }
  0x5d   : > { %980 = vrot.lane.b32.xlu1 %v3503_v5, %s3125_s22  ;;  %v3609_v15 = vsel %vm893_vm1, %v940_v9, %v942_v56  ;;  %2999 = vmatprep.subr.msk.bf16.mxu0 %vm2126_vm2, %v3066_v6  ;;  %v2128_v30 = vsel %vm2126_vm2, %v3066_v6, 0  ;;  %v3614_v50 = vsel %vm893_vm1, %v939_v20, %v940_v9 }
  0x5e   : > { %978 = vrot.lane.b32.xlu0 %v3509_v7, %s3125_s22  ;;  %2916 = vmatpush3.bf16.msra.mxu0 %v2128_v30 }
  0x5f   : > { %3000 = vmatprep.subr.msk.bf16.mxu1 %vm2126_vm2, %v3066_v6  ;;  %2917 = vmatprep.subr.bf16.mxu0 %v3067_v18 }
  0x60   : > { %2994 = vmatpush3.bf16.msra.mxu1 %v2128_v30 }
  0x61   : > { %984 = vrot.lane.b32.xlu1 %v3515_v29, %s3125_s22  ;;  %2990 = vmatprep.subr.bf16.mxu1 %v3067_v18 }
  0x62   : > { %982 = vrot.lane.b32.xlu0 %v3522_v26, %s3125_s22  ;;  %2918 = vmatpush3.bf16.msra.mxu0 %v3067_v18 }
  0x63   : > { %2919 = vmatprep.subr.bf16.mxu0 %v3068_v47 }
  0x64   : > { %2995 = vmatpush3.bf16.msra.mxu1 %v3067_v18 }
  0x65   : > { %988 = vrot.lane.b32.xlu1 %v3528_v14, %s3125_s22  ;;  %2991 = vmatprep.subr.bf16.mxu1 %v3068_v47 }
  0x66   : > { %986 = vrot.lane.b32.xlu0 %v3535_v41, %s3125_s22  ;;  %2920 = vmatpush3.bf16.msra.mxu0 %v3068_v47 }
  0x67   : > { %2921 = vmatprep.subr.bf16.mxu0 %v3069_v16 }
  0x68   : > { %2996 = vmatpush3.bf16.msra.mxu1 %v3068_v47 }
  0x69   : > { %992 = vrot.lane.b32.xlu1 %v3541_v25, %s3125_s22  ;;  %2992 = vmatprep.subr.bf16.mxu1 %v3069_v16 }
  0x6a   : > { %990 = vrot.lane.b32.xlu0 %v3548_v54, %s3125_s22  ;;  %2922 = vmatpush3.bf16.msra.mxu0 %v3069_v16 }
  0x6c   : > { %2997 = vmatpush3.bf16.msra.mxu1 %v3069_v16 }
  0x6d   : > { %996 = vrot.lane.b32.xlu1 %v3554_v45, %s3125_s22 }
  0x6e   : > { %994 = vrot.lane.b32.xlu0 %v3561_v11, %s3125_s22 }
  0x71   : > { %1000 = vrot.lane.b32.xlu1 %v3567_v35, %s3125_s22 }
  0x72   : > { %998 = vrot.lane.b32.xlu0 %v3574_v32, %s3125_s22 }
  0x75   : > { %1004 = vrot.lane.b32.xlu1 %v3580_v21, %s3125_s22 }
  0x76   : > { %1002 = vrot.lane.b32.xlu0 %v3587_v52, %s3125_s22 }
  0x79   : > { %1008 = vrot.lane.b32.xlu1 %v3593_v61, %s3125_s22 }
  0x7a   : > { %1006 = vrot.lane.b32.xlu0 %v3600_v12, %s3125_s22 }
  0x7d   : > { %1012 = vrot.lane.b32.xlu1 %v3609_v15, %s3125_s22 }
  0x7e   : > { %1010 = vrot.lane.b32.xlu0 %v3614_v50, %s3125_s22 }
  0x81   : > { %1048 = vrot.lane.b32.xlu1 %v3174_v0, %s3126_s27  ;;  %v3070_v0 = vld [vmem:[%s4805_s1] sm:$0xff]  }
  0x82   : > { %1014 = vrot.lane.b32.xlu0 %v3628_v48, %s3125_s22  ;;  %2923 = vmatprep.subr.bf16.mxu0 %v3070_v0 }
  0x83   : > { %2924 = vmatpush3.bf16.msra.mxu0 %v3070_v0  ;;  %2993 = vmatprep.subr.bf16.mxu1 %v3070_v0 }
  0x84   : > { %2998 = vmatpush3.bf16.msra.mxu1 %v3070_v0 }
  0x85   : > { %1135 = vrot.lane.b32.xlu1 %v3205_v24, %s3127_s30 }
  0x86   : > { %1050 = vrot.lane.b32.xlu0 %v3177_v1, %s3126_s27 }
  0x89   : > { %1204 = vrot.lane.b32.xlu1 %v3509_v7, %s3128_s7 }
  0x8a   : > { %1137 = vrot.lane.b32.xlu0 %v3216_v28, %s3127_s30 }
  0x8b   : > { %v3651_v24 = vpop.permute.xlu1 %833 }
  0x8c   : > { %v3653_v1 = vpop.permute.xlu0 %829 }
  0x8d   : > { %1278 = vrot.lane.b32.xlu1 %v3211_v27, %s3129_s10 }
  0x8e   : > { %1206 = vrot.lane.b32.xlu0 %v3503_v5, %s3128_s7 }
  0x8f   : > { %v3659_v7 = vpop.permute.xlu1 %835 }
  0x90   : > { %v3661_v39 = vpop.permute.xlu0 %831 }
  0x91   : > { %1365 = vrot.lane.b32.xlu1 %v3258_v58, %s3130_s11 }
  0x92   : > { %1280 = vrot.lane.b32.xlu0 %v3202_v23, %s3129_s10 }
  0x93   : > { %v3667_v28 = vpop.permute.xlu1 %839 }
  0x94   : > { %v3669_v51 = vpop.permute.xlu0 %837 }
  0x95   : > { %1434 = vrot.lane.b32.xlu1 %v3522_v26, %s3131_s12 }
  0x96   : > { %1367 = vrot.lane.b32.xlu0 %v3242_v49, %s3130_s11 }
  0x97   : > { %v3675_v5 = vpop.permute.xlu1 %843 }
  0x98   : > { %v3677_v9 = vpop.permute.xlu0 %841 }
  0x99   : > { %1052 = vrot.lane.b32.xlu1 %v3211_v27, %s3126_s27 }
  0x9a   : > { %1436 = vrot.lane.b32.xlu0 %v3515_v29, %s3131_s12 }
  0x9b   : > { %v3683_v56 = vpop.permute.xlu1 %847 }
  0x9c   : > { %v3685_v20 = vpop.permute.xlu0 %845 }
  0x9d   : > { %1139 = vrot.lane.b32.xlu1 %v3258_v58, %s3127_s30 }
  0x9e   : > { %1054 = vrot.lane.b32.xlu0 %v3202_v23, %s3126_s27 }
  0x9f   : > { %v3691_v6 = vpop.permute.xlu1 %851 }
  0xa0   : > { %v3693_v30 = vpop.permute.xlu0 %849 }
  0xa1   : > { %1208 = vrot.lane.b32.xlu1 %v3522_v26, %s3128_s7 }
  0xa2   : > { %1141 = vrot.lane.b32.xlu0 %v3242_v49, %s3127_s30 }
  0xa3   : > { %v3699_v27 = vpop.permute.xlu1 %855 }
  0xa4   : > { %v3701_v59 = vpop.permute.xlu0 %853 }
  0xa5   : > { %1282 = vrot.lane.b32.xlu1 %v3237_v46, %s3129_s10 }
  0xa6   : > { %1210 = vrot.lane.b32.xlu0 %v3515_v29, %s3128_s7 }
  0xa7   : > { %v3707_v23 = vpop.permute.xlu1 %859 }
  0xa8   : > { %v3709_v58 = vpop.permute.xlu0 %857 }
  0xa9   : > { %1369 = vrot.lane.b32.xlu1 %v3284_v17, %s3130_s11 }
  0xaa   : > { %1284 = vrot.lane.b32.xlu0 %v3224_v36, %s3129_s10 }
  0xab   : > { %v3715_v49 = vpop.permute.xlu1 %863 }
  0xac   : > { %4867 = vst [vmem:[#allocation21_spill] sm:$0xff] %v3715_v49  ;;  %v3717_v26 = vpop.permute.xlu0 %861  ;;  %v4891_v49 = vld [vmem:[#allocation6_spill] sm:$0xff] }
  0xad   : > { %4868 = vst [vmem:[#allocation22_spill] sm:$0xff] %v3717_v26  ;;  %1438 = vrot.lane.b32.xlu1 %v3535_v41, %s3131_s12  ;;  %v3077_v26 = vld [vmem:[%s3171_s20] sm:$0xff]  }
  0xae   : > { %1371 = vrot.lane.b32.xlu0 %v3266_v63, %s3130_s11  ;;  %v1500_v42 = vsel %vm1498_vm3, %v3077_v26, %v3653_v1 }
  0xaf   : > { %v3723_v29 = vpop.permute.xlu1 %867 }
  0xb0   : > { %4869 = vst [vmem:[#allocation23_spill] sm:$0xff] %v3723_v29  ;;  %v3725_v18 = vpop.permute.xlu0 %865 }
  0xb1   : > { %4870 = vst [vmem:[#allocation24_spill] sm:$0xff] %v3725_v18  ;;  %1056 = vrot.lane.b32.xlu1 %v3237_v46, %s3126_s27 }
  0xb2   : > { %1440 = vrot.lane.b32.xlu0 %v3528_v14, %s3131_s12 }
  0xb3   : > { %v3731_v47 = vpop.permute.xlu1 %871 }
  0xb4   : > { %4871 = vst [vmem:[#allocation25_spill] sm:$0xff] %v3731_v47  ;;  %v3733_v16 = vpop.permute.xlu0 %869 }
  0xb5   : > { %4872 = vst [vmem:[#allocation26_spill] sm:$0xff] %v3733_v16  ;;  %1143 = vrot.lane.b32.xlu1 %v3284_v17, %s3127_s30 }
  0xb6   : > { %1058 = vrot.lane.b32.xlu0 %v3224_v36, %s3126_s27 }
  0xb7   : > { %v3739_v0 = vpop.permute.xlu1 %875 }
  0xb8   : > { %4873 = vst [vmem:[#allocation27_spill] sm:$0xff] %v3739_v0  ;;  %v3741_v2 = vpop.permute.xlu0 %873 }
  0xb9   : > { %4874 = vst [vmem:[#allocation28_spill] sm:$0xff] %v3741_v2  ;;  %1212 = vrot.lane.b32.xlu1 %v3535_v41, %s3128_s7  ;;  %v4885_v2 = vld [vmem:[#allocation3_spill] sm:$0xff] }
  0xba   : > { %1145 = vrot.lane.b32.xlu0 %v3266_v63, %s3127_s30 }
  0xbb   : > { %v3747_v46 = vpop.permute.xlu1 %879 }
  0xbc   : > { %4875 = vst [vmem:[#allocation29_spill] sm:$0xff] %v3747_v46  ;;  %v3749_v47 = vpop.permute.xlu0 %877  ;;  %v4884_v46 = vld [vmem:[#allocation4_spill] sm:$0xff] }
  0xbd   : > { %4876 = vst [vmem:[#allocation30_spill] sm:$0xff] %v3749_v47  ;;  %1286 = vrot.lane.b32.xlu1 %v3253_v57, %s3129_s10  ;;  %v4881_v47 = vld [vmem:[#allocation2_spill] sm:$0xff] }
  0xbe   : > { %1214 = vrot.lane.b32.xlu0 %v3528_v14, %s3128_s7 }
  0xbf   : > { %v3755_v36 = vpop.permute.xlu1 %883 }
  0xc0   : > { %4877 = vst [vmem:[#allocation31_spill] sm:$0xff] %v3755_v36  ;;  %v3757_v17 = vpop.permute.xlu0 %881 }
  0xc1   : > { %4878 = vst [vmem:[#allocation32_spill] sm:$0xff] %v3757_v17  ;;  %1373 = vrot.lane.b32.xlu1 %v3304_v34, %s3130_s11 }
  0xc2   : > { %1288 = vrot.lane.b32.xlu0 %v3247_v53, %s3129_s10 }
  0xc3   : > { %v3763_v63 = vpop.permute.xlu1 %887 }
  0xc4   : > { %4879 = vst [vmem:[#allocation33_spill] sm:$0xff] %v3763_v63  ;;  %v3765_v41 = vpop.permute.xlu0 %885 }
  0xc5   : > { %4880 = vst [vmem:[#allocation34_spill] sm:$0xff] %v3765_v41  ;;  %1442 = vrot.lane.b32.xlu1 %v3548_v54, %s3131_s12 }
  0xc6   : > { %1375 = vrot.lane.b32.xlu0 %v4881_v47, %s3130_s11 }
  0xc7   : > { %v3771_v14 = vpop.permute.xlu1 %891 }
  0xc8   : > { %4882 = vst [vmem:[#allocation2_spill] sm:$0xff] %v3771_v14  ;;  %v3773_v36 = vpop.permute.xlu0 %889 }
  0xc9   : > { %4883 = vst [vmem:[#allocation35_spill] sm:$0xff] %v3773_v36  ;;  %1060 = vrot.lane.b32.xlu1 %v3253_v57, %s3126_s27 }
  0xca   : > { %1444 = vrot.lane.b32.xlu0 %v3541_v25, %s3131_s12 }
  0xcb   : > { %v3779_v17 = vpop.permute.xlu1 %976 }
  0xcc   : > { %v975_v63 = vpop.permute.xlu0 %974 }
  0xcd   : > { %1147 = vrot.lane.b32.xlu1 %v3304_v34, %s3127_s30  ;;  %v1565_v4 = vsel %vm1563_vm4, %v1500_v42, %v975_v63 }
  0xce   : > { %1062 = vrot.lane.b32.xlu0 %v3247_v53, %s3126_s27 }
  0xcf   : > { %v3785_v41 = vpop.permute.xlu1 %980 }
  0xd0   : > { %v3787_v14 = vpop.permute.xlu0 %978 }
  0xd1   : > { %1216 = vrot.lane.b32.xlu1 %v3548_v54, %s3128_s7 }
  0xd2   : > { %1149 = vrot.lane.b32.xlu0 %v4881_v47, %s3127_s30 }
  0xd3   : > { %v3793_v57 = vpop.permute.xlu1 %984 }
  0xd4   : > { %v3795_v36 = vpop.permute.xlu0 %982 }
  0xd5   : > { %1290 = vrot.lane.b32.xlu1 %v3272_v8, %s3129_s10 }
  0xd6   : > { %1218 = vrot.lane.b32.xlu0 %v3541_v25, %s3128_s7 }
  0xd7   : > { %v3801_v53 = vpop.permute.xlu1 %988 }
  0xd8   : > { %v3803_v34 = vpop.permute.xlu0 %986 }
  0xd9   : > { %1377 = vrot.lane.b32.xlu1 %v4884_v46, %s3130_s11 }
  0xda   : > { %1292 = vrot.lane.b32.xlu0 %v3263_v62, %s3129_s10 }
  0xdb   : > { %v3809_v54 = vpop.permute.xlu1 %992 }
  0xdc   : > { %v3811_v47 = vpop.permute.xlu0 %990 }
  0xdd   : > { %1446 = vrot.lane.b32.xlu1 %v3561_v11, %s3131_s12 }
  0xde   : > { %1379 = vrot.lane.b32.xlu0 %v4885_v2, %s3130_s11 }
  0xdf   : > { %v3817_v25 = vpop.permute.xlu1 %996 }
  0xe0   : > { %v3819_v0 = vpop.permute.xlu0 %994 }
  0xe1   : > { %1064 = vrot.lane.b32.xlu1 %v3272_v8, %s3126_s27 }
  0xe2   : > { %1448 = vrot.lane.b32.xlu0 %v3554_v45, %s3131_s12 }
  0xe3   : > { %v3825_v16 = vpop.permute.xlu1 %1000 }
  0xe4   : > { %v3827_v29 = vpop.permute.xlu0 %998 }
  0xe5   : > { %1151 = vrot.lane.b32.xlu1 %v4884_v46, %s3127_s30 }
  0xe6   : > { %1066 = vrot.lane.b32.xlu0 %v3263_v62, %s3126_s27 }
  0xe7   : > { %v3833_v37 = vpop.permute.xlu1 %1004 }
  0xe8   : > { %4886 = vst [vmem:[#allocation4_spill] sm:$0xff] %v3833_v37  ;;  %v3835_v43 = vpop.permute.xlu0 %1002 }
  0xe9   : > { %1220 = vrot.lane.b32.xlu1 %v3561_v11, %s3128_s7 }
  0xea   : > { %1153 = vrot.lane.b32.xlu0 %v4885_v2, %s3127_s30 }
  0xeb   : > { %v3841_v8 = vpop.permute.xlu1 %1008 }
  0xec   : > { %4887 = vst [vmem:[#allocation3_spill] sm:$0xff] %v3841_v8  ;;  %v3843_v18 = vpop.permute.xlu0 %1006  ;;  %v4893_v8 = vld [vmem:[#allocation5_spill] sm:$0xff] }
  0xed   : > { %4888 = vst [vmem:[#allocation36_spill] sm:$0xff] %v3843_v18  ;;  %1294 = vrot.lane.b32.xlu1 %v3301_v33, %s3129_s10 }
  0xee   : > { %1222 = vrot.lane.b32.xlu0 %v3554_v45, %s3128_s7 }
  0xef   : > { %v3849_v62 = vpop.permute.xlu1 %1012 }
  0xf0   : > { %4889 = vst [vmem:[#allocation37_spill] sm:$0xff] %v3849_v62  ;;  %v3851_v46 = vpop.permute.xlu0 %1010 }
  0xf1   : > { %4890 = vst [vmem:[#allocation38_spill] sm:$0xff] %v3851_v46  ;;  %1381 = vrot.lane.b32.xlu1 %v4891_v49, %s3130_s11 }
  0xf2   : > { %1296 = vrot.lane.b32.xlu0 %v3295_v31, %s3129_s10 }
  0xf3   : > { %v1049_v11 = vpop.permute.xlu1 %1048 }
  0xf4   : > { %v3857_v2 = vpop.permute.xlu0 %1014 }
  0xf5   : > { %4892 = vst [vmem:[#allocation6_spill] sm:$0xff] %v3857_v2  ;;  %1450 = vrot.lane.b32.xlu1 %v3574_v32, %s3131_s12 }
  0xf6   : > { %1383 = vrot.lane.b32.xlu0 %v4893_v8, %s3130_s11 }
  0xf7   : > { %v1136_v45 = vpop.permute.xlu1 %1135 }
  0xf8   : > { %v1051_v62 = vpop.permute.xlu0 %1050 }
  0xf9   : > { %1068 = vrot.lane.b32.xlu1 %v3301_v33, %s3126_s27 }
  0xfa   : > { %1452 = vrot.lane.b32.xlu0 %v3567_v35, %s3131_s12 }
  0xfb   : > { %v1205_v46 = vpop.permute.xlu1 %1204 }
  0xfc   : > { %v1138_v18 = vpop.permute.xlu0 %1137 }
  0xfd   : > { %1155 = vrot.lane.b32.xlu1 %v4891_v49, %s3127_s30  ;;  %v1630_v49 = vsel %vm1628_vm5, %v1565_v4, %v1049_v11 }
  0xfe   : > { %1070 = vrot.lane.b32.xlu0 %v3295_v31, %s3126_s27  ;;  %v1695_v37 = vsel %vm1693_vm6, %v1630_v49, %v1136_v45 }
  0xff   : > { %v1279_v2 = vpop.permute.xlu1 %1278  ;;  %v1760_v1 = vsel %vm1758_vm7, %v1695_v37, %v1205_v46 }
 0x100   : > { %v1207_v33 = vpop.permute.xlu0 %1206  ;;  %v1825_v42 = vsel %vm1823_vm8, %v1760_v1, %v1279_v2  ;;  %v4894_v2 = vld [vmem:[#allocation8_spill] sm:$0xff] }
 0x101   : > { %1224 = vrot.lane.b32.xlu1 %v3574_v32, %s3128_s7  ;;  %v3078_v32 = vld [vmem:[%s3171_s20 + $0x8] sm:$0xff]  }
 0x102   : > { %1157 = vrot.lane.b32.xlu0 %v4893_v8, %s3127_s30  ;;  %v1502_v4 = vsel %vm1498_vm3, %v3078_v32, %v3661_v39 }
 0x103   : > { %v1366_v31 = vpop.permute.xlu1 %1365  ;;  %v1567_v37 = vsel %vm1563_vm4, %v1502_v4, %v3779_v17 }
 0x104   : > { %v1281_v26 = vpop.permute.xlu0 %1280  ;;  %v1890_v63 = vsel %vm1888_vm9, %v1825_v42, %v1366_v31  ;;  %v1632_v11 = vsel %vm1628_vm5, %v1567_v37, %v1051_v62  ;;  %v4895_v42 = vld [vmem:[#allocation7_spill] sm:$0xff] }
 0x105   : > { %1298 = vrot.lane.b32.xlu1 %v3333_v3, %s3129_s10  ;;  %v1697_v39 = vsel %vm1693_vm6, %v1632_v11, %v1138_v18 }
 0x106   : > { %1226 = vrot.lane.b32.xlu0 %v3567_v35, %s3128_s7  ;;  %v1762_v49 = vsel %vm1758_vm7, %v1697_v39, %v1207_v33 }
 0x107   : > { %v1435_v8 = vpop.permute.xlu1 %1434  ;;  %v1827_v17 = vsel %vm1823_vm8, %v1762_v49, %v1281_v26 }
 0x108   : > { %v1955_v46 = vsel %vm1953_vm10, %v1890_v63, %v1435_v8  ;;  %v1368_v45 = vpop.permute.xlu0 %1367  ;;  %v3079_v63 = vld [vmem:[%s3171_s20 + $0x14] sm:$0xff]  }
 0x109   : > { %1385 = vrot.lane.b32.xlu1 %v4894_v2, %s3130_s11  ;;  %2925 = vmatprep.mubr.msk.bf16.mxu0 %vm2061_vm11, %v1955_v46  ;;  %v1892_v31 = vsel %vm1888_vm9, %v1827_v17, %v1368_v45  ;;  %v1504_v8 = vsel %vm1498_vm3, %v3079_v63, %v3651_v24 }
 0x10a   : > { %1300 = vrot.lane.b32.xlu0 %v3307_v38, %s3129_s10 }
 0x10b   : > { %v1053_v35 = vpop.permute.xlu1 %1052 }
 0x10c   : > { %v1437_v62 = vpop.permute.xlu0 %1436 }
 0x10d   : > { %1454 = vrot.lane.b32.xlu1 %v3587_v52, %s3131_s12  ;;  %v1957_v1 = vsel %vm1953_vm10, %v1892_v31, %v1437_v62 }
 0x10e   : > { %1387 = vrot.lane.b32.xlu0 %v4895_v42, %s3130_s11  ;;  %2926 = vmatmul.mubr.msk.bf16.vlgmr.msra.gmra.mxu0 %vm2061_vm11, %v1957_v1  ;;  %v4896_v1 = vld [vmem:[#allocation10_spill] sm:$0xff] }
 0x10f   : > { %v1140_v18 = vpop.permute.xlu1 %1139 }
 0x110   : > { %v1055_v33 = vpop.permute.xlu0 %1054 }
 0x111   : > { %1072 = vrot.lane.b32.xlu1 %v3333_v3, %s3126_s27  ;;  %v1569_v3 = vsel %vm1563_vm4, %v1504_v8, %v3787_v14 }
 0x112   : > { %1456 = vrot.lane.b32.xlu0 %v3580_v21, %s3131_s12  ;;  %v1634_v46 = vsel %vm1628_vm5, %v1569_v3, %v1053_v35 }
 0x113   : > { %v1209_v26 = vpop.permute.xlu1 %1208 }
 0x114   : > { %v1142_v32 = vpop.permute.xlu0 %1141 }
 0x115   : > { %1159 = vrot.lane.b32.xlu1 %v4894_v2, %s3127_s30 }
 0x116   : > { %1074 = vrot.lane.b32.xlu0 %v3307_v38, %s3126_s27  ;;  %v1699_v38 = vsel %vm1693_vm6, %v1634_v46, %v1140_v18  ;;  %v3082_v46 = vld [vmem:[%s3171_s20 + $0x28] sm:$0xff]  }
 0x117   : > { %v1283_v4 = vpop.permute.xlu1 %1282  ;;  %v1764_v45 = vsel %vm1758_vm7, %v1699_v38, %v1209_v26 }
 0x118   : > { %v1211_v37 = vpop.permute.xlu0 %1210  ;;  %v1829_v24 = vsel %vm1823_vm8, %v1764_v45, %v1283_v4 }
 0x119   : > { %1228 = vrot.lane.b32.xlu1 %v3587_v52, %s3128_s7  ;;  %v3080_v52 = vld [vmem:[%s3171_s20 + $0x1c] sm:$0xff]  }
 0x11a   : > { %1161 = vrot.lane.b32.xlu0 %v4895_v42, %s3127_s30  ;;  %v1506_v14 = vsel %vm1498_vm3, %v3080_v52, %v3659_v7 }
 0x11b   : > { %v1370_v11 = vpop.permute.xlu1 %1369  ;;  %v1571_v35 = vsel %vm1563_vm4, %v1506_v14, %v3785_v41 }
 0x11c   : > { %v1285_v2 = vpop.permute.xlu0 %1284  ;;  %v1894_v39 = vsel %vm1888_vm9, %v1829_v24, %v1370_v11  ;;  %v1636_v31 = vsel %vm1628_vm5, %v1571_v35, %v1055_v33  ;;  %v1508_v11 = vsel %vm1498_vm3, %v3082_v46, %v3669_v51  ;;  %v3083_v51 = vld [vmem:[%s3171_s20 + $0x30] sm:$0xff]  }
 0x11d   : > { %1302 = vrot.lane.b32.xlu1 %v3349_v19, %s3129_s10  ;;  %v1701_v7 = vsel %vm1693_vm6, %v1636_v31, %v1142_v32  ;;  %v4897_v32 = vld [vmem:[#allocation9_spill] sm:$0xff]  ;;  %v1573_v38 = vsel %vm1563_vm4, %v1508_v11, %v3795_v36  ;;  %v1510_v36 = vsel %vm1498_vm3, %v3083_v51, %v3667_v28 }
 0x11e   : > { %1230 = vrot.lane.b32.xlu0 %v3580_v21, %s3128_s7  ;;  %v1766_v42 = vsel %vm1758_vm7, %v1701_v7, %v1211_v37  ;;  %v3965_v37 = vld [vmem:[%s3171_s20 + $0xa8] sm:$0xff]   ;;  %v1575_v35 = vsel %vm1563_vm4, %v1510_v36, %v3793_v57 }
 0x11f   : > { %v1439_v49 = vpop.permute.xlu1 %1438  ;;  %v1831_v41 = vsel %vm1823_vm8, %v1766_v42, %v1285_v2 }
 0x120   : > { %v1959_v17 = vsel %vm1953_vm10, %v1894_v39, %v1439_v49  ;;  %v1372_v62 = vpop.permute.xlu0 %1371 }
 0x121   : > { %1389 = vrot.lane.b32.xlu1 %v4896_v1, %s3130_s11  ;;  %2929 = vmatprep.mubr.msk.bf16.mxu0 %vm2061_vm11, %v1959_v17  ;;  %v1896_v18 = vsel %vm1888_vm9, %v1831_v41, %v1372_v62  ;;  %v4898_v62 = vld [vmem:[#allocation12_spill] sm:$0xff] }
 0x122   : > { %1304 = vrot.lane.b32.xlu0 %v3336_v10, %s3129_s10 }
 0x123   : > { %v1057_v21 = vpop.permute.xlu1 %1056 }
 0x124   : > { %v1441_v33 = vpop.permute.xlu0 %1440  ;;  %v1638_v45 = vsel %vm1628_vm5, %v1573_v38, %v1057_v21 }
 0x125   : > { %1458 = vrot.lane.b32.xlu1 %v3600_v12, %s3131_s12  ;;  %v1961_v26 = vsel %vm1953_vm10, %v1896_v18, %v1441_v33  ;;  %v4899_v18 = vld [vmem:[#allocation11_spill] sm:$0xff] }
 0x126   : > { %1391 = vrot.lane.b32.xlu0 %v4897_v32, %s3130_s11  ;;  %2930 = vmatmul.mubr.msk.bf16.gmra.mxu0 %vm2061_vm11, %v1961_v26 }
 0x127   : > { %v1144_v4 = vpop.permute.xlu1 %1143 }
 0x128   : > { %v1059_v10 = vpop.permute.xlu0 %1058  ;;  %v1703_v24 = vsel %vm1693_vm6, %v1638_v45, %v1144_v4 }
 0x129   : > { %1076 = vrot.lane.b32.xlu1 %v3349_v19, %s3126_s27  ;;  %v1640_v31 = vsel %vm1628_vm5, %v1575_v35, %v1059_v10  ;;  %v4900_v35 = vld [vmem:[#allocation14_spill] sm:$0xff] }
 0x12a   : > { %1460 = vrot.lane.b32.xlu0 %v3593_v61, %s3131_s12 }
 0x12b   : > { %v1213_v63 = vpop.permute.xlu1 %1212 }
 0x12c   : > { %v1146_v8 = vpop.permute.xlu0 %1145  ;;  %v1768_v52 = vsel %vm1758_vm7, %v1703_v24, %v1213_v63 }
 0x12d   : > { %1163 = vrot.lane.b32.xlu1 %v4896_v1, %s3127_s30  ;;  %v1705_v28 = vsel %vm1693_vm6, %v1640_v31, %v1146_v8  ;;  %v3086_v8 = vld [vmem:[%s3171_s20 + $0x3c] sm:$0xff]   ;;  %v4057_v31 = vld [vmem:[%s3171_s20 + $0xd0] sm:$0xff]  }
 0x12e   : > { %1078 = vrot.lane.b32.xlu0 %v3965_v37, %s3126_s27 }
 0x12f   : > { %v1287_v3 = vpop.permute.xlu1 %1286 }
 0x130   : > { %v1215_v19 = vpop.permute.xlu0 %1214 }
 0x131   : > { %1232 = vrot.lane.b32.xlu1 %v3600_v12, %s3128_s7  ;;  %v1833_v12 = vsel %vm1823_vm8, %v1768_v52, %v1287_v3  ;;  %v1770_v1 = vsel %vm1758_vm7, %v1705_v28, %v1215_v19  ;;  %v1512_v3 = vsel %vm1498_vm3, %v3086_v8, %v3677_v9  ;;  %v4036_v52 = vld [vmem:[%s3171_s20 + $0xc8] sm:$0xff]  }
 0x132   : > { %1165 = vrot.lane.b32.xlu0 %v4897_v32, %s3127_s30  ;;  %v4013_v32 = vld [vmem:[%s3171_s20 + $0xb4] sm:$0xff]   ;;  %v1577_v11 = vsel %vm1563_vm4, %v1512_v3, %v3803_v34  ;;  %v3088_v9 = vld [vmem:[%s3171_s20 + $0x44] sm:$0xff]  }
 0x133   : > { %v1374_v2 = vpop.permute.xlu1 %1373  ;;  %v1514_v34 = vsel %vm1498_vm3, %v3088_v9, %v3675_v5 }
 0x134   : > { %v1289_v14 = vpop.permute.xlu0 %1288  ;;  %v1898_v39 = vsel %vm1888_vm9, %v1833_v12, %v1374_v2  ;;  %v1579_v51 = vsel %vm1563_vm4, %v1514_v34, %v3801_v53 }
 0x135   : > { %1306 = vrot.lane.b32.xlu1 %v3365_v40, %s3129_s10  ;;  %v1835_v7 = vsel %vm1823_vm8, %v1770_v1, %v1289_v14 }
 0x136   : > { %1234 = vrot.lane.b32.xlu0 %v3593_v61, %s3128_s7  ;;  %v4000_v61 = vld [vmem:[%s3171_s20 + $0xbc] sm:$0xff]  }
 0x137   : > { %v1443_v49 = vpop.permute.xlu1 %1442 }
 0x138   : > { %v1963_v17 = vsel %vm1953_vm10, %v1898_v39, %v1443_v49  ;;  %v1376_v40 = vpop.permute.xlu0 %1375 }
 0x139   : > { %1393 = vrot.lane.b32.xlu1 %v4898_v62, %s3130_s11  ;;  %2933 = vmatprep.mubr.msk.bf16.mxu0 %vm2061_vm11, %v1963_v17  ;;  %v1900_v42 = vsel %vm1888_vm9, %v1835_v7, %v1376_v40  ;;  %v3090_v40 = vld [vmem:[%s3171_s20 + $0xd8] ss:$0 sps:$4 sm:$0x11]  }
 0x13a   : > { %1308 = vrot.lane.b32.xlu0 %v4000_v61, %s3129_s10  ;;  %v4901_v7 = vld [vmem:[#allocation13_spill] sm:$0xff] }
 0x13b   : > { %v1061_v57 = vpop.permute.xlu1 %1060 }
 0x13c   : > { %v1445_v21 = vpop.permute.xlu0 %1444  ;;  %v1642_v19 = vsel %vm1628_vm5, %v1577_v11, %v1061_v57 }
 0x13d   : > { %1462 = vrot.lane.b32.xlu1 %v3614_v50, %s3131_s12  ;;  %v1965_v41 = vsel %vm1953_vm10, %v1900_v42, %v1445_v21  ;;  %v4902_v21 = vrot.slane %v3389_v22, 1  ;;  %v3091_v22 = vld [vmem:[%s3171_s20 + $0x50] sm:$0xff]  }
 0x13e   : > { %1395 = vrot.lane.b32.xlu0 %v4899_v18, %s3130_s11  ;;  %2934 = vmatmul.mubr.msk.bf16.gmra.mxu0 %vm2061_vm11, %v1965_v41 }
 0x13f   : > { %v1148_v33 = vpop.permute.xlu1 %1147 }
 0x140   : > { %v1063_v26 = vpop.permute.xlu0 %1062  ;;  %v1707_v45 = vsel %vm1693_vm6, %v1642_v19, %v1148_v33 }
 0x141   : > { %1080 = vrot.lane.b32.xlu1 %v4013_v32, %s3126_s27  ;;  %v1644_v39 = vsel %vm1628_vm5, %v1579_v51, %v1063_v26 }
 0x142   : > { %1464 = vrot.lane.b32.xlu0 %v3609_v15, %s3131_s12 }
 0x143   : > { %v1217_v4 = vpop.permute.xlu1 %1216 }
 0x144   : > { %v1150_v10 = vpop.permute.xlu0 %1149  ;;  %v1772_v2 = vsel %vm1758_vm7, %v1707_v45, %v1217_v4  ;;  %v4100_v45 = vld [vmem:[%s3171_s20 + $0xe4] sm:$0xff]  }
 0x145   : > { %1167 = vrot.lane.b32.xlu1 %v4898_v62, %s3127_s30  ;;  %v1709_v5 = vsel %vm1693_vm6, %v1644_v39, %v1150_v10  ;;  %v947_v62 = vrot.slane %v3090_v40, 1  ;;  %v1516_v10 = vsel %vm1498_vm3, %v3091_v22, %v3685_v20  ;;  %v4093_v20 = vld [vmem:[%s3171_s20 + $0xdc] sm:$0xff]   ;;  %v4903_v39 = vld [vmem:[#allocation16_spill] sm:$0xff] }
 0x146   : > { %1082 = vrot.lane.b32.xlu0 %v4000_v61, %s3126_s27  ;;  %v1581_v8 = vsel %vm1563_vm4, %v1516_v10, %v3811_v47  ;;  %v949_v47 = vrot.slane %v4093_v20, 1 }
 0x147   : > { %v1291_v63 = vpop.permute.xlu1 %1290  ;;  %v948_v41 = vsel %vm893_vm1, %v4902_v21, %v947_v62 }
 0x148   : > { %v1219_v46 = vpop.permute.xlu0 %1218 }
 0x149   : > { %1236 = vrot.lane.b32.xlu1 %v3614_v50, %s3128_s7  ;;  %v1837_v50 = vsel %vm1823_vm8, %v1772_v2, %v1291_v63  ;;  %v1774_v17 = vsel %vm1758_vm7, %v1709_v5, %v1219_v46  ;;  %v950_v2 = vrot.slane %v4100_v45, 1 }
 0x14a   : > { %1169 = vrot.lane.b32.xlu0 %v4899_v18, %s3127_s30 }
 0x14b   : > { %v1378_v38 = vpop.permute.xlu1 %1377 }
 0x14c   : > { %v1293_v24 = vpop.permute.xlu0 %1292  ;;  %v1902_v14 = vsel %vm1888_vm9, %v1837_v50, %v1378_v38 }
 0x14d   : > { %1310 = vrot.lane.b32.xlu1 %v4036_v52, %s3129_s10  ;;  %v1839_v53 = vsel %vm1823_vm8, %v1774_v17, %v1293_v24  ;;  %v3094_v24 = vld [vmem:[%s3171_s20 + $0x58] sm:$0xff]   ;;  %v3095_v17 = vld [vmem:[%s3171_s20 + $0xec] ss:$0 sps:$4 sm:$0x11]  }
 0x14e   : > { %1238 = vrot.lane.b32.xlu0 %v3609_v15, %s3128_s7  ;;  %v1518_v50 = vsel %vm1498_vm3, %v3094_v24, %v3683_v56  ;;  %v4163_v24 = vld [vmem:[%s3171_s20 + $0xf8] sm:$0xff]  }
 0x14f   : > { %v1447_v12 = vpop.permute.xlu1 %1446 }
 0x150   : > { %v1967_v36 = vsel %vm1953_vm10, %v1902_v14, %v1447_v12  ;;  %v1380_v49 = vpop.permute.xlu0 %1379  ;;  %v1583_v14 = vsel %vm1563_vm4, %v1518_v50, %v3809_v54  ;;  %v955_v50 = vrot.slane %v4163_v24, 1 }
 0x151   : > { %1397 = vrot.lane.b32.xlu1 %v4900_v35, %s3130_s11  ;;  %2937 = vmatprep.mubr.msk.bf16.mxu0 %vm2061_vm11, %v1967_v36  ;;  %v1904_v28 = vsel %vm1888_vm9, %v1839_v53, %v1380_v49  ;;  %v4117_v49 = vsel %vm893_vm1, %v949_v47, %v950_v2 }
 0x152   : > { %1312 = vrot.lane.b32.xlu0 %v4057_v31, %s3129_s10 }
 0x153   : > { %v1065_v15 = vpop.permute.xlu1 %1064 }
 0x154   : > { %v1449_v1 = vpop.permute.xlu0 %1448  ;;  %v1646_v3 = vsel %vm1628_vm5, %v1581_v8, %v1065_v15  ;;  %v952_v15 = vrot.slane %v3095_v17, 1 }
 0x155   : > { %1466 = vrot.lane.b32.xlu1 %v3628_v48, %s3131_s12  ;;  %v1969_v57 = vsel %vm1953_vm10, %v1904_v28, %v1449_v1  ;;  %v4904_v28 = vld [vmem:[#allocation15_spill] sm:$0xff] }
 0x156   : > { %1399 = vrot.lane.b32.xlu0 %v4901_v7, %s3130_s11  ;;  %2938 = vmatmul.mubr.msk.bf16.gmra.mxu0 %vm2061_vm11, %v1969_v57  ;;  %v953_v57 = vsel %vm893_vm1, %v950_v2, %v952_v15 }
 0x157   : > { %v1152_v42 = vpop.permute.xlu1 %1151 }
 0x158   : > { %v1067_v18 = vpop.permute.xlu0 %1066  ;;  %v1711_v11 = vsel %vm1693_vm6, %v1646_v3, %v1152_v42 }
 0x159   : > { %1084 = vrot.lane.b32.xlu1 %v4036_v52, %s3126_s27  ;;  %v1648_v51 = vsel %vm1628_vm5, %v1583_v14, %v1067_v18  ;;  %v4173_v14 = vld [vmem:[%s3171_s20 + $0xf0] sm:$0xff]  }
 0x15a   : > { %1468 = vrot.lane.b32.xlu0 %v948_v41, %s3131_s12 }
 0x15b   : > { %v1221_v33 = vpop.permute.xlu1 %1220 }
 0x15c   : > { %v1154_v26 = vpop.permute.xlu0 %1153  ;;  %v1776_v19 = vsel %vm1758_vm7, %v1711_v11, %v1221_v33  ;;  %v3096_v33 = vld [vmem:[%s3171_s20 + $0x64] sm:$0xff]  }
 0x15d   : > { %1171 = vrot.lane.b32.xlu1 %v4900_v35, %s3127_s30  ;;  %v1713_v56 = vsel %vm1693_vm6, %v1648_v51, %v1154_v26  ;;  %v1520_v26 = vsel %vm1498_vm3, %v3096_v33, %v3693_v30 }
 0x15e   : > { %1086 = vrot.lane.b32.xlu0 %v4057_v31, %s3126_s27 }
 0x15f   : > { %v1295_v4 = vpop.permute.xlu1 %1294 }
 0x160   : > { %v1223_v63 = vpop.permute.xlu0 %1222 }
 0x161   : > { %1240 = vrot.lane.b32.xlu1 %v3628_v48, %s3128_s7  ;;  %v1841_v48 = vsel %vm1823_vm8, %v1776_v19, %v1295_v4  ;;  %v1778_v35 = vsel %vm1758_vm7, %v1713_v56, %v1223_v63 }
 0x162   : > { %1173 = vrot.lane.b32.xlu0 %v4901_v7, %s3127_s30 }
 0x163   : > { %v1382_v46 = vpop.permute.xlu1 %1381 }
 0x164   : > { %v1297_v38 = vpop.permute.xlu0 %1296  ;;  %v1906_v9 = vsel %vm1888_vm9, %v1841_v48, %v1382_v46  ;;  %v3097_v46 = vld [vmem:[%s3171_s20 + $0x6c] sm:$0xff]  }
 0x165   : > { %1314 = vrot.lane.b32.xlu1 %v4093_v20, %s3129_s10  ;;  %v1843_v5 = vsel %vm1823_vm8, %v1778_v35, %v1297_v38 }
 0x166   : > { %1242 = vrot.lane.b32.xlu0 %v948_v41, %s3128_s7 }
 0x167   : > { %v1451_v34 = vpop.permute.xlu1 %1450 }
 0x168   : > { %v1971_v12 = vsel %vm1953_vm10, %v1906_v9, %v1451_v34  ;;  %v1384_v36 = vpop.permute.xlu0 %1383  ;;  %v3099_v9 = vld [vmem:[%s3171_s20 + $0x100] ss:$0 sps:$4 sm:$0x11]  }
 0x169   : > { %1401 = vrot.lane.b32.xlu1 %v4903_v39, %s3130_s11  ;;  %2941 = vmatprep.mubr.msk.bf16.mxu0 %vm2061_vm11, %v1971_v12  ;;  %v1908_v53 = vsel %vm1888_vm9, %v1843_v5, %v1384_v36  ;;  %v957_v34 = vrot.slane %v3099_v9, 1  ;;  %v954_v36 = vrot.slane %v4173_v14, 1 }
 0x16a   : > { %1316 = vrot.lane.b32.xlu0 %v4100_v45, %s3129_s10 }
 0x16b   : > { %v1069_v54 = vpop.permute.xlu1 %1068  ;;  %v4190_v17 = vsel %vm893_vm1, %v954_v36, %v955_v50 }
 0x16c   : > { %v1453_v40 = vpop.permute.xlu0 %1452 }
 0x16d   : > { %1470 = vrot.lane.b32.xlu1 %v4117_v49, %s3131_s12  ;;  %v1973_v62 = vsel %vm1953_vm10, %v1908_v53, %v1453_v40 }
 0x16e   : > { %1403 = vrot.lane.b32.xlu0 %v4904_v28, %s3130_s11  ;;  %2942 = vmatmul.mubr.msk.bf16.gmra.mxu0 %vm2061_vm11, %v1973_v62 }
 0x16f   : > { %v1156_v1 = vpop.permute.xlu1 %1155 }
 0x170   : > { %v1071_v7 = vpop.permute.xlu0 %1070 }
 0x171   : > { %1016 = vrot.lane.b32.xlu1 %v948_v41, %s3125_s22  ;;  %v1585_v41 = vsel %vm1563_vm4, %v1520_v26, %v3819_v0  ;;  %v1522_v0 = vsel %vm1498_vm3, %v3097_v46, %v3691_v6  ;;  %v3102_v26 = vld [vmem:[%s3171_s20 + $0x80] sm:$0xff]   ;;  %v4234_v46 = vld [vmem:[%s3171_s20 + $0x10c] sm:$0xff]  }
 0x172   : > { %1472 = vrot.lane.b32.xlu0 %v953_v57, %s3131_s12  ;;  %v1650_v22 = vsel %vm1628_vm5, %v1585_v41, %v1069_v54  ;;  %v1587_v38 = vsel %vm1563_vm4, %v1522_v0, %v3817_v25  ;;  %v4184_v54 = vsel %vm893_vm1, %v955_v50, %v957_v34 }
 0x173   : > { %v1225_v42 = vpop.permute.xlu1 %1224  ;;  %v1715_v63 = vsel %vm1693_vm6, %v1650_v22, %v1156_v1  ;;  %v1652_v47 = vsel %vm1628_vm5, %v1587_v38, %v1071_v7 }
 0x174   : > { %v1158_v21 = vpop.permute.xlu0 %1157  ;;  %v1780_v8 = vsel %vm1758_vm7, %v1715_v63, %v1225_v42 }
 0x175   : > { %1090 = vrot.lane.b32.xlu1 %v4100_v45, %s3126_s27  ;;  %v1717_v6 = vsel %vm1693_vm6, %v1652_v47, %v1158_v21 }
 0x176   : > { %1088 = vrot.lane.b32.xlu0 %v4093_v20, %s3126_s27 }
 0x177   : > { %v1299_v18 = vpop.permute.xlu1 %1298 }
 0x178   : > { %v1227_v4 = vpop.permute.xlu0 %1226  ;;  %v1845_v30 = vsel %vm1823_vm8, %v1780_v8, %v1299_v18 }
 0x179   : > { %1177 = vrot.lane.b32.xlu1 %v4904_v28, %s3127_s30  ;;  %v1782_v25 = vsel %vm1758_vm7, %v1717_v6, %v1227_v4  ;;  %v3101_v28 = vld [vmem:[%s3171_s20 + $0x78] sm:$0xff]  }
 0x17a   : > { %1175 = vrot.lane.b32.xlu0 %v4903_v39, %s3127_s30  ;;  %v1524_v1 = vsel %vm1498_vm3, %v3101_v28, %v3701_v59  ;;  %v4905_v28 = vld [vmem:[#allocation4_spill] sm:$0xff] }
 0x17b   : > { %v1386_v10 = vpop.permute.xlu1 %1385  ;;  %v1589_v42 = vsel %vm1563_vm4, %v1524_v1, %v3827_v29  ;;  %v1526_v29 = vsel %vm1498_vm3, %v3102_v26, %v3699_v27 }
 0x17c   : > { %v1301_v3 = vpop.permute.xlu0 %1300  ;;  %v1910_v11 = vsel %vm1888_vm9, %v1845_v30, %v1386_v10  ;;  %v1591_v22 = vsel %vm1563_vm4, %v1526_v29, %v3825_v16 }
 0x17d   : > { %1246 = vrot.lane.b32.xlu1 %v953_v57, %s3128_s7  ;;  %v1847_v51 = vsel %vm1823_vm8, %v1782_v25, %v1301_v3 }
 0x17e   : > { %1244 = vrot.lane.b32.xlu0 %v4117_v49, %s3128_s7 }
 0x17f   : > { %v1455_v19 = vpop.permute.xlu1 %1454 }
 0x180   : > { %v1975_v48 = vsel %vm1953_vm10, %v1910_v11, %v1455_v19  ;;  %v1388_v2 = vpop.permute.xlu0 %1387  ;;  %v960_v11 = vrot.slane %v4234_v46, 1  ;;  %v3104_v19 = vld [vmem:[%s3171_s20 + $0x114] ss:$0 sps:$4 sm:$0x11]  }
 0x181   : > { %1320 = vrot.lane.b32.xlu1 %v4163_v24, %s3129_s10  ;;  %2945 = vmatprep.mubr.msk.bf16.mxu0 %vm2061_vm11, %v1975_v48  ;;  %v1912_v39 = vsel %vm1888_vm9, %v1847_v51, %v1388_v2  ;;  %v962_v38 = vrot.slane %v3104_v19, 1  ;;  %v4242_v48 = vld [vmem:[%s3171_s20 + $0x104] sm:$0xff]   ;;  %v3106_v51 = vld [vmem:[%s3171_s20 + $0x8c] sm:$0xff]  }
 0x182   : > { %1318 = vrot.lane.b32.xlu0 %v4173_v14, %s3129_s10  ;;  %v959_v2 = vrot.slane %v4242_v48, 1  ;;  %v1528_v36 = vsel %vm1498_vm3, %v3106_v51, %v3709_v58 }
 0x183   : > { %v1073_v12 = vpop.permute.xlu1 %1072  ;;  %v4251_v50 = vsel %vm893_vm1, %v960_v11, %v962_v38 }
 0x184   : > { %v1457_v56 = vpop.permute.xlu0 %1456  ;;  %v1654_v21 = vsel %vm1628_vm5, %v1589_v42, %v1073_v12  ;;  %v4256_v34 = vsel %vm893_vm1, %v959_v2, %v960_v11  ;;  %v4908_v11 = vld [vmem:[#allocation22_spill] sm:$0xff] }
 0x185   : > { %1407 = vrot.lane.b32.xlu1 %v3448_v44, %s3130_s11  ;;  %v1977_v35 = vsel %vm1953_vm10, %v1912_v39, %v1457_v56  ;;  %v1593_v56 = vsel %vm1563_vm4, %v1528_v36, %v3835_v43 }
 0x186   : > { %1405 = vrot.lane.b32.xlu0 %v3454_v60, %s3130_s11  ;;  %2946 = vmatmul.mubr.msk.bf16.gmra.mxu0 %vm2061_vm11, %v1977_v35 }
 0x187   : > { %v1160_v5 = vpop.permute.xlu1 %1159 }
 0x188   : > { %v1075_v15 = vpop.permute.xlu0 %1074 }
 0x189   : > { %1476 = vrot.lane.b32.xlu1 %v4184_v54, %s3131_s12 }
 0x18a   : > { %1474 = vrot.lane.b32.xlu0 %v4190_v17, %s3131_s12 }
 0x18b   : > { %v1229_v53 = vpop.permute.xlu1 %1228 }
 0x18c   : > { %v1162_v40 = vpop.permute.xlu0 %1161 }
 0x18d   : > { %1020 = vrot.lane.b32.xlu1 %v953_v57, %s3125_s22 }
 0x18e   : > { %1018 = vrot.lane.b32.xlu0 %v4117_v49, %s3125_s22  ;;  %v1719_v49 = vsel %vm1693_vm6, %v1654_v21, %v1160_v5 }
 0x18f   : > { %v1303_v62 = vpop.permute.xlu1 %1302  ;;  %v1784_v18 = vsel %vm1758_vm7, %v1719_v49, %v1229_v53 }
 0x190   : > { %v1231_v7 = vpop.permute.xlu0 %1230  ;;  %v1849_v59 = vsel %vm1823_vm8, %v1784_v18, %v1303_v62 }
 0x191   : > { %1094 = vrot.lane.b32.xlu1 %v4163_v24, %s3126_s27 }
 0x192   : > { %1092 = vrot.lane.b32.xlu0 %v4173_v14, %s3126_s27 }
 0x193   : > { %v1390_v57 = vpop.permute.xlu1 %1389 }
 0x194   : > { %v1305_v33 = vpop.permute.xlu0 %1304  ;;  %v1914_v4 = vsel %vm1888_vm9, %v1849_v59, %v1390_v57 }
 0x195   : > { %1181 = vrot.lane.b32.xlu1 %v3448_v44, %s3127_s30  ;;  %v1656_v44 = vsel %vm1628_vm5, %v1591_v22, %v1075_v15 }
 0x196   : > { %1179 = vrot.lane.b32.xlu0 %v3454_v60, %s3127_s30  ;;  %v1721_v27 = vsel %vm1693_vm6, %v1656_v44, %v1162_v40 }
 0x197   : > { %v1459_v41 = vpop.permute.xlu1 %1458  ;;  %v1786_v60 = vsel %vm1758_vm7, %v1721_v27, %v1231_v7 }
 0x198   : > { %v1979_v10 = vsel %vm1953_vm10, %v1914_v4, %v1459_v41  ;;  %v1392_v63 = vpop.permute.xlu0 %1391  ;;  %v1851_v8 = vsel %vm1823_vm8, %v1786_v60, %v1305_v33  ;;  %v3109_v41 = vld [vmem:[%s3171_s20 + $0x128] ss:$0 sps:$4 sm:$0x11]   ;;  %v4906_v60 = vld [vmem:[#allocation17_spill] sm:$0xff] }
 0x199   : > { %1250 = vrot.lane.b32.xlu1 %v4184_v54, %s3128_s7  ;;  %2949 = vmatprep.mubr.msk.bf16.mxu0 %vm2061_vm11, %v1979_v10  ;;  %v1916_v3 = vsel %vm1888_vm9, %v1851_v8, %v1392_v63  ;;  %v967_v22 = vrot.slane %v3109_v41, 1  ;;  %v4310_v10 = vld [vmem:[%s3171_s20 + $0x118] sm:$0xff]   ;;  %v4907_v8 = vld [vmem:[#allocation18_spill] sm:$0xff] }
 0x19a   : > { %1248 = vrot.lane.b32.xlu0 %v4190_v17, %s3128_s7  ;;  %v964_v63 = vrot.slane %v4310_v10, 1 }
 0x19b   : > { %v1077_v16 = vpop.permute.xlu1 %1076 }
 0x19c   : > { %v1461_v30 = vpop.permute.xlu0 %1460  ;;  %v1658_v35 = vsel %vm1628_vm5, %v1593_v56, %v1077_v16 }
 0x19d   : > { %1324 = vrot.lane.b32.xlu1 %v4234_v46, %s3129_s10  ;;  %v1981_v0 = vsel %vm1953_vm10, %v1916_v3, %v1461_v30 }
 0x19e   : > { %1322 = vrot.lane.b32.xlu0 %v4242_v48, %s3129_s10  ;;  %2950 = vmatmul.mubr.msk.bf16.gmra.mxu0 %vm2061_vm11, %v1981_v0  ;;  %v3111_v0 = vld [vmem:[%s3171_s20 + $0xa0] sm:$0xff]  }
 0x19f   : > { %v1164_v47 = vpop.permute.xlu1 %1163  ;;  %v1532_v19 = vsel %vm1498_vm3, %v3111_v0, %v4908_v11 }
 0x1a0   : > { %v1079_v6 = vpop.permute.xlu0 %1078  ;;  %v1723_v15 = vsel %vm1693_vm6, %v1658_v35, %v1164_v47  ;;  %v4909_v47 = vld [vmem:[#allocation36_spill] sm:$0xff] }
 0x1a1   : > { %1411 = vrot.lane.b32.xlu1 %v3460_v55, %s3130_s11  ;;  %v1597_v2 = vsel %vm1563_vm4, %v1532_v19, %v4909_v47 }
 0x1a2   : > { %1409 = vrot.lane.b32.xlu0 %v3467_v13, %s3130_s11 }
 0x1a3   : > { %v1233_v9 = vpop.permute.xlu1 %1232 }
 0x1a4   : > { %v1166_v25 = vpop.permute.xlu0 %1165  ;;  %v1788_v53 = vsel %vm1758_vm7, %v1723_v15, %v1233_v9  ;;  %v4911_v15 = vld [vmem:[#allocation3_spill] sm:$0xff] }
 0x1a5   : > { %1480 = vrot.lane.b32.xlu1 %v4251_v50, %s3131_s12 }
 0x1a6   : > { %1478 = vrot.lane.b32.xlu0 %v4256_v34, %s3131_s12 }
 0x1a7   : > { %v1307_v12 = vpop.permute.xlu1 %1306 }
 0x1a8   : > { %v1235_v39 = vpop.permute.xlu0 %1234  ;;  %v1853_v58 = vsel %vm1823_vm8, %v1788_v53, %v1307_v12 }
 0x1a9   : > { %1024 = vrot.lane.b32.xlu1 %v4184_v54, %s3125_s22  ;;  %v3107_v54 = vld [vmem:[%s3171_s20 + $0x94] sm:$0xff]  }
 0x1aa   : > { %1022 = vrot.lane.b32.xlu0 %v4190_v17, %s3125_s22  ;;  %v1530_v43 = vsel %vm1498_vm3, %v3107_v54, %v3707_v23 }
 0x1ab   : > { %v1394_v5 = vpop.permute.xlu1 %1393  ;;  %v1595_v1 = vsel %vm1563_vm4, %v1530_v43, %v4905_v28  ;;  %v4365_v28 = vld [vmem:[%s4806_s2] ss:$0 sm:$0xff] }
 0x1ac   : > { %v1309_v40 = vpop.permute.xlu0 %1308  ;;  %v1918_v62 = vsel %vm1888_vm9, %v1853_v58, %v1394_v5  ;;  %v1660_v42 = vsel %vm1628_vm5, %v1595_v1, %v1079_v6 }
 0x1ad   : > { %1098 = vrot.lane.b32.xlu1 %v4234_v46, %s3126_s27  ;;  %v1725_v23 = vsel %vm1693_vm6, %v1660_v42, %v1166_v25 }
 0x1ae   : > { %1096 = vrot.lane.b32.xlu0 %v4242_v48, %s3126_s27  ;;  %v1790_v57 = vsel %vm1758_vm7, %v1725_v23, %v1235_v39  ;;  %v4910_v39 = vld [vmem:[#allocation21_spill] sm:$0xff] }
 0x1af   : > { %v1463_v17 = vpop.permute.xlu1 %1462  ;;  %v1855_v18 = vsel %vm1823_vm8, %v1790_v57, %v1309_v40  ;;  %v1534_v56 = vsel %vm1498_vm3, %v3965_v37, %v4910_v39 }
 0x1b0   : > { %v1983_v7 = vsel %vm1953_vm10, %v1918_v62, %v1463_v17  ;;  %v1396_v21 = vpop.permute.xlu0 %1395  ;;  %v1599_v53 = vsel %vm1563_vm4, %v1534_v56, %v4911_v15 }
 0x1b1   : > { %1185 = vrot.lane.b32.xlu1 %v3460_v55, %s3127_s30  ;;  %2953 = vmatprep.mubr.msk.bf16.mxu0 %vm2061_vm11, %v1983_v7  ;;  %v1920_v33 = vsel %vm1888_vm9, %v1855_v18, %v1396_v21 }
 0x1b2   : > { %1183 = vrot.lane.b32.xlu0 %v3467_v13, %s3127_s30  ;;  %v4303_v13 = vld [vmem:[%s3171_s20 + $0x120] sm:$0xff]  }
 0x1b3   : > { %v1081_v49 = vpop.permute.xlu1 %1080  ;;  %v965_v4 = vrot.slane %v4303_v13, 1 }
 0x1b4   : > { %v1465_v59 = vpop.permute.xlu0 %1464  ;;  %v1662_v6 = vsel %vm1628_vm5, %v1597_v2, %v1081_v49 }
 0x1b5   : > { %1254 = vrot.lane.b32.xlu1 %v4251_v50, %s3128_s7  ;;  %v1985_v55 = vsel %vm1953_vm10, %v1920_v33, %v1465_v59  ;;  %v4318_v16 = vsel %vm893_vm1, %v965_v4, %v967_v22  ;;  %v4323_v30 = vsel %vm893_vm1, %v964_v63, %v965_v4  ;;  %v3113_v22 = vld [vmem:[%s3171_s20 + $0x13c] ss:$0 sps:$4 sm:$0x11]   ;;  %v4395_v63 = vld [vmem:[%s3171_s20 + $0x12c] sm:$0xff]  }
 0x1b6   : > { %1252 = vrot.lane.b32.xlu0 %v4256_v34, %s3128_s7  ;;  %2954 = vmatmul.mubr.msk.bf16.gmra.mxu0 %vm2061_vm11, %v1985_v55 }
 0x1b7   : > { %v1168_v26 = vpop.permute.xlu1 %1167 }
 0x1b8   : > { %v1083_v29 = vpop.permute.xlu0 %1082  ;;  %v1727_v25 = vsel %vm1693_vm6, %v1662_v6, %v1168_v26  ;;  %v4914_v6 = vld [vmem:[#allocation19_spill] sm:$0xff] }
 0x1b9   : > { %1328 = vrot.lane.b32.xlu1 %v4303_v13, %s3129_s10 }
 0x1ba   : > { %1326 = vrot.lane.b32.xlu0 %v4310_v10, %s3129_s10 }
 0x1bb   : > { %v1237_v44 = vpop.permute.xlu1 %1236 }
 0x1bc   : > { %v1170_v27 = vpop.permute.xlu0 %1169  ;;  %v1792_v12 = vsel %vm1758_vm7, %v1727_v25, %v1237_v44  ;;  %v972_v44 = vrot.slane %v3113_v22, 1 }
 0x1bd   : > { %1415 = vrot.lane.b32.xlu1 %v4906_v60, %s3130_s11 }
 0x1be   : > { %1413 = vrot.lane.b32.xlu0 %v4907_v8, %s3130_s11 }
 0x1bf   : > { %v1311_v3 = vpop.permute.xlu1 %1310 }
 0x1c0   : > { %v1239_v38 = vpop.permute.xlu0 %1238  ;;  %v1857_v36 = vsel %vm1823_vm8, %v1792_v12, %v1311_v3 }
 0x1c1   : > { %1484 = vrot.lane.b32.xlu1 %v4318_v16, %s3131_s12 }
 0x1c2   : > { %1482 = vrot.lane.b32.xlu0 %v4323_v30, %s3131_s12 }
 0x1c3   : > { %v1398_v9 = vpop.permute.xlu1 %1397 }
 0x1c4   : > { %v1313_v51 = vpop.permute.xlu0 %1312  ;;  %v1922_v35 = vsel %vm1888_vm9, %v1857_v36, %v1398_v9 }
 0x1c5   : > { %1028 = vrot.lane.b32.xlu1 %v4251_v50, %s3125_s22  ;;  %v1664_v50 = vsel %vm1628_vm5, %v1599_v53, %v1083_v29  ;;  %v4386_v29 = vld [vmem:[%s3171_s20 + $0x134] sm:$0xff]  }
 0x1c6   : > { %1026 = vrot.lane.b32.xlu0 %v4256_v34, %s3125_s22  ;;  %v1729_v37 = vsel %vm1693_vm6, %v1664_v50, %v1170_v27  ;;  %v970_v41 = vrot.slane %v4386_v29, 1 }
 0x1c7   : > { %v1467_v5 = vpop.permute.xlu1 %1466  ;;  %v1794_v54 = vsel %vm1758_vm7, %v1729_v37, %v1239_v38  ;;  %v4913_v38 = vld [vmem:[#allocation38_spill] sm:$0xff] }
 0x1c8   : > { %v1987_v40 = vsel %vm1953_vm10, %v1922_v35, %v1467_v5  ;;  %v1400_v58 = vpop.permute.xlu0 %1399  ;;  %v1859_v43 = vsel %vm1823_vm8, %v1794_v54, %v1313_v51  ;;  %v4409_v51 = vsel %vm893_vm1, %v970_v41, %v972_v44  ;;  %v4916_v54 = vld [vmem:[#allocation23_spill] sm:$0xff] }
 0x1c9   : > { %1102 = vrot.lane.b32.xlu1 %v4303_v13, %s3126_s27  ;;  %2957 = vmatprep.mubr.msk.bf16.mxu1 %vm2061_vm11, %v1987_v40  ;;  %v1924_v62 = vsel %vm1888_vm9, %v1859_v43, %v1400_v58 }
 0x1ca   : > { %1100 = vrot.lane.b32.xlu0 %v4310_v10, %s3126_s27 }
 0x1cb   : > { %v1085_v34 = vpop.permute.xlu1 %1084 }
 0x1cc   : > { %v1469_v17 = vpop.permute.xlu0 %1468 }
 0x1cd   : > { %1189 = vrot.lane.b32.xlu1 %v4906_v60, %s3127_s30  ;;  %v1989_v1 = vsel %vm1953_vm10, %v1924_v62, %v1469_v17  ;;  %v969_v60 = vrot.slane %v4395_v63, 1  ;;  %v4917_v17 = vld [vmem:[#allocation37_spill] sm:$0xff] }
 0x1ce   : > { %v2927_v7 = vpop.f32.mrf.mxu0  ;;  %1187 = vrot.lane.b32.xlu0 %v4907_v8, %s3127_s30  ;;  %2958 = vmatmul.mubr.msk.bf16.vlgmr.msra.gmra.mxu1 %vm2061_vm11, %v1989_v1  ;;  %v4912_v8 = vld [vmem:[#allocation24_spill] sm:$0xff] }
 0x1cf   : > { %v1172_v42 = vpop.permute.xlu1 %1171  ;;  %v2173_v21 = vadd.f32 %v2927_v7, %v4365_v28  ;;  %v1536_v3 = vsel %vm1498_vm3, %v4013_v32, %v4912_v8  ;;  %v4915_v32 = vld [vmem:[#allocation20_spill] sm:$0xff]  ;;  %v4415_v56 = vsel %vm893_vm1, %v969_v60, %v970_v41 }
 0x1d0   : > { %v2164_v23 = vpop.f32.mrf.mxu0  ;;  %v1087_v57 = vpop.permute.xlu0 %1086  ;;  %v1601_v47 = vsel %vm1563_vm4, %v1536_v3, %v4913_v38 }
 0x1d1   : > { %1258 = vrot.lane.b32.xlu1 %v4318_v16, %s3128_s7  ;;  %2421 = vst [vmem:[%s4371_s21 + $0x10] sm:$0xff] %v2173_v21  ;;  %v2165_v49 = vadd.f32 %v4365_v28, %v2164_v23  ;;  %v2554_v9 = vmul.f32 %v2173_v21, %v2173_v21  ;;  %v1666_v36 = vsel %vm1628_vm5, %v1601_v47, %v1085_v34 }
 0x1d2   : > { %v2928_v18 = vpop.f32.mrf.mxu0  ;;  %1256 = vrot.lane.b32.xlu0 %v4323_v30, %s3128_s7  ;;  %v1731_v35 = vsel %vm1693_vm6, %v1666_v36, %v1172_v42  ;;  %v1538_v34 = vsel %vm1498_vm3, %v4000_v61, %v4916_v54  ;;  %v4436_v61 = vld [vmem:[%s3171_s20 + $0x148] sm:$0xff]  }
 0x1d3   : > { %v1241_v33 = vpop.permute.xlu1 %1240  ;;  %2419 = vst [vmem:[%s4371_s21] sm:$0xff] %v2165_v49  ;;  %v2176_v59 = vadd.f32 %v2928_v18, %v4365_v28  ;;  %v2552_v0 = vmul.f32 %v2165_v49, %v2165_v49  ;;  %v1603_v1 = vsel %vm1563_vm4, %v1538_v34, %v4917_v17  ;;  %v1127_v3 = vshrl.u32 %v4436_v61, 16 }
 0x1d4   : > { %v2167_v55 = vpop.f32.mrf.mxu0  ;;  %v1174_v26 = vpop.permute.xlu0 %1173  ;;  %v1796_v40 = vsel %vm1758_vm7, %v1731_v35, %v1241_v33  ;;  %v1668_v42 = vsel %vm1628_vm5, %v1603_v1, %v1087_v57  ;;  %v4445_v33 = vld [vmem:[%s3171_s20 + $0x140] sm:$0xff]  }
 0x1d5   : > { %1332 = vrot.lane.b32.xlu1 %v4386_v29, %s3129_s10  ;;  %2422 = vst [vmem:[%s4371_s21 + $0x18] sm:$0xff] %v2176_v59  ;;  %v2168_v4 = vadd.f32 %v4365_v28, %v2167_v55  ;;  %v2555_v5 = vmul.f32 %v2176_v59, %v2176_v59  ;;  %v1733_v23 = vsel %vm1693_vm6, %v1668_v42, %v1174_v26  ;;  %v3073_v55 = vld [vmem:[%s3171_s20 + $0x150] ss:$0 sps:$4 sm:$0x11]   ;;  %v1123_v26 = vshll.u32 %v4436_v61, 16 }
 0x1d6   : > { %1330 = vrot.lane.b32.xlu0 %v4395_v63, %s3129_s10  ;;  %v1118_v22 = vshll.u32 %v4445_v33, 16  ;;  %v1116_v47 = vshrl.u32 %v4445_v33, 16  ;;  %v1202_v17 = vrot.slane %v3073_v55, 1 }
 0x1d7   : > { %v1315_v27 = vpop.permute.xlu1 %1314  ;;  %2420 = vst [vmem:[%s4371_s21 + $0x8] sm:$0xff] %v2168_v4  ;;  %v2483_v11 = vadd.f32 %v2168_v4, %v2165_v49  ;;  %v2553_v19 = vmul.f32 %v2168_v4, %v2168_v4  ;;  %v1125_v8 = vrot.slane %v1123_v26, 1 }
 0x1d8   : > { %v1243_v2 = vpop.permute.xlu0 %1242  ;;  %v1861_v58 = vsel %vm1823_vm8, %v1796_v40, %v1315_v27 }
 0x1d9   : > { %1419 = vrot.lane.b32.xlu1 %v4914_v6, %s3130_s11  ;;  %v2484_v25 = vadd.f32 %v2483_v11, %v2173_v21  ;;  %v2616_v12 = vadd.f32 %v2553_v19, %v2552_v0  ;;  %v1798_v49 = vsel %vm1758_vm7, %v1733_v23, %v1243_v2  ;;  %v1131_v0 = vshll.u32 %v3073_v55, 16 }
 0x1da   : > { %1417 = vrot.lane.b32.xlu0 %v4915_v32, %s3130_s11  ;;  %v1120_v2 = vrot.slane %v1118_v22, 1  ;;  %v1199_v23 = vrot.slane %v4445_v33, 1 }
 0x1db   : > { %v1402_v39 = vpop.permute.xlu1 %1401  ;;  %v2617_v15 = vadd.f32 %v2616_v12, %v2554_v9  ;;  %v2485_v53 = vadd.f32 %v2484_v25, %v2176_v59  ;;  %v1133_v35 = vrot.slane %v1131_v0, 1 }
 0x1dc   : > { %v1317_v50 = vpop.permute.xlu0 %1316  ;;  %v1926_v43 = vsel %vm1888_vm9, %v1861_v58, %v1402_v39  ;;  %v1129_v39 = vor.u32 %v1127_v3, %v1125_v8  ;;  %v1121_v40 = vor.u32 %v1120_v2, %v1116_v47 }
 0x1dd   : > { %1488 = vrot.lane.b32.xlu1 %v4409_v51, %s3131_s12  ;;  %v2618_v37 = vadd.f32 %v2617_v15, %v2555_v5  ;;  %v1863_v57 = vsel %vm1823_vm8, %v1798_v49, %v1317_v50 }
 0x1de   : > { %1486 = vrot.lane.b32.xlu0 %v4415_v56, %s3131_s12  ;;  %v4479_v54 = vsel %vm508_vm0, %v1129_v39, %v1133_v35 }
 0x1df   : > { %v1471_v62 = vpop.permute.xlu1 %1470 }
 0x1e0   : > { %v1991_v7 = vsel %vm1953_vm10, %v1926_v43, %v1471_v62  ;;  %v1404_v21 = vpop.permute.xlu0 %1403 }
 0x1e1   : > { %1032 = vrot.lane.b32.xlu1 %v4318_v16, %s3125_s22  ;;  %2961 = vmatprep.mubr.msk.bf16.mxu1 %vm2061_vm11, %v1991_v7  ;;  %v1928_v59 = vsel %vm1888_vm9, %v1863_v57, %v1404_v21  ;;  %v4485_v7 = vsel %vm508_vm0, %v1121_v40, %v1125_v8 }
 0x1e2   : > { %1030 = vrot.lane.b32.xlu0 %v4323_v30, %s3125_s22 }
 0x1e3   : > { %v4442_v18 = vpop.permute.xlu1 %1016 }
 0x1e4   : > { %v1473_v16 = vpop.permute.xlu0 %1472 }
 0x1e5   : > { %1106 = vrot.lane.b32.xlu1 %v4386_v29, %s3126_s27  ;;  %v1993_v4 = vsel %vm1953_vm10, %v1928_v59, %v1473_v16  ;;  %v4918_v59 = vld [vmem:[#allocation25_spill] sm:$0xff] }
 0x1e6   : > { %v2931_v41 = vpop.f32.mrf.mxu0  ;;  %1104 = vrot.lane.b32.xlu0 %v4395_v63, %s3126_s27  ;;  %2962 = vmatmul.mubr.msk.bf16.gmra.mxu1 %vm2061_vm11, %v1993_v4  ;;  %v1542_v16 = vsel %vm1498_vm3, %v4057_v31, %v4918_v59  ;;  %v4919_v4 = vld [vmem:[#allocation26_spill] sm:$0xff] }
 0x1e7   : > { %v1091_v30 = vpop.permute.xlu1 %1090  ;;  %v2189_v44 = vadd.f32 %v2931_v41, %v4365_v28  ;;  %v1540_v41 = vsel %vm1498_vm3, %v4036_v52, %v4919_v4  ;;  %v1607_v22 = vsel %vm1563_vm4, %v1542_v16, %v4442_v18 }
 0x1e8   : > { %v2180_v27 = vpop.f32.mrf.mxu0  ;;  %v1089_v60 = vpop.permute.xlu0 %1088  ;;  %v1672_v31 = vsel %vm1628_vm5, %v1607_v22, %v1091_v30 }
 0x1e9   : > { %1193 = vrot.lane.b32.xlu1 %v4914_v6, %s3127_s30  ;;  %2425 = vst [vmem:[%s4371_s21 + $0x30] sm:$0xff] %v2189_v44  ;;  %v2181_v11 = vadd.f32 %v4365_v28, %v2180_v27  ;;  %v2558_v34 = vmul.f32 %v2189_v44, %v2189_v44  ;;  %v4920_v27 = vld [vmem:[#allocation6_spill] sm:$0xff] }
 0x1ea   : > { %v2932_v19 = vpop.f32.mrf.mxu0  ;;  %1191 = vrot.lane.b32.xlu0 %v4915_v32, %s3127_s30  ;;  %v1605_v8 = vsel %vm1563_vm4, %v1540_v41, %v4920_v27 }
 0x1eb   : > { %v1178_v38 = vpop.permute.xlu1 %1177  ;;  %2423 = vst [vmem:[%s4371_s21 + $0x20] sm:$0xff] %v2181_v11  ;;  %v2486_v9 = vadd.f32 %v2485_v53, %v2181_v11  ;;  %v2556_v6 = vmul.f32 %v2181_v11, %v2181_v11  ;;  %v2192_v25 = vadd.f32 %v2932_v19, %v4365_v28  ;;  %v1670_v0 = vsel %vm1628_vm5, %v1605_v8, %v1089_v60 }
 0x1ec   : > { %v2183_v12 = vpop.f32.mrf.mxu0  ;;  %v1176_v36 = vpop.permute.xlu0 %1175  ;;  %v1737_v52 = vsel %vm1693_vm6, %v1672_v31, %v1178_v38 }
 0x1ed   : > { %1262 = vrot.lane.b32.xlu1 %v4409_v51, %s3128_s7  ;;  %v2619_v5 = vadd.f32 %v2618_v37, %v2556_v6  ;;  %2426 = vst [vmem:[%s4371_s21 + $0x38] sm:$0xff] %v2192_v25  ;;  %v2184_v32 = vadd.f32 %v4365_v28, %v2183_v12  ;;  %v1200_v37 = vrot.slane %v4436_v61, 1  ;;  %v2559_v42 = vmul.f32 %v2192_v25, %v2192_v25  ;;  %v4526_v12 = vld [vmem:[%s3171_s20 + $0x15c] sm:$0xff]  }
 0x1ee   : > { %1260 = vrot.lane.b32.xlu0 %v4415_v56, %s3128_s7  ;;  %v1735_v18 = vsel %vm1693_vm6, %v1670_v0, %v1176_v36  ;;  %v1353_v40 = vshll.u32 %v4526_v12, 16 }
 0x1ef   : > { %v1247_v15 = vpop.permute.xlu1 %1246  ;;  %2424 = vst [vmem:[%s4371_s21 + $0x28] sm:$0xff] %v2184_v32  ;;  %v2487_v53 = vadd.f32 %v2486_v9, %v2184_v32  ;;  %v2557_v50 = vmul.f32 %v2184_v32, %v2184_v32  ;;  %v4494_v55 = vsel %vm893_vm1, %v1200_v37, %v1202_v17  ;;  %v4507_v3 = vsel %vm893_vm1, %v1199_v23, %v1200_v37  ;;  %v4537_v32 = vld [vmem:[%s3171_s20 + $0x154] sm:$0xff]  }
 0x1f0   : > { %v1245_v58 = vpop.permute.xlu0 %1244  ;;  %v1802_v19 = vsel %vm1758_vm7, %v1737_v52, %v1247_v15  ;;  %v1346_v16 = vshrl.u32 %v4537_v32, 16 }
 0x1f1   : > { %1336 = vrot.lane.b32.xlu1 %v4436_v61, %s3129_s10  ;;  %v2488_v43 = vadd.f32 %v2487_v53, %v2189_v44  ;;  %v2620_v62 = vadd.f32 %v2619_v5, %v2557_v50  ;;  %v1800_v47 = vsel %vm1758_vm7, %v1735_v18, %v1245_v58  ;;  %v3076_v53 = vld [vmem:[%s3171_s20 + $0x164] ss:$0 sps:$4 sm:$0x11]  }
 0x1f2   : > { %1334 = vrot.lane.b32.xlu0 %v4445_v33, %s3129_s10  ;;  %v1361_v23 = vshll.u32 %v3076_v53, 16 }
 0x1f3   : > { %v1321_v1 = vpop.permute.xlu1 %1320  ;;  %v2621_v21 = vadd.f32 %v2620_v62, %v2558_v34  ;;  %v2489_v49 = vadd.f32 %v2488_v43, %v2192_v25 }
 0x1f4   : > { %v1319_v57 = vpop.permute.xlu0 %1318  ;;  %v1867_v30 = vsel %vm1823_vm8, %v1802_v19, %v1321_v1  ;;  %v1355_v1 = vrot.slane %v1353_v40, 1  ;;  %v1363_v27 = vrot.slane %v1361_v23, 1  ;;  %v1432_v19 = vrot.slane %v3076_v53, 1 }
 0x1f5   : > { %1423 = vrot.lane.b32.xlu1 %v4479_v54, %s3130_s11  ;;  %v2622_v26 = vadd.f32 %v2621_v21, %v2559_v42  ;;  %v1865_v2 = vsel %vm1823_vm8, %v1800_v47, %v1319_v57  ;;  %v1357_v42 = vshrl.u32 %v4526_v12, 16 }
 0x1f6   : > { %1421 = vrot.lane.b32.xlu0 %v4485_v7, %s3130_s11 }
 0x1f7   : > { %v1408_v44 = vpop.permute.xlu1 %1407 }
 0x1f8   : > { %v1406_v11 = vpop.permute.xlu0 %1405  ;;  %v1932_v38 = vsel %vm1888_vm9, %v1867_v30, %v1408_v44 }
 0x1f9   : > { %1492 = vrot.lane.b32.xlu1 %v4494_v55, %s3131_s12  ;;  %v1930_v9 = vsel %vm1888_vm9, %v1865_v2, %v1406_v11 }
 0x1fa   : > { %1490 = vrot.lane.b32.xlu0 %v4507_v3, %s3131_s12 }
 0x1fb   : > { %v1477_v60 = vpop.permute.xlu1 %1476 }
 0x1fc   : > { %v1997_v6 = vsel %vm1953_vm10, %v1932_v38, %v1477_v60  ;;  %v1475_v25 = vpop.permute.xlu0 %1474  ;;  %v1429_v60 = vrot.slane %v4537_v32, 1  ;;  %v4921_v38 = vld [vmem:[#allocation27_spill] sm:$0xff] }
 0x1fd   : > { %1036 = vrot.lane.b32.xlu1 %v4409_v51, %s3125_s22  ;;  %v1995_v36 = vsel %vm1953_vm10, %v1930_v9, %v1475_v25  ;;  %v1546_v9 = vsel %vm1498_vm3, %v4100_v45, %v4921_v38  ;;  %v4922_v25 = vld [vmem:[#allocation28_spill] sm:$0xff] }
 0x1fe   : > { %v2935_v39 = vpop.f32.mrf.mxu0  ;;  %1034 = vrot.lane.b32.xlu0 %v4415_v56, %s3125_s22  ;;  %2965 = vmatprep.mubr.msk.bf16.mxu1 %vm2061_vm11, %v1995_v36 }
 0x1ff   : > { %v4532_v35 = vpop.permute.xlu1 %1020  ;;  %v2205_v5 = vadd.f32 %v2935_v39, %v4365_v28  ;;  %2966 = vmatmul.mubr.msk.bf16.gmra.mxu1 %vm2061_vm11, %v1997_v6 }
 0x200   : > { %v2196_v51 = vpop.f32.mrf.mxu0  ;;  %v1019_v15 = vpop.permute.xlu0 %1018  ;;  %v1611_v36 = vsel %vm1563_vm4, %v1546_v9, %v4532_v35  ;;  %v4924_v9 = vld [vmem:[#allocation30_spill] sm:$0xff] }
 0x201   : > { %1110 = vrot.lane.b32.xlu1 %v4436_v61, %s3126_s27  ;;  %2429 = vst [vmem:[%s4371_s21 + $0x50] sm:$0xff] %v2205_v5  ;;  %v2197_v56 = vadd.f32 %v4365_v28, %v2196_v51  ;;  %v1348_v61 = vshll.u32 %v4537_v32, 16 }
 0x202   : > { %v2936_v50 = vpop.f32.mrf.mxu0  ;;  %1108 = vrot.lane.b32.xlu0 %v4445_v33, %s3126_s27 }
 0x203   : > { %v1095_v58 = vpop.permute.xlu1 %1094  ;;  %2427 = vst [vmem:[%s4371_s21 + $0x40] sm:$0xff] %v2197_v56  ;;  %v2490_v37 = vadd.f32 %v2489_v49, %v2197_v56  ;;  %v2560_v34 = vmul.f32 %v2197_v56, %v2197_v56  ;;  %v2208_v43 = vadd.f32 %v2936_v50, %v4365_v28  ;;  %v1350_v4 = vrot.slane %v1348_v61, 1 }
 0x204   : > { %v2199_v62 = vpop.f32.mrf.mxu0  ;;  %v1093_v17 = vpop.permute.xlu0 %1092 }
 0x205   : > { %1197 = vrot.lane.b32.xlu1 %v4479_v54, %s3127_s30  ;;  %v2623_v21 = vadd.f32 %v2622_v26, %v2560_v34  ;;  %2430 = vst [vmem:[%s4371_s21 + $0x58] sm:$0xff] %v2208_v43  ;;  %v2200_v33 = vadd.f32 %v4365_v28, %v2199_v62  ;;  %v1359_v54 = vor.u32 %v1357_v42, %v1355_v1 }
 0x206   : > { %1195 = vrot.lane.b32.xlu0 %v4485_v7, %s3127_s30  ;;  %v2562_v26 = vmul.f32 %v2205_v5, %v2205_v5  ;;  %v2563_v8 = vmul.f32 %v2208_v43, %v2208_v43  ;;  %v1351_v0 = vor.u32 %v1350_v4, %v1346_v16 }
 0x207   : > { %v1182_v49 = vpop.permute.xlu1 %1181  ;;  %2428 = vst [vmem:[%s4371_s21 + $0x48] sm:$0xff] %v2200_v33  ;;  %v2491_v57 = vadd.f32 %v2490_v37, %v2200_v33  ;;  %v2561_v59 = vmul.f32 %v2200_v33, %v2200_v33  ;;  %v1364_v18 = vsel %vm508_vm0, %v1359_v54, %v1363_v27 }
 0x208   : > { %v1180_v41 = vpop.permute.xlu0 %1179 }
 0x209   : > { %1266 = vrot.lane.b32.xlu1 %v4494_v55, %s3128_s7  ;;  %v2492_v22 = vadd.f32 %v2491_v57, %v2205_v5  ;;  %v2624_v44 = vadd.f32 %v2623_v21, %v2561_v59  ;;  %v1430_v55 = vrot.slane %v4526_v12, 1 }
 0x20a   : > { %1264 = vrot.lane.b32.xlu0 %v4507_v3, %s3128_s7  ;;  %v1356_v3 = vsel %vm508_vm0, %v1351_v0, %v1355_v1 }
 0x20b   : > { %v1251_v7 = vpop.permute.xlu1 %1250  ;;  %v2625_v31 = vadd.f32 %v2624_v44, %v2562_v26  ;;  %v2493_v52 = vadd.f32 %v2492_v22, %v2208_v43  ;;  %v1433_v6 = vsel %vm893_vm1, %v1430_v55, %v1432_v19  ;;  %v1431_v51 = vsel %vm893_vm1, %v1429_v60, %v1430_v55 }
 0x20c   : > { %v1249_v11 = vpop.permute.xlu0 %1248 }
 0x20d   : > { %1340 = vrot.lane.b32.xlu1 %v4526_v12, %s3129_s10  ;;  %v2626_v47 = vadd.f32 %v2625_v31, %v2563_v8  ;;  %v1544_v12 = vsel %vm1498_vm3, %v4093_v20, %v4922_v25 }
 0x20e   : > { %1338 = vrot.lane.b32.xlu0 %v4537_v32, %s3129_s10  ;;  %v1609_v5 = vsel %vm1563_vm4, %v1544_v12, %v1019_v15  ;;  %v1676_v32 = vsel %vm1628_vm5, %v1611_v36, %v1095_v58 }
 0x20f   : > { %v1325_v30 = vpop.permute.xlu1 %1324  ;;  %v1674_v45 = vsel %vm1628_vm5, %v1609_v5, %v1093_v17  ;;  %v1741_v40 = vsel %vm1693_vm6, %v1676_v32, %v1182_v49 }
 0x210   : > { %v1323_v2 = vpop.permute.xlu0 %1322  ;;  %v1739_v20 = vsel %vm1693_vm6, %v1674_v45, %v1180_v41  ;;  %v1806_v35 = vsel %vm1758_vm7, %v1741_v40, %v1251_v7 }
 0x211   : > { %1427 = vrot.lane.b32.xlu1 %v1364_v18, %s3130_s11  ;;  %v1804_v53 = vsel %vm1758_vm7, %v1739_v20, %v1249_v11  ;;  %v1871_v15 = vsel %vm1823_vm8, %v1806_v35, %v1325_v30 }
 0x212   : > { %1425 = vrot.lane.b32.xlu0 %v1356_v3, %s3130_s11  ;;  %v1869_v37 = vsel %vm1823_vm8, %v1804_v53, %v1323_v2  ;;  %v4923_v2 = vld [vmem:[#allocation29_spill] sm:$0xff] }
 0x213   : > { %v1412_v39 = vpop.permute.xlu1 %1411  ;;  %v1550_v38 = vsel %vm1498_vm3, %v4163_v24, %v4923_v2  ;;  %v4926_v2 = vld [vmem:[#allocation32_spill] sm:$0xff] }
 0x214   : > { %v1410_v56 = vpop.permute.xlu0 %1409  ;;  %v1936_v34 = vsel %vm1888_vm9, %v1871_v15, %v1412_v39 }
 0x215   : > { %1496 = vrot.lane.b32.xlu1 %v1433_v6, %s3131_s12  ;;  %v1934_v61 = vsel %vm1888_vm9, %v1869_v37, %v1410_v56  ;;  %v1548_v6 = vsel %vm1498_vm3, %v4173_v14, %v4924_v9 }
 0x216   : > { %v2939_v50 = vpop.f32.mrf.mxu0  ;;  %1494 = vrot.lane.b32.xlu0 %v1431_v51, %s3131_s12 }
 0x217   : > { %v1481_v58 = vpop.permute.xlu1 %1480  ;;  %v2221_v43 = vadd.f32 %v2939_v50, %v4365_v28 }
 0x218   : > { %v2001_v62 = vsel %vm1953_vm10, %v1936_v34, %v1481_v58  ;;  %v2212_v17 = vpop.f32.mrf.mxu0  ;;  %v1479_v1 = vpop.permute.xlu0 %1478 }
 0x219   : > { %2433 = vst [vmem:[%s4371_s21 + $0x70] sm:$0xff] %v2221_v43  ;;  %v2213_v42 = vadd.f32 %v4365_v28, %v2212_v17  ;;  %v1999_v21 = vsel %vm1953_vm10, %v1934_v61, %v1479_v1  ;;  %v2566_v7 = vmul.f32 %v2221_v43, %v2221_v43 }
 0x21a   : > { %v2940_v33 = vpop.f32.mrf.mxu0  ;;  %2969 = vmatprep.mubr.msk.bf16.mxu1 %vm2061_vm11, %v1999_v21 }
 0x21b   : > { %v1025_v23 = vpop.permute.xlu1 %1024  ;;  %2431 = vst [vmem:[%s4371_s21 + $0x60] sm:$0xff] %v2213_v42  ;;  %v2494_v49 = vadd.f32 %v2493_v52, %v2213_v42  ;;  %v2564_v57 = vmul.f32 %v2213_v42, %v2213_v42  ;;  %v2224_v59 = vadd.f32 %v2940_v33, %v4365_v28  ;;  %2970 = vmatmul.mubr.msk.bf16.gmra.mxu1 %vm2061_vm11, %v2001_v62 }
 0x21c   : > { %v2215_v16 = vpop.f32.mrf.mxu0  ;;  %v1023_v4 = vpop.permute.xlu0 %1022  ;;  %v1615_v25 = vsel %vm1563_vm4, %v1550_v38, %v1025_v23  ;;  %v1552_v38 = vsel %vm1498_vm3, %v4242_v48, %v4926_v2 }
 0x21d   : > { %v2627_v41 = vadd.f32 %v2626_v47, %v2564_v57  ;;  %2434 = vst [vmem:[%s4371_s21 + $0x78] sm:$0xff] %v2224_v59  ;;  %v2216_v54 = vadd.f32 %v4365_v28, %v2215_v16  ;;  %v2567_v52 = vmul.f32 %v2224_v59, %v2224_v59  ;;  %v1613_v12 = vsel %vm1563_vm4, %v1548_v6, %v1023_v4 }
 0x21f   : > { %v1099_v26 = vpop.permute.xlu1 %1098  ;;  %2432 = vst [vmem:[%s4371_s21 + $0x68] sm:$0xff] %v2216_v54  ;;  %v2495_v22 = vadd.f32 %v2494_v49, %v2216_v54  ;;  %v2565_v44 = vmul.f32 %v2216_v54, %v2216_v54 }
 0x220   : > { %v1097_v27 = vpop.permute.xlu0 %1096  ;;  %v1680_v5 = vsel %vm1628_vm5, %v1615_v25, %v1099_v26 }
 0x221   : > { %v2496_v8 = vadd.f32 %v2495_v22, %v2221_v43  ;;  %v2628_v31 = vadd.f32 %v2627_v41, %v2565_v44  ;;  %v1678_v32 = vsel %vm1628_vm5, %v1613_v12, %v1097_v27 }
 0x223   : > { %v1186_v0 = vpop.permute.xlu1 %1185  ;;  %v2629_v11 = vadd.f32 %v2628_v31, %v2566_v7  ;;  %v2497_v18 = vadd.f32 %v2496_v8, %v2224_v59 }
 0x224   : > { %v1184_v55 = vpop.permute.xlu0 %1183  ;;  %v1745_v45 = vsel %vm1693_vm6, %v1680_v5, %v1186_v0 }
 0x225   : > { %v2630_v19 = vadd.f32 %v2629_v11, %v2567_v52  ;;  %v1743_v24 = vsel %vm1693_vm6, %v1678_v32, %v1184_v55 }
 0x227   : > { %v1255_v30 = vpop.permute.xlu1 %1254 }
 0x228   : > { %v1253_v3 = vpop.permute.xlu0 %1252  ;;  %v1810_v14 = vsel %vm1758_vm7, %v1745_v45, %v1255_v30 }
 0x229   : > { %v1808_v20 = vsel %vm1758_vm7, %v1743_v24, %v1253_v3 }
 0x22b   : > { %v1329_v47 = vpop.permute.xlu1 %1328 }
 0x22c   : > { %v1327_v60 = vpop.permute.xlu0 %1326  ;;  %v1875_v53 = vsel %vm1823_vm8, %v1810_v14, %v1329_v47  ;;  %v4925_v47 = vld [vmem:[#allocation31_spill] sm:$0xff] }
 0x22d   : > { %v1873_v15 = vsel %vm1823_vm8, %v1808_v20, %v1327_v60  ;;  %v1554_v60 = vsel %vm1498_vm3, %v4234_v46, %v4925_v47 }
 0x22e   : > { %v2943_v36 = vpop.f32.mrf.mxu0 }
 0x22f   : > { %v1416_v39 = vpop.permute.xlu1 %1415  ;;  %v2237_v51 = vadd.f32 %v2943_v36, %v4365_v28 }
 0x230   : > { %v2228_v40 = vpop.f32.mrf.mxu0  ;;  %v1414_v56 = vpop.permute.xlu0 %1413  ;;  %v1940_v37 = vsel %vm1888_vm9, %v1875_v53, %v1416_v39 }
 0x231   : > { %2437 = vst [vmem:[%s4371_s21 + $0x90] sm:$0xff] %v2237_v51  ;;  %v2229_v35 = vadd.f32 %v4365_v28, %v2228_v40  ;;  %v1938_v62 = vsel %vm1888_vm9, %v1873_v15, %v1414_v56  ;;  %v2570_v4 = vmul.f32 %v2237_v51, %v2237_v51 }
 0x232   : > { %v2944_v50 = vpop.f32.mrf.mxu0 }
 0x233   : > { %v1485_v58 = vpop.permute.xlu1 %1484  ;;  %2435 = vst [vmem:[%s4371_s21 + $0x80] sm:$0xff] %v2229_v35  ;;  %v2498_v34 = vadd.f32 %v2497_v18, %v2229_v35  ;;  %v2568_v43 = vmul.f32 %v2229_v35, %v2229_v35  ;;  %v2240_v61 = vadd.f32 %v2944_v50, %v4365_v28 }
 0x234   : > { %v2005_v17 = vsel %vm1953_vm10, %v1940_v37, %v1485_v58  ;;  %v2231_v1 = vpop.f32.mrf.mxu0  ;;  %v1483_v42 = vpop.permute.xlu0 %1482 }
 0x235   : > { %v2631_v21 = vadd.f32 %v2630_v19, %v2568_v43  ;;  %2438 = vst [vmem:[%s4371_s21 + $0x98] sm:$0xff] %v2240_v61  ;;  %v2232_v33 = vadd.f32 %v4365_v28, %v2231_v1  ;;  %v2003_v23 = vsel %vm1953_vm10, %v1938_v62, %v1483_v42  ;;  %v2571_v22 = vmul.f32 %v2240_v61, %v2240_v61 }
 0x236   : > { %2973 = vmatprep.mubr.msk.bf16.mxu1 %vm2061_vm11, %v2003_v23 }
 0x237   : > { %v1029_v49 = vpop.permute.xlu1 %1028  ;;  %2436 = vst [vmem:[%s4371_s21 + $0x88] sm:$0xff] %v2232_v33  ;;  %v2499_v57 = vadd.f32 %v2498_v34, %v2232_v33  ;;  %v2569_v59 = vmul.f32 %v2232_v33, %v2232_v33  ;;  %2974 = vmatmul.mubr.msk.bf16.gmra.mxu1 %vm2061_vm11, %v2005_v17 }
 0x238   : > { %v1027_v16 = vpop.permute.xlu0 %1026  ;;  %v1619_v6 = vsel %vm1563_vm4, %v1554_v60, %v1029_v49  ;;  %v4928_v60 = vld [vmem:[#allocation34_spill] sm:$0xff] }
 0x239   : > { %v2500_v41 = vadd.f32 %v2499_v57, %v2237_v51  ;;  %v2632_v54 = vadd.f32 %v2631_v21, %v2569_v59  ;;  %v1617_v25 = vsel %vm1563_vm4, %v1552_v38, %v1027_v16  ;;  %v1556_v2 = vsel %vm1498_vm3, %v4310_v10, %v4928_v60 }
 0x23b   : > { %v1103_v26 = vpop.permute.xlu1 %1102  ;;  %v2633_v44 = vadd.f32 %v2632_v54, %v2570_v4  ;;  %v2501_v27 = vadd.f32 %v2500_v41, %v2240_v61 }
 0x23c   : > { %v1101_v7 = vpop.permute.xlu0 %1100  ;;  %v1684_v39 = vsel %vm1628_vm5, %v1619_v6, %v1103_v26 }
 0x23d   : > { %v2634_v8 = vadd.f32 %v2633_v44, %v2571_v22  ;;  %v1682_v48 = vsel %vm1628_vm5, %v1617_v25, %v1101_v7 }
 0x23f   : > { %v1190_v31 = vpop.permute.xlu1 %1189 }
 0x240   : > { %v1188_v0 = vpop.permute.xlu0 %1187  ;;  %v1749_v51 = vsel %vm1693_vm6, %v1684_v39, %v1190_v31 }
 0x241   : > { %v1747_v40 = vsel %vm1693_vm6, %v1682_v48, %v1188_v0 }
 0x243   : > { %v1259_v52 = vpop.permute.xlu1 %1258 }
 0x244   : > { %v1257_v11 = vpop.permute.xlu0 %1256  ;;  %v1814_v56 = vsel %vm1758_vm7, %v1749_v51, %v1259_v52 }
 0x245   : > { %v1812_v35 = vsel %vm1758_vm7, %v1747_v40, %v1257_v11 }
 0x246   : > { %v2947_v18 = vpop.f32.mrf.mxu0 }
 0x247   : > { %v1333_v55 = vpop.permute.xlu1 %1332  ;;  %v2253_v19 = vadd.f32 %v2947_v18, %v4365_v28 }
 0x248   : > { %v2244_v30 = vpop.f32.mrf.mxu0  ;;  %v1331_v3 = vpop.permute.xlu0 %1330  ;;  %v1879_v53 = vsel %vm1823_vm8, %v1814_v56, %v1333_v55 }
 0x249   : > { %2441 = vst [vmem:[%s4371_s21 + $0xb0] sm:$0xff] %v2253_v19  ;;  %v2245_v9 = vadd.f32 %v4365_v28, %v2244_v30  ;;  %v1877_v50 = vsel %vm1823_vm8, %v1812_v35, %v1331_v3  ;;  %v2574_v17 = vmul.f32 %v2253_v19, %v2253_v19  ;;  %v4927_v3 = vld [vmem:[#allocation33_spill] sm:$0xff] }
 0x24a   : > { %v2948_v12 = vpop.f32.mrf.mxu0  ;;  %v1558_v47 = vsel %vm1498_vm3, %v4303_v13, %v4927_v3 }
 0x24b   : > { %v1420_v36 = vpop.permute.xlu1 %1419  ;;  %2439 = vst [vmem:[%s4371_s21 + $0xa0] sm:$0xff] %v2245_v9  ;;  %v2502_v5 = vadd.f32 %v2501_v27, %v2245_v9  ;;  %v2572_v32 = vmul.f32 %v2245_v9, %v2245_v9  ;;  %v2256_v46 = vadd.f32 %v2948_v12, %v4365_v28 }
 0x24c   : > { %v2247_v45 = vpop.f32.mrf.mxu0  ;;  %v1418_v24 = vpop.permute.xlu0 %1417  ;;  %v1944_v58 = vsel %vm1888_vm9, %v1879_v53, %v1420_v36 }
 0x24d   : > { %v2635_v14 = vadd.f32 %v2634_v8, %v2572_v32  ;;  %2442 = vst [vmem:[%s4371_s21 + $0xb8] sm:$0xff] %v2256_v46  ;;  %v2248_v20 = vadd.f32 %v4365_v28, %v2247_v45  ;;  %v1942_v43 = vsel %vm1888_vm9, %v1877_v50, %v1418_v24  ;;  %v2575_v23 = vmul.f32 %v2256_v46, %v2256_v46 }
 0x24f   : > { %v1489_v15 = vpop.permute.xlu1 %1488  ;;  %2440 = vst [vmem:[%s4371_s21 + $0xa8] sm:$0xff] %v2248_v20  ;;  %v2503_v37 = vadd.f32 %v2502_v5, %v2248_v20  ;;  %v2573_v34 = vmul.f32 %v2248_v20, %v2248_v20 }
 0x250   : > { %v2009_v61 = vsel %vm1953_vm10, %v1944_v58, %v1489_v15  ;;  %v1487_v62 = vpop.permute.xlu0 %1486 }
 0x251   : > { %v2504_v1 = vadd.f32 %v2503_v37, %v2253_v19  ;;  %v2636_v42 = vadd.f32 %v2635_v14, %v2573_v34  ;;  %v2007_v21 = vsel %vm1953_vm10, %v1942_v43, %v1487_v62 }
 0x252   : > { %2977 = vmatprep.mubr.msk.bf16.mxu1 %vm2061_vm11, %v2007_v21 }
 0x253   : > { %v1033_v33 = vpop.permute.xlu1 %1032  ;;  %v2637_v49 = vadd.f32 %v2636_v42, %v2574_v17  ;;  %2978 = vmatmul.mubr.msk.bf16.gmra.mxu1 %vm2061_vm11, %v2009_v61  ;;  %v2505_v57 = vadd.f32 %v2504_v1, %v2256_v46 }
 0x254   : > { %v1031_v59 = vpop.permute.xlu0 %1030  ;;  %v1623_v6 = vsel %vm1563_vm4, %v1558_v47, %v1033_v33 }
 0x255   : > { %v2638_v16 = vadd.f32 %v2637_v49, %v2575_v23  ;;  %v1621_v25 = vsel %vm1563_vm4, %v1556_v2, %v1031_v59 }
 0x257   : > { %v1107_v4 = vpop.permute.xlu1 %1106 }
 0x258   : > { %v1105_v41 = vpop.permute.xlu0 %1104  ;;  %v1688_v36 = vsel %vm1628_vm5, %v1623_v6, %v1107_v4 }
 0x259   : > { %v1686_v39 = vsel %vm1628_vm5, %v1621_v25, %v1105_v41 }
 0x25b   : > { %v1194_v54 = vpop.permute.xlu1 %1193 }
 0x25c   : > { %v1192_v26 = vpop.permute.xlu0 %1191  ;;  %v1753_v32 = vsel %vm1693_vm6, %v1688_v36, %v1194_v54 }
 0x25d   : > { %v1751_v10 = vsel %vm1693_vm6, %v1686_v39, %v1192_v26 }
 0x25e   : > { %v2951_v22 = vpop.f32.mrf.mxu0 }
 0x25f   : > { %v1263_v44 = vpop.permute.xlu1 %1262  ;;  %v2269_v27 = vadd.f32 %v2951_v22, %v4365_v28 }
 0x260   : > { %v2260_v7 = vpop.f32.mrf.mxu0  ;;  %v1261_v8 = vpop.permute.xlu0 %1260  ;;  %v1818_v51 = vsel %vm1758_vm7, %v1753_v32, %v1263_v44 }
 0x261   : > { %2445 = vst [vmem:[%s4371_s21 + $0xd0] sm:$0xff] %v2269_v27  ;;  %v2261_v31 = vadd.f32 %v4365_v28, %v2260_v7  ;;  %v2578_v48 = vmul.f32 %v2269_v27, %v2269_v27  ;;  %v1816_v40 = vsel %vm1758_vm7, %v1751_v10, %v1261_v8 }
 0x262   : > { %v2952_v0 = vpop.f32.mrf.mxu0 }
 0x263   : > { %v1337_v52 = vpop.permute.xlu1 %1336  ;;  %2443 = vst [vmem:[%s4371_s21 + $0xc0] sm:$0xff] %v2261_v31  ;;  %v2506_v11 = vadd.f32 %v2505_v57, %v2261_v31  ;;  %v2576_v18 = vmul.f32 %v2261_v31, %v2261_v31  ;;  %v2272_v55 = vadd.f32 %v2952_v0, %v4365_v28 }
 0x264   : > { %v2263_v19 = vpop.f32.mrf.mxu0  ;;  %v1335_v30 = vpop.permute.xlu0 %1334  ;;  %v1883_v14 = vsel %vm1823_vm8, %v1818_v51, %v1337_v52  ;;  %v4929_v52 = vld [vmem:[#allocation2_spill] sm:$0xff] }
 0x265   : > { %v2639_v38 = vadd.f32 %v2638_v16, %v2576_v18  ;;  %2446 = vst [vmem:[%s4371_s21 + $0xd8] sm:$0xff] %v2272_v55  ;;  %v2264_v9 = vadd.f32 %v4365_v28, %v2263_v19  ;;  %v2579_v56 = vmul.f32 %v2272_v55, %v2272_v55  ;;  %v1881_v53 = vsel %vm1823_vm8, %v1816_v40, %v1335_v30 }
 0x267   : > { %v1424_v12 = vpop.permute.xlu1 %1423  ;;  %2444 = vst [vmem:[%s4371_s21 + $0xc8] sm:$0xff] %v2264_v9  ;;  %v2507_v5 = vadd.f32 %v2506_v11, %v2264_v9  ;;  %v2577_v13 = vmul.f32 %v2264_v9, %v2264_v9  ;;  %v1562_v11 = vsel %vm1498_vm3, %v4386_v29, %v4929_v52 }
 0x268   : > { %v1422_v46 = vpop.permute.xlu0 %1421  ;;  %v1948_v15 = vsel %vm1888_vm9, %v1883_v14, %v1424_v12 }
 0x269   : > { %v2508_v45 = vadd.f32 %v2507_v5, %v2269_v27  ;;  %v2640_v24 = vadd.f32 %v2639_v38, %v2577_v13  ;;  %v1946_v58 = vsel %vm1888_vm9, %v1881_v53, %v1422_v46 }
 0x26b   : > { %v1493_v20 = vpop.permute.xlu1 %1492  ;;  %v2641_v35 = vadd.f32 %v2640_v24, %v2578_v48  ;;  %v2509_v50 = vadd.f32 %v2508_v45, %v2272_v55  ;;  %v4930_v55 = vld [vmem:[#allocation35_spill] sm:$0xff] }
 0x26c   : > { %v2013_v37 = vsel %vm1953_vm10, %v1948_v15, %v1493_v20  ;;  %v1491_v34 = vpop.permute.xlu0 %1490  ;;  %v1560_v19 = vsel %vm1498_vm3, %v4395_v63, %v4930_v55 }
 0x26d   : > { %v2011_v43 = vsel %vm1953_vm10, %v1946_v58, %v1491_v34  ;;  %v2642_v61 = vadd.f32 %v2641_v35, %v2579_v56 }
 0x26e   : > { %2981 = vmatprep.mubr.msk.bf16.mxu1 %vm2061_vm11, %v2011_v43 }
 0x26f   : > { %v1037_v62 = vpop.permute.xlu1 %1036  ;;  %2982 = vmatmul.mubr.msk.bf16.gmra.mxu1 %vm2061_vm11, %v2013_v37 }
 0x270   : > { %v1035_v17 = vpop.permute.xlu0 %1034  ;;  %v1627_v60 = vsel %vm1563_vm4, %v1562_v11, %v1037_v62 }
 0x271   : > { %v1625_v2 = vsel %vm1563_vm4, %v1560_v19, %v1035_v17 }
 0x273   : > { %v1111_v1 = vpop.permute.xlu1 %1110 }
 0x274   : > { %v1109_v42 = vpop.permute.xlu0 %1108  ;;  %v1692_v9 = vsel %vm1628_vm5, %v1627_v60, %v1111_v1 }
 0x275   : > { %v1690_v29 = vsel %vm1628_vm5, %v1625_v2, %v1109_v42 }
 0x276   : > { %v2955_v21 = vpop.f32.mrf.mxu0 }
 0x277   : > { %v1198_v33 = vpop.permute.xlu1 %1197  ;;  %v2285_v23 = vadd.f32 %v2955_v21, %v4365_v28 }
 0x278   : > { %v2276_v49 = vpop.f32.mrf.mxu0  ;;  %v1196_v57 = vpop.permute.xlu0 %1195  ;;  %v1757_v36 = vsel %vm1693_vm6, %v1692_v9, %v1198_v33 }
 0x279   : > { %2449 = vst [vmem:[%s4371_s21 + $0xf0] sm:$0xff] %v2285_v23  ;;  %v2277_v59 = vadd.f32 %v4365_v28, %v2276_v49  ;;  %v2582_v30 = vmul.f32 %v2285_v23, %v2285_v23  ;;  %v1755_v63 = vsel %vm1693_vm6, %v1690_v29, %v1196_v57 }
 0x27a   : > { %v2956_v16 = vpop.f32.mrf.mxu0 }
 0x27b   : > { %v1267_v4 = vpop.permute.xlu1 %1266  ;;  %2447 = vst [vmem:[%s4371_s21 + $0xe0] sm:$0xff] %v2277_v59  ;;  %v2510_v41 = vadd.f32 %v2509_v50, %v2277_v59  ;;  %v2580_v54 = vmul.f32 %v2277_v59, %v2277_v59  ;;  %v2288_v26 = vadd.f32 %v2956_v16, %v4365_v28  ;;  %v4739_v16 = vld [vmem:[%s4806_s2] ss:$0 sm:$0xff] }
 0x27c   : > { %v2279_v22 = vpop.f32.mrf.mxu0  ;;  %v1265_v44 = vpop.permute.xlu0 %1264  ;;  %v1822_v5 = vsel %vm1758_vm7, %v1757_v36, %v1267_v4 }
 0x27d   : > { %v2643_v27 = vadd.f32 %v2642_v61, %v2580_v54  ;;  %2450 = vst [vmem:[%s4371_s21 + $0xf8] sm:$0xff] %v2288_v26  ;;  %v2280_v7 = vadd.f32 %v4365_v28, %v2279_v22  ;;  %v2583_v6 = vmul.f32 %v2288_v26, %v2288_v26  ;;  %v1820_v32 = vsel %vm1758_vm7, %v1755_v63, %v1265_v44 }
 0x27f   : > { %v1341_v8 = vpop.permute.xlu1 %1340  ;;  %2448 = vst [vmem:[%s4371_s21 + $0xe8] sm:$0xff] %v2280_v7  ;;  %v2511_v31 = vadd.f32 %v2510_v41, %v2280_v7  ;;  %v2581_v0 = vmul.f32 %v2280_v7, %v2280_v7 }
 0x280   : > { %v1339_v18 = vpop.permute.xlu0 %1338  ;;  %v1887_v10 = vsel %vm1823_vm8, %v1822_v5, %v1341_v8 }
 0x281   : > { %v2512_v3 = vadd.f32 %v2511_v31, %v2285_v23  ;;  %v2644_v47 = vadd.f32 %v2643_v27, %v2581_v0  ;;  %v1885_v48 = vsel %vm1823_vm8, %v1820_v32, %v1339_v18 }
 0x283   : > { %v1428_v38 = vpop.permute.xlu1 %1427  ;;  %v2645_v25 = vadd.f32 %v2644_v47, %v2582_v30  ;;  %v2513_v12 = vadd.f32 %v2512_v3, %v2288_v26 }
 0x284   : > { %v1426_v39 = vpop.permute.xlu0 %1425  ;;  %v1952_v51 = vsel %vm1888_vm9, %v1887_v10, %v1428_v38 }
 0x285   : > { %v2646_v13 = vadd.f32 %v2645_v25, %v2583_v6  ;;  %v1950_v45 = vsel %vm1888_vm9, %v1885_v48, %v1426_v39 }
 0x287   : > { %v1497_v46 = vpop.permute.xlu1 %1496 }
 0x288   : > { %v2017_v24 = vsel %vm1953_vm10, %v1952_v51, %v1497_v46  ;;  %v1495_v40 = vpop.permute.xlu0 %1494 }
 0x289   : > { %v2015_v56 = vsel %vm1953_vm10, %v1950_v45, %v1495_v40 }
 0x28a   : > { %2985 = vmatprep.mubr.msk.bf16.mxu1 %vm2061_vm11, %v2015_v56 }
 0x28b   : > { %2986 = vmatmul.mubr.msk.bf16.gmra.mxu1 %vm2061_vm11, %v2017_v24 }
 0x28e   : > { %v2959_v14 = vpop.f32.mrf.mxu1 }
 0x28f   : > { %v2301_v20 = vadd.f32 %v2959_v14, %v4365_v28 }
 0x290   : > { %v2292_v35 = vpop.f32.mrf.mxu1 }
 0x291   : > { %2453 = vst [vmem:[%s4371_s21 + $0x110] sm:$0xff] %v2301_v20  ;;  %v2293_v53 = vadd.f32 %v4365_v28, %v2292_v35  ;;  %v2586_v1 = vmul.f32 %v2301_v20, %v2301_v20 }
 0x292   : > { %v2960_v15 = vpop.f32.mrf.mxu1 }
 0x293   : > { %2451 = vst [vmem:[%s4371_s21 + $0x100] sm:$0xff] %v2293_v53  ;;  %v2514_v50 = vadd.f32 %v2513_v12, %v2293_v53  ;;  %v2584_v58 = vmul.f32 %v2293_v53, %v2293_v53  ;;  %v2304_v37 = vadd.f32 %v2960_v15, %v4365_v28 }
 0x294   : > { %v2295_v34 = vpop.f32.mrf.mxu1 }
 0x295   : > { %v2647_v43 = vadd.f32 %v2646_v13, %v2584_v58  ;;  %2454 = vst [vmem:[%s4371_s21 + $0x118] sm:$0xff] %v2304_v37  ;;  %v2296_v61 = vadd.f32 %v4365_v28, %v2295_v34  ;;  %v2587_v33 = vmul.f32 %v2304_v37, %v2304_v37 }
 0x297   : > { %2452 = vst [vmem:[%s4371_s21 + $0x108] sm:$0xff] %v2296_v61  ;;  %v2515_v62 = vadd.f32 %v2514_v50, %v2296_v61  ;;  %v2585_v17 = vmul.f32 %v2296_v61, %v2296_v61 }
 0x299   : > { %v2516_v42 = vadd.f32 %v2515_v62, %v2301_v20  ;;  %v2648_v21 = vadd.f32 %v2647_v43, %v2585_v17 }
 0x29b   : > { %v2649_v23 = vadd.f32 %v2648_v21, %v2586_v1  ;;  %v2517_v49 = vadd.f32 %v2516_v42, %v2304_v37 }
 0x29d   : > { %v2650_v57 = vadd.f32 %v2649_v23, %v2587_v33 }
 0x2a6   : > { %v2963_v59 = vpop.f32.mrf.mxu1 }
 0x2a7   : > { %v2317_v28 = vadd.f32 %v4739_v16, %v2963_v59 }
 0x2a8   : > { %v2308_v4 = vpop.f32.mrf.mxu1 }
 0x2a9   : > { %2457 = vst [vmem:[%s4371_s21 + $0x130] sm:$0xff] %v2317_v28  ;;  %v2309_v41 = vadd.f32 %v4739_v16, %v2308_v4  ;;  %v2590_v52 = vmul.f32 %v2317_v28, %v2317_v28 }
 0x2aa   : > { %v2964_v54 = vpop.f32.mrf.mxu1 }
 0x2ab   : > { %2455 = vst [vmem:[%s4371_s21 + $0x120] sm:$0xff] %v2309_v41  ;;  %v2518_v26 = vadd.f32 %v2517_v49, %v2309_v41  ;;  %v2588_v22 = vmul.f32 %v2309_v41, %v2309_v41  ;;  %v2320_v44 = vadd.f32 %v4739_v16, %v2964_v54 }
 0x2ac   : > { %v2311_v27 = vpop.f32.mrf.mxu1 }
 0x2ad   : > { %v2651_v7 = vadd.f32 %v2650_v57, %v2588_v22  ;;  %2458 = vst [vmem:[%s4371_s21 + $0x138] sm:$0xff] %v2320_v44  ;;  %v2312_v8 = vadd.f32 %v4739_v16, %v2311_v27  ;;  %v2591_v55 = vmul.f32 %v2320_v44, %v2320_v44 }
 0x2af   : > { %2456 = vst [vmem:[%s4371_s21 + $0x128] sm:$0xff] %v2312_v8  ;;  %v2519_v31 = vadd.f32 %v2518_v26, %v2312_v8  ;;  %v2589_v0 = vmul.f32 %v2312_v8, %v2312_v8 }
 0x2b1   : > { %v2520_v11 = vadd.f32 %v2519_v31, %v2317_v28  ;;  %v2652_v18 = vadd.f32 %v2651_v7, %v2589_v0 }
 0x2b3   : > { %v2653_v19 = vadd.f32 %v2652_v18, %v2590_v52  ;;  %v2521_v30 = vadd.f32 %v2520_v11, %v2320_v44 }
 0x2b5   : > { %v2654_v3 = vadd.f32 %v2653_v19, %v2591_v55 }
 0x2bf   : > { %v2967_v47 = vpop.f32.mrf.mxu1 }
 0x2c0   : > { %v2333_v60 = vadd.f32 %v4739_v16, %v2967_v47 }
 0x2c1   : > { %v2324_v2 = vpop.f32.mrf.mxu1 }
 0x2c2   : > { %2461 = vst [vmem:[%s4371_s21 + $0x150] sm:$0xff] %v2333_v60  ;;  %v2325_v38 = vadd.f32 %v4739_v16, %v2324_v2  ;;  %v2594_v13 = vmul.f32 %v2333_v60, %v2333_v60 }
 0x2c3   : > { %v2968_v9 = vpop.f32.mrf.mxu1 }
 0x2c4   : > { %2459 = vst [vmem:[%s4371_s21 + $0x140] sm:$0xff] %v2325_v38  ;;  %v2522_v6 = vadd.f32 %v2521_v30, %v2325_v38  ;;  %v2592_v25 = vmul.f32 %v2325_v38, %v2325_v38  ;;  %v2336_v12 = vadd.f32 %v4739_v16, %v2968_v9 }
 0x2c5   : > { %v2327_v29 = vpop.f32.mrf.mxu1 }
 0x2c6   : > { %v2655_v36 = vadd.f32 %v2654_v3, %v2592_v25  ;;  %2462 = vst [vmem:[%s4371_s21 + $0x158] sm:$0xff] %v2336_v12  ;;  %v2328_v39 = vadd.f32 %v4739_v16, %v2327_v29  ;;  %v2595_v46 = vmul.f32 %v2336_v12, %v2336_v12 }
 0x2c8   : > { %2460 = vst [vmem:[%s4371_s21 + $0x148] sm:$0xff] %v2328_v39  ;;  %v2523_v63 = vadd.f32 %v2522_v6, %v2328_v39  ;;  %v2593_v5 = vmul.f32 %v2328_v39, %v2328_v39 }
 0x2ca   : > { %v2524_v32 = vadd.f32 %v2523_v63, %v2333_v60  ;;  %v2656_v10 = vadd.f32 %v2655_v36, %v2593_v5 }
 0x2cc   : > { %v2657_v48 = vadd.f32 %v2656_v10, %v2594_v13  ;;  %v2525_v51 = vadd.f32 %v2524_v32, %v2336_v12 }
 0x2ce   : > { %v2658_v45 = vadd.f32 %v2657_v48, %v2595_v46 }
 0x2db   : > { %v2971_v24 = vpop.f32.mrf.mxu1 }
 0x2dc   : > { %v2349_v40 = vadd.f32 %v4739_v16, %v2971_v24 }
 0x2dd   : > { %v2340_v56 = vpop.f32.mrf.mxu1 }
 0x2de   : > { %2465 = vst [vmem:[%s4371_s21 + $0x170] sm:$0xff] %v2349_v40  ;;  %v2341_v14 = vadd.f32 %v4739_v16, %v2340_v56  ;;  %v2598_v61 = vmul.f32 %v2349_v40, %v2349_v40 }
 0x2df   : > { %v2972_v20 = vpop.f32.mrf.mxu1 }
 0x2e0   : > { %2463 = vst [vmem:[%s4371_s21 + $0x160] sm:$0xff] %v2341_v14  ;;  %v2526_v35 = vadd.f32 %v2525_v51, %v2341_v14  ;;  %v2596_v53 = vmul.f32 %v2341_v14, %v2341_v14  ;;  %v2352_v15 = vadd.f32 %v4739_v16, %v2972_v20 }
 0x2e1   : > { %v2343_v50 = vpop.f32.mrf.mxu1 }
 0x2e2   : > { %v2659_v58 = vadd.f32 %v2658_v45, %v2596_v53  ;;  %2466 = vst [vmem:[%s4371_s21 + $0x178] sm:$0xff] %v2352_v15  ;;  %v2344_v37 = vadd.f32 %v4739_v16, %v2343_v50  ;;  %v2599_v1 = vmul.f32 %v2352_v15, %v2352_v15 }
 0x2e4   : > { %2464 = vst [vmem:[%s4371_s21 + $0x168] sm:$0xff] %v2344_v37  ;;  %v2527_v34 = vadd.f32 %v2526_v35, %v2344_v37  ;;  %v2597_v43 = vmul.f32 %v2344_v37, %v2344_v37 }
 0x2e6   : > { %v2528_v62 = vadd.f32 %v2527_v34, %v2349_v40  ;;  %v2660_v17 = vadd.f32 %v2659_v58, %v2597_v43 }
 0x2e8   : > { %v2661_v42 = vadd.f32 %v2660_v17, %v2598_v61  ;;  %v2529_v21 = vadd.f32 %v2528_v62, %v2352_v15 }
 0x2ea   : > { %v2662_v33 = vadd.f32 %v2661_v42, %v2599_v1 }
 0x2f7   : > { %v2975_v23 = vpop.f32.mrf.mxu1 }
 0x2f8   : > { %v2365_v49 = vadd.f32 %v4739_v16, %v2975_v23 }
 0x2f9   : > { %v2356_v57 = vpop.f32.mrf.mxu1 }
 0x2fa   : > { %2469 = vst [vmem:[%s4371_s21 + $0x190] sm:$0xff] %v2365_v49  ;;  %v2357_v59 = vadd.f32 %v4739_v16, %v2356_v57  ;;  %v2602_v8 = vmul.f32 %v2365_v49, %v2365_v49 }
 0x2fb   : > { %v2976_v28 = vpop.f32.mrf.mxu1 }
 0x2fc   : > { %2467 = vst [vmem:[%s4371_s21 + $0x180] sm:$0xff] %v2357_v59  ;;  %v2530_v4 = vadd.f32 %v2529_v21, %v2357_v59  ;;  %v2600_v41 = vmul.f32 %v2357_v59, %v2357_v59  ;;  %v2368_v54 = vadd.f32 %v4739_v16, %v2976_v28 }
 0x2fd   : > { %v2359_v26 = vpop.f32.mrf.mxu1 }
 0x2fe   : > { %2470 = vst [vmem:[%s4371_s21 + $0x198] sm:$0xff] %v2368_v54  ;;  %v2360_v22 = vadd.f32 %v4739_v16, %v2359_v26  ;;  %v2663_v44 = vadd.f32 %v2662_v33, %v2600_v41  ;;  %v2603_v52 = vmul.f32 %v2368_v54, %v2368_v54 }
 0x300   : > { %2468 = vst [vmem:[%s4371_s21 + $0x188] sm:$0xff] %v2360_v22  ;;  %v2531_v27 = vadd.f32 %v2530_v4, %v2360_v22  ;;  %v2601_v7 = vmul.f32 %v2360_v22, %v2360_v22 }
 0x302   : > { %v2532_v31 = vadd.f32 %v2531_v27, %v2365_v49  ;;  %v2664_v0 = vadd.f32 %v2663_v44, %v2601_v7 }
 0x304   : > { %v2665_v11 = vadd.f32 %v2664_v0, %v2602_v8  ;;  %v2533_v18 = vadd.f32 %v2532_v31, %v2368_v54 }
 0x306   : > { %v2666_v55 = vadd.f32 %v2665_v11, %v2603_v52 }
 0x313   : > { %v2979_v19 = vpop.f32.mrf.mxu1 }
 0x314   : > { %v2381_v30 = vadd.f32 %v4739_v16, %v2979_v19 }
 0x315   : > { %v2372_v3 = vpop.f32.mrf.mxu1 }
 0x316   : > { %2473 = vst [vmem:[%s4371_s21 + $0x1b0] sm:$0xff] %v2381_v30  ;;  %v2373_v47 = vadd.f32 %v4739_v16, %v2372_v3  ;;  %v2606_v45 = vmul.f32 %v2381_v30, %v2381_v30 }
 0x317   : > { %v2980_v60 = vpop.f32.mrf.mxu1 }
 0x318   : > { %2471 = vst [vmem:[%s4371_s21 + $0x1a0] sm:$0xff] %v2373_v47  ;;  %v2384_v2 = vadd.f32 %v4739_v16, %v2980_v60  ;;  %v2604_v13 = vmul.f32 %v2373_v47, %v2373_v47  ;;  %v2534_v32 = vadd.f32 %v2533_v18, %v2373_v47 }
 0x319   : > { %v2375_v38 = vpop.f32.mrf.mxu1 }
 0x31a   : > { %2474 = vst [vmem:[%s4371_s21 + $0x1b8] sm:$0xff] %v2384_v2  ;;  %v2376_v9 = vadd.f32 %v4739_v16, %v2375_v38  ;;  %v2667_v46 = vadd.f32 %v2666_v55, %v2604_v13  ;;  %v2607_v56 = vmul.f32 %v2384_v2, %v2384_v2 }
 0x31c   : > { %2472 = vst [vmem:[%s4371_s21 + $0x1a8] sm:$0xff] %v2376_v9  ;;  %v2605_v10 = vmul.f32 %v2376_v9, %v2376_v9  ;;  %v2535_v48 = vadd.f32 %v2534_v32, %v2376_v9 }
 0x31e   : > { %v2668_v51 = vadd.f32 %v2667_v46, %v2605_v10  ;;  %v2536_v24 = vadd.f32 %v2535_v48, %v2381_v30 }
 0x320   : > { %v2669_v40 = vadd.f32 %v2668_v51, %v2606_v45  ;;  %v2537_v14 = vadd.f32 %v2536_v24, %v2384_v2 }
 0x322   : > { %v2670_v53 = vadd.f32 %v2669_v40, %v2607_v56 }
 0x32f   : > { %v2983_v6 = vpop.f32.mrf.mxu1 }
 0x330   : > { %v2397_v25 = vadd.f32 %v4739_v16, %v2983_v6 }
 0x331   : > { %v2388_v12 = vpop.f32.mrf.mxu1 }
 0x332   : > { %2477 = vst [vmem:[%s4371_s21 + $0x1d0] sm:$0xff] %v2397_v25  ;;  %v2389_v29 = vadd.f32 %v4739_v16, %v2388_v12  ;;  %v2610_v43 = vmul.f32 %v2397_v25, %v2397_v25 }
 0x333   : > { %v2984_v36 = vpop.f32.mrf.mxu1 }
 0x334   : > { %2475 = vst [vmem:[%s4371_s21 + $0x1c0] sm:$0xff] %v2389_v29  ;;  %v2400_v39 = vadd.f32 %v4739_v16, %v2984_v36  ;;  %v2608_v20 = vmul.f32 %v2389_v29, %v2389_v29  ;;  %v2538_v35 = vadd.f32 %v2537_v14, %v2389_v29 }
 0x335   : > { %v2391_v63 = vpop.f32.mrf.mxu1 }
 0x336   : > { %2478 = vst [vmem:[%s4371_s21 + $0x1d8] sm:$0xff] %v2400_v39  ;;  %v2392_v5 = vadd.f32 %v4739_v16, %v2391_v63  ;;  %v2671_v50 = vadd.f32 %v2670_v53, %v2608_v20  ;;  %v2611_v33 = vmul.f32 %v2400_v39, %v2400_v39 }
 0x338   : > { %2476 = vst [vmem:[%s4371_s21 + $0x1c8] sm:$0xff] %v2392_v5  ;;  %v2609_v15 = vmul.f32 %v2392_v5, %v2392_v5  ;;  %v2539_v58 = vadd.f32 %v2538_v35, %v2392_v5 }
 0x33a   : > { %v2672_v37 = vadd.f32 %v2671_v50, %v2609_v15  ;;  %v2540_v61 = vadd.f32 %v2539_v58, %v2397_v25 }
 0x33c   : > { %v2673_v1 = vadd.f32 %v2672_v37, %v2610_v43  ;;  %v2541_v23 = vadd.f32 %v2540_v61, %v2400_v39 }
 0x33e   : > { %v2674_v4 = vadd.f32 %v2673_v1, %v2611_v33 }
 0x34b   : > { %v2987_v34 = vpop.f32.mrf.mxu1 }
 0x34c   : > { %v2413_v62 = vadd.f32 %v4739_v16, %v2987_v34 }
 0x34d   : > { %v2404_v17 = vpop.f32.mrf.mxu1 }
 0x34e   : > { %2481 = vst [vmem:[%s4371_s21 + $0x1f0] sm:$0xff] %v2413_v62  ;;  %v2405_v42 = vadd.f32 %v4739_v16, %v2404_v17  ;;  %v2614_v44 = vmul.f32 %v2413_v62, %v2413_v62 }
 0x34f   : > { %v2988_v21 = vpop.f32.mrf.mxu1 }
 0x350   : > { %2479 = vst [vmem:[%s4371_s21 + $0x1e0] sm:$0xff] %v2405_v42  ;;  %v2612_v49 = vmul.f32 %v2405_v42, %v2405_v42  ;;  %v2416_v57 = vadd.f32 %v4739_v16, %v2988_v21  ;;  %v2542_v28 = vadd.f32 %v2541_v23, %v2405_v42 }
 0x351   : > { %v2407_v59 = vpop.f32.mrf.mxu1 }
 0x352   : > { %2482 = vst [vmem:[%s4371_s21 + $0x1f8] sm:$0xff] %v2416_v57  ;;  %v2408_v41 = vadd.f32 %v4739_v16, %v2407_v59  ;;  %v2675_v54 = vadd.f32 %v2674_v4, %v2612_v49  ;;  %v2615_v8 = vmul.f32 %v2416_v57, %v2416_v57 }
 0x354   : > { %2480 = vst [vmem:[%s4371_s21 + $0x1e8] sm:$0xff] %v2408_v41  ;;  %v2543_v26 = vadd.f32 %v2542_v28, %v2408_v41  ;;  %v2613_v22 = vmul.f32 %v2408_v41, %v2408_v41 }
 0x356   : > { %v2544_v27 = vadd.f32 %v2543_v26, %v2413_v62  ;;  %v2676_v7 = vadd.f32 %v2675_v54, %v2613_v22 }
 0x358   : > { %v2545_v31 = vadd.f32 %v2544_v27, %v2416_v57  ;;  %v2677_v0 = vadd.f32 %v2676_v7, %v2614_v44 }
 0x35a   : > { %v2546_v52 = vrot.slane %v2545_v31, 4  ;;  %v2678_v11 = vadd.f32 %v2677_v0, %v2615_v8 }
 0x35c   : > { %v2547_v18 = vadd.f32 %v2546_v52, %v2545_v31  ;;  %v2679_v55 = vrot.slane %v2678_v11, 4 }
 0x35e   : > { %v2548_v19 = vrot.slane %v2547_v18, 2  ;;  %v2680_v30 = vadd.f32 %v2679_v55, %v2678_v11 }
 0x360   : > { %v2549_v3 = vadd.f32 %v2548_v19, %v2547_v18  ;;  %v2681_v47 = vrot.slane %v2680_v30, 2 }
 0x362   : > { %v2550_v16 = vrot.slane %v2549_v3, 1  ;;  %v2682_v60 = vadd.f32 %v2681_v47, %v2680_v30 }
 0x364   : > { %v2683_v2 = vrot.slane %v2682_v60, 1  ;;  %v2551_v38 = vadd.f32 %v2550_v16, %v2549_v3 }
 0x366   : > { %v2684_v9 = vadd.f32 %v2683_v2, %v2682_v60 }
 0x368   : > { %v2686_v6 = vsel %vm2685_vm12, %v2551_v38, %v2684_v9 }
 0x369   : > { %2687 = vst [vmem:[%s208_s26] sm:$0x3] %v2686_v6 }
 0x36a PF: > { %s15_s15 = sadd.s32 1, %s3122_s15  }
 0x36b   : > { %p12_p4 = scmp.ge.s32.totalorder %s15_s15, 6  }
 0x36d   :  { %14 = sbr.rel (!%p12_p4) target bundleno = 1 (0x1), region = 74 }

</bundles_post_ra>
